<compile_context>
chip_gen: v5e
topology: v5e:2x2
jax: 0.10.0
libtpu: 0.0.40
codegen_flags: <defaults>
</compile_context>

<pallas_src>
import functools

import jax
import jax.numpy as jnp
import numpy as np
from jax.experimental import pallas as pl
from jax.experimental.pallas import tpu as pltpu

INT4_OFFSET = 8  # symmetric int4: q in [-8, 7] stored as q + 8 in a nibble


# ----------------------------------------------------------------------------
# host-side packing (mirrors PackedINTSymmetricWeightsDequantizer.pack_weight)
# ----------------------------------------------------------------------------
def pack_int4_symmetric(weight_int: jnp.ndarray) -> jnp.ndarray:
    """weight_int: int32 values in [-8, 7], shape (..., I) with I even."""
    w = (weight_int + INT4_OFFSET).astype(jnp.uint8)            # 0..15
    low = w[..., 0::2]                                           # even elements
    high = w[..., 1::2]                                          # odd elements
    return (low | (high << 4)).astype(jnp.uint8)                 # (..., I//2)


# ----------------------------------------------------------------------------
# constant interleave (permutation) matrices for the in-kernel lane interleave
#   P_even[j, 2j]   = 1  -> low-nibble value j goes to output column 2j
#   P_odd [j, 2j+1] = 1  -> high-nibble value j goes to output column 2j+1
# ----------------------------------------------------------------------------
@functools.lru_cache(maxsize=None)
def _interleave_mats():
    j = np.arange(128)
    pe = np.zeros((128, 256), np.float32)
    po = np.zeros((128, 256), np.float32)
    pe[j, 2 * j] = 1.0
    po[j, 2 * j + 1] = 1.0
    return jnp.asarray(pe, dtype=jnp.bfloat16), jnp.asarray(po, dtype=jnp.bfloat16)


def _pick_tile(dim, cap, mult):
    """Largest multiple of `mult` that divides `dim` and is <= cap (dim % mult == 0)."""
    t = min(cap, dim)
    t -= t % mult
    while t > mult and dim % t != 0:
        t -= mult
    return max(t, mult)


# ----------------------------------------------------------------------------
# Pallas kernel: unpack + dequantize one (TR, CB) packed tile into an
# interleaved (TR, 2*CB) output tile, lane-dense, no wrapper-side relayout.
# ----------------------------------------------------------------------------
def _dequant_int4_kernel(n_sub, w_ref, s_ref, pe_ref, po_ref, o_ref):
    # w_ref : (TR, CB)   uint8 packed          (CB = n_sub * 128)
    # s_ref : (TR, 1)    float32 per-row scale
    # pe_ref: (128, 256) bf16 permutation (low nibble  -> even columns)
    # po_ref: (128, 256) bf16 permutation (high nibble -> odd  columns)
    # o_ref : (TR, 2*CB) result_dtype, interleaved output
    s = s_ref[...].astype(jnp.float32)          # (TR, 1) broadcast over lanes
    pe = pe_ref[...]
    po = po_ref[...]
    for j in range(n_sub):                      # static unroll, 128 packed cols / step
        # Chunk-local int32 widen keeps the shift safe; only (TR, 128) live at once.
        p = w_ref[:, j * 128:(j + 1) * 128].astype(jnp.int32)
        lo = ((p & 0xF) - INT4_OFFSET).astype(jnp.bfloat16)   # elements 2k   (exact)
        hi = ((p >> 4) - INT4_OFFSET).astype(jnp.bfloat16)    # elements 2k+1 (exact)
        # Interleave on the (idle) MXU: exact 0/1 permutation, f32 accumulate.
        x = (jnp.dot(lo, pe, preferred_element_type=jnp.float32) +
             jnp.dot(hi, po, preferred_element_type=jnp.float32))   # (TR, 256) ints
        o_ref[:, j * 256:(j + 1) * 256] = (x * s).astype(o_ref.dtype)


def dequantize_packed_int4_symmetric(packed, scale, quantized_weight_shape,
                                     result_dtype, result_shape,
                                     row_tile_cap=256, col_tile_cap=4096):
    O, I = quantized_weight_shape
    assert I % 2 == 0
    half = I // 2
    assert packed.shape == (O, half), (packed.shape, (O, half))
    assert half % 128 == 0, "in_features must be a multiple of 256"
    row_mult = 32 if O % 32 == 0 else 8
    assert O % row_mult == 0, "out_features must be a multiple of 8"

    tr = _pick_tile(O, row_tile_cap, row_mult)      # row tile (sublane-aligned)
    cb = _pick_tile(half, col_tile_cap, 128)        # packed-column tile (lane-aligned)
    n_sub = cb // 128

    pe, po = _interleave_mats()
    scale_f32 = scale.reshape(O, 1).astype(jnp.float32)

    out_bytes = O * I * jnp.dtype(result_dtype).itemsize
    cost = pl.CostEstimate(
        flops=2 * 256 * O * I + 2 * O * I,          # permutation matmuls + scale
        transcendentals=0,
        bytes_accessed=O * half + O * 4 + 2 * (128 * 256 * 2) + out_bytes,
    )

    out = pl.pallas_call(
        functools.partial(_dequant_int4_kernel, n_sub),
        out_shape=jax.ShapeDtypeStruct((O, I), result_dtype),
        grid_spec=pltpu.PrefetchScalarGridSpec(
            num_scalar_prefetch=0,
            grid=(O // tr, half // cb),
            in_specs=[
                pl.BlockSpec((tr, cb), lambda i, c: (i, c)),      # packed weight
                pl.BlockSpec((tr, 1), lambda i, c: (i, 0)),       # per-row scale
                pl.BlockSpec((128, 256), lambda i, c: (0, 0)),    # P_even (resident)
                pl.BlockSpec((128, 256), lambda i, c: (0, 0)),    # P_odd  (resident)
            ],
            out_specs=pl.BlockSpec((tr, 2 * cb), lambda i, c: (i, c)),
        ),
        compiler_params=pltpu.CompilerParams(
            dimension_semantics=("parallel", "parallel"),
            vmem_limit_bytes=32 * 1024 * 1024,
        ),
        cost_estimate=cost,
    )(packed, scale_f32, pe, po)

    # Row-major (O, I) -> result_shape is metadata-only (no second HBM pass).
    return out.reshape(result_shape)


# ----------------------------------------------------------------------------
# Module equivalent
# ----------------------------------------------------------------------------
class PackedINTSymmetricWeightsDequantizer:
    def __init__(self, scale, quantized_weight_shape, result_dtype, result_shape,
                 original_shape, weights_dtype, use_quantized_matmul=False, **kwargs):
        # TODO(synk): only the packed "int4" width is implemented (int2/int3/uint not needed here).
        assert weights_dtype == "int4"
        self.weights_dtype = weights_dtype
        self.original_shape = original_shape
        self.use_quantized_matmul = use_quantized_matmul
        self.quantized_weight_shape = tuple(quantized_weight_shape)
        self.result_dtype = result_dtype
        self.result_shape = tuple(result_shape)
        self.scale = scale.astype(result_dtype)

    def pack_weight(self, weight):
        return pack_int4_symmetric(weight)

    def forward(self, weight, skip_quantized_matmul=False, **kwargs):
        # TODO(synk): transposed / fused-into-matmul path for use_quantized_matmul=True
        # (skip_quantized_matmul) is not implemented; dequantized weight is materialized.
        assert not skip_quantized_matmul
        return dequantize_packed_int4_symmetric(
            weight, self.scale, self.quantized_weight_shape,
            self.result_dtype, self.result_shape)

    __call__ = forward


# ----------------------------------------------------------------------------
# demo / correctness check
# ----------------------------------------------------------------------------
if __name__ == "__main__":
    O, I = 512, 1024                    # small Linear weight (out_features, in_features)
    result_dtype = jnp.float32
    quantized_weight_shape = (O, I)
    result_shape = (O, I)
    original_shape = (O, I)

    key = jax.random.PRNGKey(0)
    k_w, k_s = jax.random.split(key)
    weight_int = jax.random.randint(k_w, (O, I), -8, 8, dtype=jnp.int32)   # symmetric int4 values
    scale = jax.random.uniform(k_s, (O, 1), dtype=jnp.float32,
                               minval=0.01, maxval=0.1)

    deq = PackedINTSymmetricWeightsDequantizer(
        scale=scale,
        quantized_weight_shape=quantized_weight_shape,
        result_dtype=result_dtype,
        result_shape=result_shape,
        original_shape=original_shape,
        weights_dtype="int4",
        use_quantized_matmul=False,
    )

    packed = deq.pack_weight(weight_int)          # (O, I//2) uint8
    out = deq(packed)                             # Pallas kernel dequantize
    out = jax.block_until_ready(out)

    ref = (weight_int.astype(result_dtype) * scale).reshape(result_shape)
    np.testing.assert_allclose(np.asarray(out), np.asarray(ref), rtol=1e-6, atol=1e-6)
    print("KERNEL_OK")
</pallas_src>

<mosaic_0001>
module attributes {stable_mosaic.version = 11 : i64} {
  func.func @_dequant_int4_kernel(%arg0: i32, %arg1: i32, %arg2: memref<256x512xi8, #tpu.memory_space<vmem>>, %arg3: memref<256x1xf32, #tpu.memory_space<vmem>>, %arg4: memref<128x256xbf16, #tpu.memory_space<vmem>>, %arg5: memref<128x256xbf16, #tpu.memory_space<vmem>>, %arg6: memref<256x1024xf32, #tpu.memory_space<vmem>>) attributes {dimension_semantics = [#tpu.dimension_semantics<parallel>, #tpu.dimension_semantics<parallel>], iteration_bounds = array<i64: 2, 1>, scalar_prefetch = 0 : i64, scratch_operands = 0 : i64, tpu.core_type = #tpu.core_type<tc>, window_params = [{transform_indices = @transform_0, window_bounds = array<i64: 256, 512>}, {transform_indices = @transform_1, window_bounds = array<i64: 256, 1>}, {pipeline_mode = #tpu.pipeline_mode<synchronous>, transform_indices = @transform_2, window_bounds = array<i64: 128, 256>}, {pipeline_mode = #tpu.pipeline_mode<synchronous>, transform_indices = @transform_3, window_bounds = array<i64: 128, 256>}, {transform_indices = @transform_4, window_bounds = array<i64: 256, 1024>}]} {
    %c0 = arith.constant 0 : index
    %c0_0 = arith.constant 0 : index
    %0 = vector.load %arg3[%c0, %c0_0] : memref<256x1xf32, #tpu.memory_space<vmem>>, vector<256x1xf32>
    %c0_1 = arith.constant 0 : index
    %c0_2 = arith.constant 0 : index
    %1 = vector.load %arg4[%c0_1, %c0_2] : memref<128x256xbf16, #tpu.memory_space<vmem>>, vector<128x256xbf16>
    %c0_3 = arith.constant 0 : index
    %c0_4 = arith.constant 0 : index
    %2 = vector.load %arg5[%c0_3, %c0_4] : memref<128x256xbf16, #tpu.memory_space<vmem>>, vector<128x256xbf16>
    %c0_5 = arith.constant 0 : index
    %c0_6 = arith.constant 0 : index
    %3 = vector.load %arg2[%c0_5, %c0_6] : memref<256x512xi8, #tpu.memory_space<vmem>>, vector<256x128xi8>
    %4 = arith.extui %3 : vector<256x128xi8> to vector<256x128xi32>
    %c15_i32 = arith.constant 15 : i32
    %5 = vector.broadcast %c15_i32 : i32 to vector<256x128xi32>
    %6 = arith.andi %4, %5 : vector<256x128xi32>
    %c8_i32 = arith.constant 8 : i32
    %7 = vector.broadcast %c8_i32 : i32 to vector<256x128xi32>
    %8 = arith.subi %6, %7 : vector<256x128xi32>
    %9 = arith.sitofp %8 : vector<256x128xi32> to vector<256x128xbf16>
    %c4_i32 = arith.constant 4 : i32
    %10 = vector.broadcast %c4_i32 : i32 to vector<256x128xi32>
    %11 = arith.shrsi %4, %10 : vector<256x128xi32>
    %c8_i32_7 = arith.constant 8 : i32
    %12 = vector.broadcast %c8_i32_7 : i32 to vector<256x128xi32>
    %13 = arith.subi %11, %12 : vector<256x128xi32>
    %14 = arith.sitofp %13 : vector<256x128xi32> to vector<256x128xbf16>
    %cst = arith.constant dense<0.000000e+00> : vector<256x256xf32>
    %15 = tpu.matmul %9, %1, %cst {dimension_numbers = #tpu.dot_dimension_numbers<[1], [0], [0], [1], [0, 0, 1, 1], [], []>} : vector<256x128xbf16>, vector<128x256xbf16>, vector<256x256xf32> -> vector<256x256xf32>
    %cst_8 = arith.constant dense<0.000000e+00> : vector<256x256xf32>
    %16 = tpu.matmul %14, %2, %cst_8 {dimension_numbers = #tpu.dot_dimension_numbers<[1], [0], [0], [1], [0, 0, 1, 1], [], []>} : vector<256x128xbf16>, vector<128x256xbf16>, vector<256x256xf32> -> vector<256x256xf32>
    %17 = arith.addf %15, %16 : vector<256x256xf32>
    %18 = vector.broadcast %0 : vector<256x1xf32> to vector<256x256xf32>
    %19 = arith.mulf %17, %18 : vector<256x256xf32>
    %c0_9 = arith.constant 0 : index
    %c0_10 = arith.constant 0 : index
    %20 = vector.load %arg6[%c0_9, %c0_10] : memref<256x1024xf32, #tpu.memory_space<vmem>>, vector<256x256xf32>
    tpu.vector_store %arg6[%c0_9, %c0_10], %19 {strides = array<i32>} : memref<256x1024xf32, #tpu.memory_space<vmem>>, vector<256x256xf32>,
    %c0_11 = arith.constant 0 : index
    %c128 = arith.constant 128 : index
    %21 = vector.load %arg2[%c0_11, %c128] : memref<256x512xi8, #tpu.memory_space<vmem>>, vector<256x128xi8>
    %22 = arith.extui %21 : vector<256x128xi8> to vector<256x128xi32>
    %c15_i32_12 = arith.constant 15 : i32
    %23 = vector.broadcast %c15_i32_12 : i32 to vector<256x128xi32>
    %24 = arith.andi %22, %23 : vector<256x128xi32>
    %c8_i32_13 = arith.constant 8 : i32
    %25 = vector.broadcast %c8_i32_13 : i32 to vector<256x128xi32>
    %26 = arith.subi %24, %25 : vector<256x128xi32>
    %27 = arith.sitofp %26 : vector<256x128xi32> to vector<256x128xbf16>
    %c4_i32_14 = arith.constant 4 : i32
    %28 = vector.broadcast %c4_i32_14 : i32 to vector<256x128xi32>
    %29 = arith.shrsi %22, %28 : vector<256x128xi32>
    %c8_i32_15 = arith.constant 8 : i32
    %30 = vector.broadcast %c8_i32_15 : i32 to vector<256x128xi32>
    %31 = arith.subi %29, %30 : vector<256x128xi32>
    %32 = arith.sitofp %31 : vector<256x128xi32> to vector<256x128xbf16>
    %cst_16 = arith.constant dense<0.000000e+00> : vector<256x256xf32>
    %33 = tpu.matmul %27, %1, %cst_16 {dimension_numbers = #tpu.dot_dimension_numbers<[1], [0], [0], [1], [0, 0, 1, 1], [], []>} : vector<256x128xbf16>, vector<128x256xbf16>, vector<256x256xf32> -> vector<256x256xf32>
    %cst_17 = arith.constant dense<0.000000e+00> : vector<256x256xf32>
    %34 = tpu.matmul %32, %2, %cst_17 {dimension_numbers = #tpu.dot_dimension_numbers<[1], [0], [0], [1], [0, 0, 1, 1], [], []>} : vector<256x128xbf16>, vector<128x256xbf16>, vector<256x256xf32> -> vector<256x256xf32>
    %35 = arith.addf %33, %34 : vector<256x256xf32>
    %36 = vector.broadcast %0 : vector<256x1xf32> to vector<256x256xf32>
    %37 = arith.mulf %35, %36 : vector<256x256xf32>
    %c0_18 = arith.constant 0 : index
    %c256 = arith.constant 256 : index
    %38 = vector.load %arg6[%c0_18, %c256] : memref<256x1024xf32, #tpu.memory_space<vmem>>, vector<256x256xf32>
    tpu.vector_store %arg6[%c0_18, %c256], %37 {strides = array<i32>} : memref<256x1024xf32, #tpu.memory_space<vmem>>, vector<256x256xf32>,
    %c0_19 = arith.constant 0 : index
    %c256_20 = arith.constant 256 : index
    %39 = vector.load %arg2[%c0_19, %c256_20] : memref<256x512xi8, #tpu.memory_space<vmem>>, vector<256x128xi8>
    %40 = arith.extui %39 : vector<256x128xi8> to vector<256x128xi32>
    %c15_i32_21 = arith.constant 15 : i32
    %41 = vector.broadcast %c15_i32_21 : i32 to vector<256x128xi32>
    %42 = arith.andi %40, %41 : vector<256x128xi32>
    %c8_i32_22 = arith.constant 8 : i32
    %43 = vector.broadcast %c8_i32_22 : i32 to vector<256x128xi32>
    %44 = arith.subi %42, %43 : vector<256x128xi32>
    %45 = arith.sitofp %44 : vector<256x128xi32> to vector<256x128xbf16>
    %c4_i32_23 = arith.constant 4 : i32
    %46 = vector.broadcast %c4_i32_23 : i32 to vector<256x128xi32>
    %47 = arith.shrsi %40, %46 : vector<256x128xi32>
    %c8_i32_24 = arith.constant 8 : i32
    %48 = vector.broadcast %c8_i32_24 : i32 to vector<256x128xi32>
    %49 = arith.subi %47, %48 : vector<256x128xi32>
    %50 = arith.sitofp %49 : vector<256x128xi32> to vector<256x128xbf16>
    %cst_25 = arith.constant dense<0.000000e+00> : vector<256x256xf32>
    %51 = tpu.matmul %45, %1, %cst_25 {dimension_numbers = #tpu.dot_dimension_numbers<[1], [0], [0], [1], [0, 0, 1, 1], [], []>} : vector<256x128xbf16>, vector<128x256xbf16>, vector<256x256xf32> -> vector<256x256xf32>
    %cst_26 = arith.constant dense<0.000000e+00> : vector<256x256xf32>
    %52 = tpu.matmul %50, %2, %cst_26 {dimension_numbers = #tpu.dot_dimension_numbers<[1], [0], [0], [1], [0, 0, 1, 1], [], []>} : vector<256x128xbf16>, vector<128x256xbf16>, vector<256x256xf32> -> vector<256x256xf32>
    %53 = arith.addf %51, %52 : vector<256x256xf32>
    %54 = vector.broadcast %0 : vector<256x1xf32> to vector<256x256xf32>
    %55 = arith.mulf %53, %54 : vector<256x256xf32>
    %c0_27 = arith.constant 0 : index
    %c512 = arith.constant 512 : index
    %56 = vector.load %arg6[%c0_27, %c512] : memref<256x1024xf32, #tpu.memory_space<vmem>>, vector<256x256xf32>
    tpu.vector_store %arg6[%c0_27, %c512], %55 {strides = array<i32>} : memref<256x1024xf32, #tpu.memory_space<vmem>>, vector<256x256xf32>,
    %c0_28 = arith.constant 0 : index
    %c384 = arith.constant 384 : index
    %57 = vector.load %arg2[%c0_28, %c384] : memref<256x512xi8, #tpu.memory_space<vmem>>, vector<256x128xi8>
    %58 = arith.extui %57 : vector<256x128xi8> to vector<256x128xi32>
    %c15_i32_29 = arith.constant 15 : i32
    %59 = vector.broadcast %c15_i32_29 : i32 to vector<256x128xi32>
    %60 = arith.andi %58, %59 : vector<256x128xi32>
    %c8_i32_30 = arith.constant 8 : i32
    %61 = vector.broadcast %c8_i32_30 : i32 to vector<256x128xi32>
    %62 = arith.subi %60, %61 : vector<256x128xi32>
    %63 = arith.sitofp %62 : vector<256x128xi32> to vector<256x128xbf16>
    %c4_i32_31 = arith.constant 4 : i32
    %64 = vector.broadcast %c4_i32_31 : i32 to vector<256x128xi32>
    %65 = arith.shrsi %58, %64 : vector<256x128xi32>
    %c8_i32_32 = arith.constant 8 : i32
    %66 = vector.broadcast %c8_i32_32 : i32 to vector<256x128xi32>
    %67 = arith.subi %65, %66 : vector<256x128xi32>
    %68 = arith.sitofp %67 : vector<256x128xi32> to vector<256x128xbf16>
    %cst_33 = arith.constant dense<0.000000e+00> : vector<256x256xf32>
    %69 = tpu.matmul %63, %1, %cst_33 {dimension_numbers = #tpu.dot_dimension_numbers<[1], [0], [0], [1], [0, 0, 1, 1], [], []>} : vector<256x128xbf16>, vector<128x256xbf16>, vector<256x256xf32> -> vector<256x256xf32>
    %cst_34 = arith.constant dense<0.000000e+00> : vector<256x256xf32>
    %70 = tpu.matmul %68, %2, %cst_34 {dimension_numbers = #tpu.dot_dimension_numbers<[1], [0], [0], [1], [0, 0, 1, 1], [], []>} : vector<256x128xbf16>, vector<128x256xbf16>, vector<256x256xf32> -> vector<256x256xf32>
    %71 = arith.addf %69, %70 : vector<256x256xf32>
    %72 = vector.broadcast %0 : vector<256x1xf32> to vector<256x256xf32>
    %73 = arith.mulf %71, %72 : vector<256x256xf32>
    %c0_35 = arith.constant 0 : index
    %c768 = arith.constant 768 : index
    %74 = vector.load %arg6[%c0_35, %c768] : memref<256x1024xf32, #tpu.memory_space<vmem>>, vector<256x256xf32>
    tpu.vector_store %arg6[%c0_35, %c768], %73 {strides = array<i32>} : memref<256x1024xf32, #tpu.memory_space<vmem>>, vector<256x256xf32>,
    return
  }
  func.func @transform_0(%arg0: i32, %arg1: i32) -> (i32, i32) {
    %c0_i32 = arith.constant 0 : i32
    return %arg0, %arg1 : i32, i32
  }
  func.func @transform_1(%arg0: i32, %arg1: i32) -> (i32, i32) {
    %c0_i32 = arith.constant 0 : i32
    %c0_i32_0 = arith.constant 0 : i32
    return %arg0, %c0_i32 : i32, i32
  }
  func.func @transform_2(%arg0: i32, %arg1: i32) -> (i32, i32) {
    %c0_i32 = arith.constant 0 : i32
    %c0_i32_0 = arith.constant 0 : i32
    %c0_i32_1 = arith.constant 0 : i32
    return %c0_i32, %c0_i32_0 : i32, i32
  }
  func.func @transform_3(%arg0: i32, %arg1: i32) -> (i32, i32) {
    %c0_i32 = arith.constant 0 : i32
    %c0_i32_0 = arith.constant 0 : i32
    %c0_i32_1 = arith.constant 0 : i32
    return %c0_i32, %c0_i32_0 : i32, i32
  }
  func.func @transform_4(%arg0: i32, %arg1: i32) -> (i32, i32) {
    %c0_i32 = arith.constant 0 : i32
    return %arg0, %arg1 : i32, i32
  }
}

</mosaic_0001>

<bundles_post_ra>
// kernel: tpu_custom_call.1
= control target key start
LH: loop header
LB: loop body
LE: loop exit
PB: predicated region body
PF: predicated region fallthrough
CT: control target
= control target key end

     0   :  { %s5858_s0 = inlined_call_operand.hbm [shape: u8[512,512], index: 0, kind: input, shape index: {}]   ;;  %s5859_s1 = inlined_call_operand.vmem [shape: f32[512,1], index: 1, kind: input, shape index: {}]   ;;  %s5860_s2 = inlined_call_operand.hbm [shape: bf16[128,256], index: 2, kind: input, shape index: {}]   ;;  %s5861_s3 = inlined_call_operand.hbm [shape: bf16[128,256], index: 3, kind: input, shape index: {}]   ;;  %s5862_s4 = inlined_call_operand.hbm [shape: f32[512,1024], index: 4, kind: output, shape index: {}]  }
   0x1   :  { %5877 = sst [smem:[#allocation19_spill]] %s5860_s2 }
   0x2   :  { %5878 = sst [smem:[#allocation20_spill]] %s5861_s3 }
   0x3   :  { %9 = vsyncpa [#allocation3], 0 }
   0x4   :  { %11 = vsyncpa [#allocation3 + $0x1], 0 }
   0x5   :  { %12 = vsyncpa [#allocation6], 0 }
   0x6   :  { %13 = vsyncpa [#allocation4], 0 }
   0x7   :  { %15 = vsyncpa [#allocation4 + $0x1], 0  ;;  %s4685_s15 = smov 0   ;;  %s4687_s16 = smov 0  }
   0x8   :  { %s4689_s17 = smov 0   ;;  %s4691_s18 = smov 0  }
   0x9   :  { %s4693_s19 = smov 0   ;;  %s4695_s20 = smov 0  }
   0xa LB: > { %s3937_s21 = sadd.s32 4294967295, %s4649_s20   ;;  %s3938_s22 = sadd.s32 4294967294, %s4649_s20   ;;  %s4649_s20 = sphi %s4695_s20, %s21_s20   ;;  %s4645_s19 = sphi %s4693_s19, %s5907_s19   ;;  %s4641_s18 = sphi %s4691_s18, %s5906_s18   ;;  %s4637_s17 = sphi %s4689_s17, %s5905_s17   ;;  %s4633_s16 = sphi %s4687_s16, %s5904_s16   ;;  %s4629_s15 = sphi %s4685_s15, %s5903_s15  }
   0xb   : > { %p55_p0 = scmp.ne.s32.totalorder %s4633_s16, %s4629_s15  ;;  %p4719_p1 = scmp.eq.s32.totalorder %s3937_s21, 0 }
   0xc   : > { %p4723_p2 = scmp.eq.s32.totalorder %s3937_s21, 1  ;;  %p155_p3 = scmp.eq.s32.totalorder %s3938_s22, 1 }
   0xd   : > { %p4729_p4 = por %p4719_p1, %p55_p0  ;;  %p3939_p5 = scmp.ge.s32.totalorder %s4649_s20, 1 }
   0xe   : > { %p4734_p6 = por %p155_p3, %p55_p0  ;;  %p162_p7 = scmp.lt.s32.totalorder %s4649_s20, 3 }
   0xf   : > { %s5883_s2 = sld [smem:[#allocation19_spill]]  ;;  %s4651_s5 = smov [#allocation5]  }
  0x10   : > { %p4742_p8 = pnand %p3939_p5, %p162_p7  ;;  %s175_s6 = sshll.u32 %s4651_s5, 4  ;;  %s176_s6 = int_to_ptr.vmem [resolvable:$true] %s175_s6 }
  0x11   : > { %p3942_p11 = scmp.ge.s32.totalorder %s4649_s20, 2  ;;  %s5885_s3 = sld [smem:[#allocation20_spill]] }
  0x12   : > { %p4392_p9 = pneg %p4742_p8  ;;  %s4652_s10 = smov 128  }
  0x13   : > { %s4653_s11 = smov 8   ;;  %s4654_s12 = smov [#allocation7]  }
  0x14   : > { %p4393_p10 = pnand %p4392_p9, %p4719_p1  ;;  %s189_s13 = sshll.u32 %s4654_s12, 4  ;;  %s190_s13 = int_to_ptr.vmem [resolvable:$true] %s189_s13 }
  0x15   : > { %s173_s29 = sshll.u32 %s5883_s2, 4  ;;  %s33_s14 = sadd.s32 1, %s4645_s19  ;;  %s174_s29 = int_to_ptr.hbm [resolvable:$true] %s173_s29 }
  0x16   : > { %4395 = dma.hbm_to_vmem [thread:$0]  (!%p4393_p10), %s174_s29, 2048, %s176_s6, [#allocation6], %s4652_s10, %s4652_s10, %s4653_s11  }
  0x17   : > { %s187_s9 = sshll.u32 %s5885_s3, 4  ;;  %s42_s21 = sadd.s32 1, %s4637_s17  ;;  %s188_s9 = int_to_ptr.hbm [resolvable:$true] %s187_s9 }
  0x18   : > { %4398 = dma.hbm_to_vmem [thread:$0]  (!%p4393_p10), %s188_s9, 2048, %s190_s13, [#allocation6], %s4652_s10, %s4652_s10, %s4653_s11  }
  0x19   : > { %p35_p12 = scmp.ge.s32.totalorder %s33_s14, 2  ;;  %p49_p13 = scmp.ne.s32.totalorder %s4637_s17, %s4633_s16 }
  0x1a   : > { %p50_p0 = scmp.eq.s32.totalorder %s4649_s20, 0  ;;  %p4409_p3 = scmp.lt.s32.totalorder %s4649_s20, 2 }
  0x1b   : > { %s5909_s14 = smov (%p35_p12, %s33_s14), 0  ;;  %p4768_p7 = por %p4723_p2, %p49_p13 }
  0x1c   : > { %p4762_p5 = por %p50_p0, %p49_p13  ;;  %s37_s28 = ssub.s32 %s4645_s19, %s5909_s14 }
  0x1d   : > { %s203_s29 = sand.u32 1, %s4637_s17   ;;  %p40_p9 = scmp.eq.s32.totalorder %s37_s28, 0 }
  0x1e   : > { %s3943_s5 = sshll.u32 %s203_s29, 8  ;;  %s4345_s6 = sshll.u32 %s4645_s19, 8 }
  0x1f   : > { %s4777_s7 = scalar_select %p40_p9, %s4637_s17, %s42_s21  }
  0x20   : > { %s215_s10 = scalar_lea.hbm %s5858_s0, %s4345_s6  ;;  %s207_s12 = scalar_lea.vmem [#allocation2], %s3943_s5 }
  0x21   : > { %s216_s11 = sshll.u32 %s215_s10, 4  ;;  %s218_s13 = sshll.u32 %s207_s12, 4  ;;  %s217_s11 = int_to_ptr.hbm [resolvable:$true] %s216_s11  ;;  %s219_s13 = int_to_ptr.vmem [resolvable:$true] %s218_s13 }
  0x22   : > { %p4400_p2 = pnand %p4409_p3, %p4762_p5  ;;  %s204_s24 = scalar_lea.sflag [#allocation3], %s203_s29 }
  0x23   : > { %s4655_s2 = smov 512   ;;  %s4656_s3 = smov 32  }
  0x24   : > { %4402 = dma.hbm_to_vmem [thread:$0]  (!%p4400_p2), %s217_s11, 4096, %s219_s13, %s204_s24, %s4655_s2, %s4655_s2, %s4656_s3  }
  0x25   : > { %239 = sbr.rel (%p4742_p8) target bundleno = 1241 (0x4d9), region = 36 }
  0x2a   : > { %s4789_s21 = sand.u32 1, %s4633_s16  }
  0x2b   : > { %s3948_s28 = sshll.u32 %s4789_s21, 8  ;;  %s242_s5 = scalar_lea.sflag [#allocation3], %s4789_s21 }
  0x2c   : > { %s4793_s6 = scalar_lea.vmem [#allocation2], %s3948_s28 }
  0x2d   : > { %4616 = dma.done.wait (%p4729_p4), %s242_s5, 4096  }
  0x2e   : > { %4618 = vsyncadd (%p4729_p4), %s242_s5, 4294963200 }
  0x2f   : > { %4620 = dma.done.wait (%p4719_p1), [#allocation6], 4096  }
  0x30   : > { %4622 = vsyncadd (%p4719_p1), [#allocation6], 4294963200  ;;  %s3952_s2 = sshll.u32 %s4641_s18, 5  ;;  %v4076_v0 = vld [vmem:[#allocation7 + $0x70] sm:$0xf]  ;;  %s3951_s29 = sshll.u32 %s4789_s21, 11 }
  0x31   : > { %p4806_p8 = scmp.lt.s32.totalorder %s3952_s2, 63  ;;  %v4377_v1 = vld [vmem:[#allocation7 + $0x74] sm:$0xf0]  ;;  %v4376_v2 = vld [vmem:[#allocation7 + $0x74] sm:$0xf]  ;;  %s5015_s8 = scalar_lea.vmem [#allocation8], %s3951_s29 }
  0x32   : > { %v4810_v3 = vor.u32 %v4377_v1, %v4076_v0  ;;  %v4078_v4 = vld [vmem:[#allocation7 + $0x78] sm:$0xf0]  ;;  %v4140_v5 = vld [vmem:[#allocation5 + $0x70] sm:$0xf]  ;;  %v4361_v6 = vld [vmem:[#allocation5 + $0x74] sm:$0xf0] }
  0x33   : > { %v4812_v7 = vor.u32 %v4376_v2, %v4078_v4  ;;  %v4814_v8 = vor.u32 %v4361_v6, %v4140_v5  ;;  %v4360_v9 = vld [vmem:[#allocation5 + $0x74] sm:$0xf]  ;;  %v4142_v10 = vld [vmem:[#allocation5 + $0x78] sm:$0xf0]  ;;  %v4068_v11 = vld [vmem:[#allocation7 + $0x60] sm:$0xf] }
  0x34   : > { %736 = vmatpush.bf16.msra.mxu0 %v4810_v3  ;;  %v4817_v12 = vor.u32 %v4360_v9, %v4142_v10  ;;  %v4375_v13 = vld [vmem:[#allocation7 + $0x64] sm:$0xf0]  ;;  %v4374_v14 = vld [vmem:[#allocation7 + $0x64] sm:$0xf]  ;;  %v4070_v15 = vld [vmem:[#allocation7 + $0x68] sm:$0xf0] }
  0x35   : > { %825 = vmatpush.bf16.msra.mxu1 %v4812_v7  ;;  %994 = vmatpush.bf16.msra.mxu2 %v4814_v8  ;;  %v4821_v16 = vor.u32 %v4375_v13, %v4068_v11  ;;  %v4823_v17 = vor.u32 %v4374_v14, %v4070_v15  ;;  %v4132_v18 = vld [vmem:[#allocation5 + $0x60] sm:$0xf]  ;;  %v4359_v19 = vld [vmem:[#allocation5 + $0x64] sm:$0xf0]  ;;  %v4358_v20 = vld [vmem:[#allocation5 + $0x64] sm:$0xf] }
  0x36   : > { %1083 = vmatpush.bf16.msra.mxu3 %v4817_v12  ;;  %v4826_v21 = vor.u32 %v4359_v19, %v4132_v18  ;;  %v4134_v22 = vld [vmem:[#allocation5 + $0x68] sm:$0xf0]  ;;  %v4060_v23 = vld [vmem:[#allocation7 + $0x50] sm:$0xf]  ;;  %v4373_v24 = vld [vmem:[#allocation7 + $0x54] sm:$0xf0] }
  0x37   : > { %v4828_v25 = vor.u32 %v4358_v20, %v4134_v22  ;;  %v4372_v26 = vld [vmem:[#allocation7 + $0x54] sm:$0xf]  ;;  %v4062_v27 = vld [vmem:[#allocation7 + $0x58] sm:$0xf0]  ;;  %v4124_v28 = vld [vmem:[#allocation5 + $0x50] sm:$0xf]  ;;  %v4831_v29 = vor.u32 %v4373_v24, %v4060_v23 }
  0x38   : > { %737 = vmatpush.bf16.msra.mxu0 %v4821_v16  ;;  %v4357_v30 = vld [vmem:[#allocation5 + $0x54] sm:$0xf0]  ;;  %v4356_v31 = vld [vmem:[#allocation5 + $0x54] sm:$0xf]  ;;  %v4126_v32 = vld [vmem:[#allocation5 + $0x58] sm:$0xf0]  ;;  %v4835_v33 = vor.u32 %v4372_v26, %v4062_v27 }
  0x39   : > { %826 = vmatpush.bf16.msra.mxu1 %v4823_v17  ;;  %995 = vmatpush.bf16.msra.mxu2 %v4826_v21  ;;  %v4837_v34 = vor.u32 %v4357_v30, %v4124_v28  ;;  %v4052_v35 = vld [vmem:[#allocation7 + $0x40] sm:$0xf]  ;;  %v4371_v36 = vld [vmem:[#allocation7 + $0x44] sm:$0xf0]  ;;  %v4370_v37 = vld [vmem:[#allocation7 + $0x44] sm:$0xf]  ;;  %v4840_v38 = vor.u32 %v4356_v31, %v4126_v32 }
  0x3a   : > { %1084 = vmatpush.bf16.msra.mxu3 %v4828_v25  ;;  %v4054_v39 = vld [vmem:[#allocation7 + $0x48] sm:$0xf0]  ;;  %v4116_v40 = vld [vmem:[#allocation5 + $0x40] sm:$0xf]  ;;  %v4355_v41 = vld [vmem:[#allocation5 + $0x44] sm:$0xf0]  ;;  %v4843_v44 = vor.u32 %v4371_v36, %v4052_v35 }
  0x3b   : > { %v4354_v42 = vld [vmem:[#allocation5 + $0x44] sm:$0xf]  ;;  %v4118_v43 = vld [vmem:[#allocation5 + $0x48] sm:$0xf0]  ;;  %s5911_s2 = smov (!%p4806_p8, %s3952_s2), 63  ;;  %v4853_v45 = vor.u32 %v4370_v37, %v4054_v39  ;;  %v4855_v46 = vor.u32 %v4355_v41, %v4116_v40  ;;  %v4657_v30 = vmov 0  }
  0x3c   : > { %738 = vmatpush.bf16.msra.mxu0 %v4831_v29  ;;  %v4044_v47 = vld [vmem:[#allocation7 + $0x30] sm:$0xf]  ;;  %v4369_v48 = vld [vmem:[#allocation7 + $0x34] sm:$0xf0]  ;;  %v4368_v49 = vld [vmem:[#allocation7 + $0x34] sm:$0xf]  ;;  %v4858_v50 = vor.u32 %v4354_v42, %v4118_v43  ;;  %4470 = vset.pattern.permute.xlu0 %v4657_v30 }
  0x3d   : > { %827 = vmatpush.bf16.msra.mxu1 %v4835_v33  ;;  %996 = vmatpush.bf16.msra.mxu2 %v4837_v34  ;;  %v4046_v51 = vld [vmem:[#allocation7 + $0x38] sm:$0xf0]  ;;  %v4108_v52 = vld [vmem:[#allocation5 + $0x30] sm:$0xf]  ;;  %v4353_v53 = vld [vmem:[#allocation5 + $0x34] sm:$0xf0]  ;;  %v4861_v56 = vor.u32 %v4369_v48, %v4044_v47 }
  0x3e   : > { %1085 = vmatpush.bf16.msra.mxu3 %v4840_v38  ;;  %v4352_v54 = vld [vmem:[#allocation5 + $0x34] sm:$0xf]  ;;  %v4110_v55 = vld [vmem:[#allocation5 + $0x38] sm:$0xf0]  ;;  %s3953_s23 = sshll.u32 %s5911_s2, 3  ;;  %v4866_v57 = vor.u32 %v4368_v49, %v4046_v51  ;;  %v4868_v58 = vor.u32 %v4353_v53, %v4108_v52  ;;  %v360_v20 = vld [vmem:[%s4793_s6] sm:$0xff]  ;;  %4471 = vset.pattern.permute.xlu1 %v4657_v30 }
  0x3f   : > { %v4036_v59 = vld [vmem:[#allocation7 + $0x20] sm:$0xf]  ;;  %v4367_v60 = vld [vmem:[#allocation7 + $0x24] sm:$0xf0]  ;;  %v4366_v61 = vld [vmem:[#allocation7 + $0x24] sm:$0xf]  ;;  %v4871_v62 = vor.u32 %v4352_v54, %v4110_v55  ;;  %s4876_s22 = scalar_lea.vmem %s5859_s1, %s3953_s23  ;;  %v368_v27 = vunpack.c.0.s8 %v360_v20  ;;  %v369_v28 = vunpack.c.1.s8 %v360_v20  ;;  %v370_v49 = vunpack.c.2.s8 %v360_v20  ;;  %4472 = vset.pattern.permute.xlu2 %v4657_v30 }
  0x40   : > { %739 = vmatpush.bf16.msra.mxu0 %v4843_v44  ;;  %v4038_v63 = vld [vmem:[#allocation7 + $0x28] sm:$0xf0]  ;;  %v4100_v0 = vld [vmem:[#allocation5 + $0x20] sm:$0xf]  ;;  %v4351_v1 = vld [vmem:[#allocation5 + $0x24] sm:$0xf0]  ;;  %v4879_v5 = vor.u32 %v4367_v60, %v4036_v59  ;;  %v371_v51 = vunpack.c.3.s8 %v360_v20 }
  0x41   : > { %828 = vmatpush.bf16.msra.mxu1 %v4853_v45  ;;  %997 = vmatpush.bf16.msra.mxu2 %v4855_v46  ;;  %v4350_v2 = vld [vmem:[#allocation5 + $0x24] sm:$0xf]  ;;  %v4102_v4 = vld [vmem:[#allocation5 + $0x28] sm:$0xf0]  ;;  %v4028_v6 = vld [vmem:[#allocation7 + $0x10] sm:$0xf]  ;;  %v4883_v10 = vor.u32 %v4366_v61, %v4038_v63  ;;  %v4885_v11 = vor.u32 %v4351_v1, %v4100_v0 }
  0x42   : > { %1086 = vmatpush.bf16.msra.mxu3 %v4858_v50  ;;  %v4365_v9 = vld [vmem:[#allocation7 + $0x14] sm:$0xf0]  ;;  %v4364_v13 = vld [vmem:[#allocation7 + $0x14] sm:$0xf]  ;;  %v4030_v14 = vld [vmem:[#allocation7 + $0x18] sm:$0xf0]  ;;  %v4888_v18 = vor.u32 %v4350_v2, %v4102_v4 }
  0x43   : > { %v4092_v15 = vld [vmem:[#allocation5 + $0x10] sm:$0xf]  ;;  %v4349_v19 = vld [vmem:[#allocation5 + $0x14] sm:$0xf0]  ;;  %v296_v22 = vld [vmem:[%s4876_s22] sm:$0xff]  ;;  %v4893_v31 = vor.u32 %v4365_v9, %v4028_v6  ;;  %v4897_v37 = vor.u32 %v4364_v13, %v4030_v14  ;;  %v400_v42 = vand.u32 255, %v368_v27 }
  0x44   : > { %740 = vmatpush.bf16.msra.mxu0 %v4861_v56  ;;  %v4348_v23 = vld [vmem:[#allocation5 + $0x14] sm:$0xf]  ;;  %v4094_v24 = vld [vmem:[#allocation5 + $0x18] sm:$0xf0]  ;;  %v4020_v26 = vld [vmem:[#allocation7] sm:$0xf]  ;;  %1174 = vperm.xlu0 %4470, %v296_v22   ;;  %v4899_v39 = vor.u32 %v4349_v19, %v4092_v15 }
  0x45   : > { %829 = vmatpush.bf16.msra.mxu1 %v4866_v57  ;;  %998 = vmatpush.bf16.msra.mxu2 %v4868_v58  ;;  %v4363_v32 = vld [vmem:[#allocation7 + $0x4] sm:$0xf0]  ;;  %v4362_v35 = vld [vmem:[#allocation7 + $0x4] sm:$0xf]  ;;  %v4022_v36 = vld [vmem:[#allocation7 + $0x8] sm:$0xf0]  ;;  %v4902_v47 = vor.u32 %v4348_v23, %v4094_v24 }
  0x46   : > { %1087 = vmatpush.bf16.msra.mxu3 %v4871_v62  ;;  %v4084_v40 = vld [vmem:[#allocation5] sm:$0xf]  ;;  %v4347_v41 = vld [vmem:[#allocation5 + $0x4] sm:$0xf0]  ;;  %v401_v43 = vand.u32 255, %v369_v28  ;;  %v544_v53 = vshra.s32 %v400_v42, 4  ;;  %v4905_v60 = vor.u32 %v4363_v32, %v4020_v26  ;;  %v4907_v61 = vor.u32 %v4362_v35, %v4022_v36 }
  0x47   : > { %v4346_v48 = vld [vmem:[#allocation5 + $0x4] sm:$0xf]  ;;  %v4086_v52 = vld [vmem:[#allocation5 + $0x8] sm:$0xf0]  ;;  %v432_v55 = vand.u32 15, %v400_v42  ;;  %v4909_v63 = vor.u32 %v4347_v41, %v4084_v40  ;;  %v402_v13 = vand.u32 255, %v370_v49 }
  0x48   : > { %741 = vmatpush.bf16.msra.mxu0 %v4879_v5  ;;  %v545_v54 = vshra.s32 %v401_v43, 4  ;;  %v433_v59 = vand.u32 15, %v401_v43  ;;  %v3986_v0 = vadd.s32 4294967288, %v544_v53  ;;  %v297_v6 = vld [vmem:[%s4876_s22 + $0x8] sm:$0xff]  ;;  %v4915_v9 = vor.u32 %v4346_v48, %v4086_v52  ;;  %v298_v32 = vld [vmem:[%s4876_s22 + $0x10] sm:$0xff]  ;;  %v361_v42 = vld [vmem:[%s4793_s6 + $0x20] sm:$0xff] }
  0x49   : > { %830 = vmatpush.bf16.msra.mxu1 %v4883_v10  ;;  %999 = vmatpush.bf16.msra.mxu2 %v4885_v11  ;;  %v3954_v2 = vadd.s32 4294967288, %v432_v55  ;;  %v403_v14 = vand.u32 255, %v371_v51  ;;  %v546_v26 = vshra.s32 %v402_v13, 4  ;;  %v434_v28 = vand.u32 15, %v402_v13  ;;  %s4379_s9 = sshll.u32 %s4641_s18, 11  ;;  %s3816_s13 = sshll.u32 %s5015_s8, 4  ;;  %s3817_s13 = int_to_ptr.vmem [resolvable:$true] %s3816_s13 }
  0x4a   : > { %1088 = vmatpush.bf16.msra.mxu3 %v4888_v18  ;;  %v3987_v1 = vadd.s32 4294967288, %v545_v54  ;;  %v3955_v4 = vadd.s32 4294967288, %v433_v59  ;;  %v608_v15 = vcvt.s32.f32 %v3986_v0  ;;  %1184 = vperm.xlu1 %4471, %v298_v32   ;;  %v372_v49 = vunpack.c.0.s8 %v361_v42  ;;  %v299_v54 = vld [vmem:[%s4876_s22 + $0x18] sm:$0xff]  ;;  %s3815_s12 = scalar_lea.hbm %s5862_s4, %s4379_s9  ;;  %s3801_s18 = scalar_lea.sflag [#allocation4], %s4789_s21 }
  0x4b   : > { %v496_v20 = vcvt.s32.f32 %v3954_v2  ;;  %v547_v27 = vshra.s32 %v403_v14, 4  ;;  %v435_v30 = vand.u32 15, %v403_v14  ;;  %v3988_v35 = vadd.s32 4294967288, %v546_v26  ;;  %s3818_s24 = sshll.u32 %s3815_s12, 4  ;;  %s4583_s3 = scalar_lea.hbm %s5862_s4, 4096  ;;  %s3819_s24 = int_to_ptr.hbm [resolvable:$true] %s3818_s24 }
  0x4c   : > { %742 = vmatpush.bf16.msra.mxu0 %v4893_v31  ;;  %v609_v19 = vcvt.s32.f32 %v3987_v1  ;;  %v497_v22 = vcvt.s32.f32 %v3955_v4  ;;  %1179 = vperm.xlu0 %4470, %v297_v6   ;;  %v3956_v40 = vadd.s32 4294967288, %v434_v28  ;;  %v373_v51 = vunpack.c.1.s8 %v361_v42  ;;  %s4577_s28 = sshra.s32 %s3819_s24, 4  ;;  %s4578_s28 = int_to_ptr.hbm [resolvable:$true] %s4577_s28 }
  0x4d   : > { %831 = vmatpush.bf16.msra.mxu1 %v4897_v37  ;;  %1000 = vmatpush.bf16.msra.mxu2 %v4899_v39  ;;  %v3989_v36 = vadd.s32 4294967288, %v547_v27  ;;  %v3957_v41 = vadd.s32 4294967288, %v435_v30  ;;  %v610_v43 = vcvt.s32.f32 %v3988_v35  ;;  %v404_v59 = vand.u32 255, %v372_v49  ;;  %v300_v49 = vld [vmem:[%s4876_s22 + $0x20] sm:$0xff]  ;;  %s4579_s5 = scalar_lea.hbm %s4578_s28, 2048  ;;  %p4584_p12 = scmp.lt.s32.totalorder %s4578_s28, %s5862_s4 }
  0x4e   : > { %1089 = vmatpush.bf16.msra.mxu3 %v4902_v47  ;;  %v640_v23 = vpack.c.bf16 %v609_v19, %v608_v15  ;;  %v528_v24 = vpack.c.bf16 %v497_v22, %v496_v20  ;;  %v498_v52 = vcvt.s32.f32 %v3956_v40  ;;  %v405_v0 = vand.u32 255, %v373_v51  ;;  %v303_v51 = vld [vmem:[%s4876_s22 + $0x38] sm:$0xff]  ;;  %1194 = vperm.xlu2 %4472, %v300_v49   ;;  %p4580_p1 = scmp.ne.s32.totalorder %s4578_s28, %s4579_s5  ;;  %p4585_p13 = scmp.lt.s32.totalorder %s4583_s3, %s4579_s5 }
  0x4f   : > { %v611_v48 = vcvt.s32.f32 %v3989_v36  ;;  %v499_v53 = vcvt.s32.f32 %v3957_v41  ;;  %v548_v2 = vshra.s32 %v404_v59, 4  ;;  %v436_v6 = vand.u32 15, %v404_v59  ;;  %v362_v59 = vld [vmem:[%s4793_s6 + $0x40] sm:$0xff] }
  0x50   : > { %743 = vmatpush.bf16.msra.mxu0 %v4905_v60  ;;  %v549_v4 = vshra.s32 %v405_v0, 4  ;;  %v437_v13 = vand.u32 15, %v405_v0  ;;  %v375_v26 = vunpack.c.3.s8 %v361_v42  ;;  %p4581_p4 = pnand %p4580_p1, %p4768_p7  ;;  %p4586_p0 = por %p4585_p13, %p4584_p12 }
  0x51   : > { %832 = vmatpush.bf16.msra.mxu1 %v4907_v61  ;;  %1001 = vmatpush.bf16.msra.mxu2 %v4909_v63  ;;  %v641_v55 = vpack.c.bf16 %v611_v48, %v610_v43  ;;  %v529_v1 = vpack.c.bf16 %v499_v53, %v498_v52  ;;  %v3990_v14 = vadd.s32 4294967288, %v548_v2  ;;  %v3958_v19 = vadd.s32 4294967288, %v436_v6  ;;  %v302_v48 = vld [vmem:[%s4876_s22 + $0x30] sm:$0xff] }
  0x52   : > { %1090 = vmatpush.bf16.msra.mxu3 %v4915_v9  ;;  %1189 = vperm.xlu1 %4471, %v299_v54   ;;  %v3991_v15 = vadd.s32 4294967288, %v549_v4  ;;  %v3959_v20 = vadd.s32 4294967288, %v437_v13  ;;  %v407_v35 = vand.u32 255, %v375_v26  ;;  %v376_v2 = vunpack.c.0.s8 %v362_v59  ;;  %p4582_p10 = pneg %p4581_p4 }
  0x53   : > { %744 = vmatmul.bf16.vlgmr.msra.gmra.mxu0 %v640_v23  ;;  %v612_v22 = vcvt.s32.f32 %v3990_v14  ;;  %v500_v27 = vcvt.s32.f32 %v3958_v19  ;;  %v377_v4 = vunpack.c.1.s8 %v362_v59 }
  0x54   : > { %833 = vmatmul.bf16.vlgmr.msra.gmra.mxu1 %v640_v23  ;;  %1002 = vmatmul.bf16.vlgmr.msra.gmra.mxu2 %v528_v24  ;;  %v613_v23 = vcvt.s32.f32 %v3991_v15  ;;  %v501_v28 = vcvt.s32.f32 %v3959_v20  ;;  %v551_v41 = vshra.s32 %v407_v35, 4  ;;  %v439_v43 = vand.u32 15, %v407_v35  ;;  %p4587_p3 = pnand %p4586_p0, %p4582_p10 }
  0x55   : > { %1934 = vmatpush.bf16.msrb.mxu2 %v4814_v8  ;;  %1091 = vmatmul.bf16.vlgmr.msra.gmra.mxu3 %v528_v24  ;;  %v374_v24 = vunpack.c.2.s8 %v361_v42  ;;  %v408_v15 = vand.u32 255, %v376_v2  ;;  %v409_v19 = vand.u32 255, %v377_v4  ;;  %v306_v2 = vld [vmem:[%s4876_s22 + $0x50] sm:$0xff]  ;;  %v304_v4 = vld [vmem:[%s4876_s22 + $0x40] sm:$0xff] }
  0x56   : > { %2023 = vmatpush.bf16.msrb.mxu3 %v4817_v12  ;;  %1756 = vmatpush.bf16.msrb.mxu0 %v4810_v3  ;;  %v642_v30 = vpack.c.bf16 %v613_v23, %v612_v22  ;;  %v530_v36 = vpack.c.bf16 %v501_v28, %v500_v27  ;;  %v3993_v53 = vadd.s32 4294967288, %v551_v41  ;;  %v301_v27 = vld [vmem:[%s4876_s22 + $0x28] sm:$0xff] }
  0x57   : > { %1845 = vmatpush.bf16.msrb.mxu1 %v4812_v7  ;;  %v406_v32 = vand.u32 255, %v374_v24  ;;  %1204 = vperm.xlu0 %4470, %v302_v48   ;;  %v552_v22 = vshra.s32 %v408_v15, 4  ;;  %v553_v23 = vshra.s32 %v409_v19, 4  ;;  %v440_v24 = vand.u32 15, %v408_v15  ;;  %v305_v28 = vld [vmem:[%s4876_s22 + $0x48] sm:$0xff] }
  0x58   : > { %v441_v26 = vand.u32 15, %v409_v19  ;;  %1199 = vperm.xlu2 %4472, %v301_v27   ;;  %v363_v19 = vld [vmem:[%s4793_s6 + $0x60] sm:$0xff] }
  0x59   : > { %1935 = vmatpush.bf16.msrb.mxu2 %v4826_v21  ;;  %v550_v40 = vshra.s32 %v406_v32, 4  ;;  %v438_v42 = vand.u32 15, %v406_v32  ;;  %v3995_v32 = vadd.s32 4294967288, %v553_v23  ;;  %v3962_v35 = vadd.s32 4294967288, %v440_v24 }
  0x5a   : > { %2024 = vmatpush.bf16.msrb.mxu3 %v4828_v25  ;;  %1757 = vmatpush.bf16.msrb.mxu0 %v4821_v16  ;;  %v380_v23 = vunpack.c.0.s8 %v363_v19  ;;  %v381_v24 = vunpack.c.1.s8 %v363_v19 }
  0x5b   : > { %1846 = vmatpush.bf16.msrb.mxu1 %v4823_v17  ;;  %v3992_v52 = vadd.s32 4294967288, %v550_v40  ;;  %1209 = vperm.xlu1 %4471, %v303_v51   ;;  %v3960_v54 = vadd.s32 4294967288, %v438_v42  ;;  %v617_v41 = vcvt.s32.f32 %v3995_v32  ;;  %v378_v42 = vunpack.c.2.s8 %v362_v59 }
  0x5c   : > { %v504_v48 = vcvt.s32.f32 %v3962_v35  ;;  %v413_v32 = vand.u32 255, %v381_v24 }
  0x5d   : > { %1936 = vmatpush.bf16.msrb.mxu2 %v4837_v34  ;;  %v614_v0 = vcvt.s32.f32 %v3992_v52  ;;  %v502_v6 = vcvt.s32.f32 %v3960_v54  ;;  %v410_v52 = vand.u32 255, %v378_v42 }
  0x5e   : > { %2025 = vmatpush.bf16.msrb.mxu3 %v4840_v38  ;;  %1758 = vmatpush.bf16.msrb.mxu0 %v4831_v29  ;;  %v445_v42 = vand.u32 15, %v413_v32 }
  0x5f   : > { %1847 = vmatpush.bf16.msrb.mxu1 %v4835_v33  ;;  %1219 = vperm.xlu0 %4470, %v305_v28  }
  0x60   : > { %1214 = vperm.xlu2 %4472, %v304_v4  }
  0x61   : > { %1937 = vmatpush.bf16.msrb.mxu2 %v4855_v46 }
  0x62   : > { %2026 = vmatpush.bf16.msrb.mxu3 %v4858_v50  ;;  %1759 = vmatpush.bf16.msrb.mxu0 %v4843_v44 }
  0x63   : > { %1848 = vmatpush.bf16.msrb.mxu1 %v4853_v45  ;;  %749 = vmatmul.bf16.gmra.mxu0 %v641_v55 }
  0x64   : > { %838 = vmatmul.bf16.gmra.mxu1 %v641_v55  ;;  %1007 = vmatmul.bf16.gmra.mxu2 %v529_v1  ;;  %v3961_v55 = vadd.s32 4294967288, %v439_v43  ;;  %v379_v43 = vunpack.c.3.s8 %v362_v59 }
  0x65   : > { %1938 = vmatpush.bf16.msrb.mxu2 %v4868_v58  ;;  %1096 = vmatmul.bf16.gmra.mxu3 %v529_v1  ;;  %v615_v1 = vcvt.s32.f32 %v3993_v53 }
  0x66   : > { %2027 = vmatpush.bf16.msrb.mxu3 %v4871_v62  ;;  %1760 = vmatpush.bf16.msrb.mxu0 %v4861_v56  ;;  %v503_v13 = vcvt.s32.f32 %v3961_v55  ;;  %v411_v53 = vand.u32 255, %v379_v43  ;;  %v554_v55 = vshra.s32 %v410_v52, 4  ;;  %v308_v43 = vld [vmem:[%s4876_s22 + $0x60] sm:$0xff] }
  0x67   : > { %1849 = vmatpush.bf16.msrb.mxu1 %v4866_v57  ;;  %v643_v14 = vpack.c.bf16 %v615_v1, %v614_v0  ;;  %v442_v0 = vand.u32 15, %v410_v52  ;;  %1224 = vperm.xlu1 %4471, %v306_v2  }
  0x68   : > { %v531_v20 = vpack.c.bf16 %v503_v13, %v502_v6  ;;  %v555_v59 = vshra.s32 %v411_v53, 4  ;;  %v443_v1 = vand.u32 15, %v411_v53  ;;  %v3996_v6 = vadd.s32 4294967288, %v554_v55  ;;  %1234 = vperm.xlu0 %4470, %v308_v43  }
  0x69   : > { %1939 = vmatpush.bf16.msrb.mxu2 %v4885_v11  ;;  %v3967_v53 = vadd.s32 4294967288, %v445_v42 }
  0x6a   : > { %2028 = vmatpush.bf16.msrb.mxu3 %v4888_v18  ;;  %1761 = vmatpush.bf16.msrb.mxu0 %v4879_v5  ;;  %v3997_v13 = vadd.s32 4294967288, %v555_v59  ;;  %v3965_v15 = vadd.s32 4294967288, %v443_v1  ;;  %v382_v59 = vunpack.c.2.s8 %v363_v19 }
  0x6b   : > { %1850 = vmatpush.bf16.msrb.mxu1 %v4883_v10  ;;  %v509_v2 = vcvt.s32.f32 %v3967_v53 }
  0x6c   : > { %v507_v27 = vcvt.s32.f32 %v3965_v15 }
  0x6d   : > { %1940 = vmatpush.bf16.msrb.mxu2 %v4899_v39 }
  0x6e   : > { %2029 = vmatpush.bf16.msrb.mxu3 %v4902_v47  ;;  %1762 = vmatpush.bf16.msrb.mxu0 %v4893_v31 }
  0x6f   : > { %1851 = vmatpush.bf16.msrb.mxu1 %v4897_v37 }
  0x71   : > { %1941 = vmatpush.bf16.msrb.mxu2 %v4909_v63 }
  0x72   : > { %2030 = vmatpush.bf16.msrb.mxu3 %v4915_v9  ;;  %1763 = vmatpush.bf16.msrb.mxu0 %v4905_v60 }
  0x73   : > { %1852 = vmatpush.bf16.msrb.mxu1 %v4907_v61  ;;  %754 = vmatmul.bf16.gmra.mxu0 %v642_v30 }
  0x74   : > { %843 = vmatmul.bf16.gmra.mxu1 %v642_v30  ;;  %1012 = vmatmul.bf16.gmra.mxu2 %v530_v36  ;;  %v3994_v30 = vadd.s32 4294967288, %v552_v22  ;;  %v619_v22 = vcvt.s32.f32 %v3997_v13 }
  0x75   : > { %2714 = vmatpush.bf16.msra.mxu2 %v4814_v8  ;;  %1101 = vmatmul.bf16.gmra.mxu3 %v530_v36  ;;  %v3963_v36 = vadd.s32 4294967288, %v441_v26 }
  0x76   : > { %2803 = vmatpush.bf16.msra.mxu3 %v4817_v12  ;;  %2536 = vmatpush.bf16.msra.mxu0 %v4810_v3  ;;  %v616_v40 = vcvt.s32.f32 %v3994_v30  ;;  %v412_v30 = vand.u32 255, %v380_v23 }
  0x77   : > { %2625 = vmatpush.bf16.msra.mxu1 %v4812_v7  ;;  %v505_v49 = vcvt.s32.f32 %v3963_v36 }
  0x78   : > { %v644_v51 = vpack.c.bf16 %v617_v41, %v616_v40  ;;  %v556_v36 = vshra.s32 %v412_v30, 4  ;;  %v557_v40 = vshra.s32 %v413_v32, 4  ;;  %v444_v41 = vand.u32 15, %v412_v30  ;;  %v364_v30 = vld [vmem:[%s4793_s6 + $0x80] sm:$0xff] }
  0x79   : > { %2715 = vmatpush.bf16.msra.mxu2 %v4826_v21  ;;  %v532_v54 = vpack.c.bf16 %v505_v49, %v504_v48  ;;  %v309_v48 = vld [vmem:[%s4876_s22 + $0x68] sm:$0xff] }
  0x7a   : > { %2804 = vmatpush.bf16.msra.mxu3 %v4828_v25  ;;  %2537 = vmatpush.bf16.msra.mxu0 %v4821_v16  ;;  %v3998_v49 = vadd.s32 4294967288, %v556_v36  ;;  %v3966_v52 = vadd.s32 4294967288, %v444_v41  ;;  %v384_v36 = vunpack.c.0.s8 %v364_v30 }
  0x7b   : > { %2626 = vmatpush.bf16.msra.mxu1 %v4823_v17  ;;  %1239 = vperm.xlu1 %4471, %v309_v48  }
  0x7c   : > { %v508_v1 = vcvt.s32.f32 %v3966_v52  ;;  %v416_v48 = vand.u32 255, %v384_v36 }
  0x7d   : > { %2716 = vmatpush.bf16.msra.mxu2 %v4837_v34 }
  0x7e   : > { %2805 = vmatpush.bf16.msra.mxu3 %v4840_v38  ;;  %2538 = vmatpush.bf16.msra.mxu0 %v4831_v29  ;;  %v560_v53 = vshra.s32 %v416_v48, 4 }
  0x7f   : > { %2627 = vmatpush.bf16.msra.mxu1 %v4835_v33 }
  0x81   : > { %2717 = vmatpush.bf16.msra.mxu2 %v4855_v46 }
  0x82   : > { %2806 = vmatpush.bf16.msra.mxu3 %v4858_v50  ;;  %2539 = vmatpush.bf16.msra.mxu0 %v4843_v44 }
  0x83   : > { %2628 = vmatpush.bf16.msra.mxu1 %v4853_v45  ;;  %759 = vmatmul.bf16.gmra.mxu0 %v643_v14 }
  0x84   : > { %848 = vmatmul.bf16.gmra.mxu1 %v643_v14  ;;  %1017 = vmatmul.bf16.gmra.mxu2 %v531_v20  ;;  %v3964_v14 = vadd.s32 4294967288, %v442_v0  ;;  %v383_v0 = vunpack.c.3.s8 %v363_v19  ;;  %v307_v19 = vld [vmem:[%s4876_s22 + $0x58] sm:$0xff] }
  0x85   : > { %2718 = vmatpush.bf16.msra.mxu2 %v4868_v58  ;;  %1106 = vmatmul.bf16.gmra.mxu3 %v531_v20  ;;  %v618_v20 = vcvt.s32.f32 %v3996_v6  ;;  %v414_v6 = vand.u32 255, %v382_v59 }
  0x86   : > { %2807 = vmatpush.bf16.msra.mxu3 %v4871_v62  ;;  %2540 = vmatpush.bf16.msra.mxu0 %v4861_v56  ;;  %v506_v26 = vcvt.s32.f32 %v3964_v14  ;;  %v415_v13 = vand.u32 255, %v383_v0  ;;  %v534_v14 = vpack.c.bf16 %v509_v2, %v508_v1  ;;  %v4002_v0 = vadd.s32 4294967288, %v560_v53  ;;  %v312_v2 = vld [vmem:[%s4876_s22 + $0x80] sm:$0xff] }
  0x87   : > { %2629 = vmatpush.bf16.msra.mxu1 %v4866_v57  ;;  %v645_v28 = vpack.c.bf16 %v619_v22, %v618_v20  ;;  %v558_v15 = vshra.s32 %v414_v6, 4  ;;  %v446_v22 = vand.u32 15, %v414_v6  ;;  %1229 = vperm.xlu2 %4472, %v307_v19  }
  0x88   : > { %v533_v35 = vpack.c.bf16 %v507_v27, %v506_v26  ;;  %v559_v20 = vshra.s32 %v415_v13, 4  ;;  %v447_v23 = vand.u32 15, %v415_v13  ;;  %1254 = vperm.xlu1 %4471, %v312_v2   ;;  %v624_v13 = vcvt.s32.f32 %v4002_v0 }
  0x89   : > { %2719 = vmatpush.bf16.msra.mxu2 %v4885_v11  ;;  %v4000_v24 = vadd.s32 4294967288, %v558_v15  ;;  %v3968_v27 = vadd.s32 4294967288, %v446_v22  ;;  %v386_v15 = vunpack.c.2.s8 %v364_v30 }
  0x8a   : > { %2808 = vmatpush.bf16.msra.mxu3 %v4888_v18  ;;  %2541 = vmatpush.bf16.msra.mxu0 %v4879_v5  ;;  %v4001_v26 = vadd.s32 4294967288, %v559_v20  ;;  %v387_v20 = vunpack.c.3.s8 %v364_v30 }
  0x8b   : > { %2630 = vmatpush.bf16.msra.mxu1 %v4883_v10  ;;  %v622_v32 = vcvt.s32.f32 %v4000_v24  ;;  %v510_v41 = vcvt.s32.f32 %v3968_v27  ;;  %v310_v27 = vld [vmem:[%s4876_s22 + $0x70] sm:$0xff] }
  0x8c   : > { %v419_v19 = vand.u32 255, %v387_v20 }
  0x8d   : > { %2720 = vmatpush.bf16.msra.mxu2 %v4899_v39 }
  0x8e   : > { %2809 = vmatpush.bf16.msra.mxu3 %v4902_v47  ;;  %2542 = vmatpush.bf16.msra.mxu0 %v4893_v31 }
  0x8f   : > { %2631 = vmatpush.bf16.msra.mxu1 %v4897_v37  ;;  %1244 = vperm.xlu2 %4472, %v310_v27  }
  0x91   : > { %2721 = vmatpush.bf16.msra.mxu2 %v4909_v63 }
  0x92   : > { %2810 = vmatpush.bf16.msra.mxu3 %v4915_v9  ;;  %2543 = vmatpush.bf16.msra.mxu0 %v4905_v60 }
  0x93   : > { %764 = vmatmul.bf16.gmra.mxu0 %v644_v51  ;;  %2632 = vmatpush.bf16.msra.mxu1 %v4907_v61 }
  0x94   : > { %853 = vmatmul.bf16.gmra.mxu1 %v644_v51  ;;  %1022 = vmatmul.bf16.gmra.mxu2 %v532_v54  ;;  %v3999_v51 = vadd.s32 4294967288, %v557_v40  ;;  %v385_v40 = vunpack.c.1.s8 %v364_v30  ;;  %v451_v30 = vand.u32 15, %v419_v19 }
  0x95   : > { %1111 = vmatmul.bf16.gmra.mxu3 %v532_v54  ;;  %v620_v54 = vcvt.s32.f32 %v3998_v49 }
  0x96   : > { %v621_v55 = vcvt.s32.f32 %v3999_v51  ;;  %v417_v49 = vand.u32 255, %v385_v40  ;;  %v311_v51 = vld [vmem:[%s4876_s22 + $0x78] sm:$0xff]  ;;  %v563_v40 = vshra.s32 %v419_v19, 4  ;;  %v3973_v0 = vadd.s32 4294967288, %v451_v30 }
  0x97   : > { %1249 = vperm.xlu0 %4470, %v311_v51   ;;  %v5008_v51 = vld [vmem:[%s4793_s6 + $0xa0] sm:$0xff] }
  0x98   : > { %v646_v4 = vpack.c.bf16 %v621_v55, %v620_v54  ;;  %v561_v54 = vshra.s32 %v417_v49, 4  ;;  %v448_v55 = vand.u32 15, %v416_v48  ;;  %v449_v59 = vand.u32 15, %v417_v49 }
  0x99   : > { %v4005_v49 = vadd.s32 4294967288, %v563_v40  ;;  %v389_v20 = vunpack.c.1.s8 %v5008_v51 }
  0x9a   : > { %v4003_v1 = vadd.s32 4294967288, %v561_v54  ;;  %v3971_v6 = vadd.s32 4294967288, %v449_v59 }
  0xa3   : > { %769 = vmatmul.bf16.gmra.mxu0 %v645_v28 }
  0xa4   : > { %858 = vmatmul.bf16.gmra.mxu1 %v645_v28  ;;  %1027 = vmatmul.bf16.gmra.mxu2 %v533_v35  ;;  %v3969_v28 = vadd.s32 4294967288, %v447_v23  ;;  %v513_v23 = vcvt.s32.f32 %v3971_v6  ;;  %v388_v6 = vunpack.c.0.s8 %v5008_v51 }
  0xa5   : > { %1116 = vmatmul.bf16.gmra.mxu3 %v533_v35  ;;  %v623_v35 = vcvt.s32.f32 %v4001_v26  ;;  %v418_v26 = vand.u32 255, %v386_v15  ;;  %v627_v15 = vcvt.s32.f32 %v4005_v49 }
  0xa6   : > { %v511_v42 = vcvt.s32.f32 %v3969_v28 }
  0xa7   : > { %v647_v43 = vpack.c.bf16 %v623_v35, %v622_v32  ;;  %v562_v36 = vshra.s32 %v418_v26, 4 }
  0xa8   : > { %v535_v52 = vpack.c.bf16 %v511_v42, %v510_v41  ;;  %v450_v41 = vand.u32 15, %v418_v26 }
  0xa9   : > { %v4004_v48 = vadd.s32 4294967288, %v562_v36 }
  0xaa   : > { %v3972_v59 = vadd.s32 4294967288, %v450_v41 }
  0xb3   : > { %774 = vmatmul.bf16.gmra.mxu0 %v646_v4 }
  0xb4   : > { %863 = vmatmul.bf16.gmra.mxu1 %v646_v4  ;;  %1032 = vmatmul.bf16.gmra.mxu2 %v534_v14  ;;  %v3970_v4 = vadd.s32 4294967288, %v448_v55 }
  0xb5   : > { %1121 = vmatmul.bf16.gmra.mxu3 %v534_v14  ;;  %v625_v14 = vcvt.s32.f32 %v4003_v1 }
  0xb6   : > { %v512_v22 = vcvt.s32.f32 %v3970_v4  ;;  %v5004_v42 = vpop.permute.xlu0 %1174 }
  0xb7   : > { %v648_v24 = vpack.c.bf16 %v625_v14, %v624_v13  ;;  %v626_v14 = vcvt.s32.f32 %v4004_v48 }
  0xb8   : > { %v536_v32 = vpack.c.bf16 %v513_v23, %v512_v22  ;;  %v514_v22 = vcvt.s32.f32 %v3972_v59  ;;  %v515_v23 = vcvt.s32.f32 %v3973_v0 }
  0xb9   : > { %v649_v27 = vpack.c.bf16 %v627_v15, %v626_v14 }
  0xba   : > { %v537_v41 = vpack.c.bf16 %v515_v23, %v514_v22 }
  0xbc   : > { %v5026_v59 = vpop.permute.xlu1 %1184 }
  0xbe   : > { %v5019_v19 = vpop.permute.xlu0 %1179 }
  0xc3   : > { %779 = vmatmul.bf16.gmra.mxu0 %v647_v43 }
  0xc4   : > { %868 = vmatmul.bf16.gmra.mxu1 %v647_v43  ;;  %1037 = vmatmul.bf16.gmra.mxu2 %v535_v52 }
  0xc5   : > { %1126 = vmatmul.bf16.gmra.mxu3 %v535_v52  ;;  %v314_v52 = vld [vmem:[%s4876_s22 + $0x90] sm:$0xff] }
  0xc6   : > { %1264 = vperm.xlu0 %4470, %v314_v52  }
  0xd0   : > { %v745_v28 = vpop.f32.mrf.mxu0 }
  0xd1   : > { %v834_v35 = vpop.f32.mrf.mxu1 }
  0xd3   : > { %784 = vmatmul.bf16.gmra.mxu0 %v648_v24 }
  0xd4   : > { %873 = vmatmul.bf16.gmra.mxu1 %v648_v24  ;;  %1042 = vmatmul.bf16.gmra.mxu2 %v536_v32  ;;  %v420_v24 = vand.u32 255, %v388_v6 }
  0xd5   : > { %1131 = vmatmul.bf16.gmra.mxu3 %v536_v32  ;;  %v315_v32 = vld [vmem:[%s4876_s22 + $0x98] sm:$0xff] }
  0xd6   : > { %1269 = vperm.xlu1 %4471, %v315_v32   ;;  %v564_v49 = vshra.s32 %v420_v24, 4  ;;  %v390_v32 = vunpack.c.2.s8 %v5008_v51 }
  0xd7   : > { %v1003_v43 = vpop.f32.mrf.mxu2 }
  0xd8   : > { %v1004_v53 = vadd.f32 %v1003_v43, %v745_v28  ;;  %v1092_v54 = vpop.f32.mrf.mxu3  ;;  %v747_v55 = vpop.f32.mrf.mxu0  ;;  %v421_v28 = vand.u32 255, %v389_v20  ;;  %v4006_v0 = vadd.s32 4294967288, %v564_v49 }
  0xd9   : > { %v1093_v1 = vadd.f32 %v1092_v54, %v834_v35  ;;  %v836_v2 = vpop.f32.mrf.mxu1  ;;  %v452_v54 = vand.u32 15, %v420_v24 }
  0xda   : > { %v1332_v4 = vmul.f32 %v5004_v42, %v1004_v53  ;;  %v565_v53 = vshra.s32 %v421_v28, 4 }
  0xdb   : > { %v1333_v13 = vmul.f32 %v5004_v42, %v1093_v1  ;;  %v3974_v15 = vadd.s32 4294967288, %v452_v54 }
  0xdc   : > { %1396 = vst [vmem:[%s5015_s8] sm:$0xff] %v1332_v4  ;;  %v313_v4 = vld [vmem:[%s4876_s22 + $0x88] sm:$0xff] }
  0xdd   : > { %1397 = vst [vmem:[%s5015_s8 + $0x8] sm:$0xff] %v1333_v13  ;;  %1259 = vperm.xlu2 %4472, %v313_v4  }
  0xdf   : > { %v1005_v26 = vpop.f32.mrf.mxu2 }
  0xe0   : > { %v1006_v35 = vadd.f32 %v1005_v26, %v747_v55  ;;  %v1094_v36 = vpop.f32.mrf.mxu3  ;;  %v750_v40 = vpop.f32.mrf.mxu0  ;;  %v453_v55 = vand.u32 15, %v421_v28  ;;  %v628_v26 = vcvt.s32.f32 %v4006_v0 }
  0xe1   : > { %v1095_v30 = vadd.f32 %v1094_v36, %v836_v2  ;;  %v839_v43 = vpop.f32.mrf.mxu1  ;;  %v4007_v2 = vadd.s32 4294967288, %v565_v53  ;;  %v516_v36 = vcvt.s32.f32 %v3974_v15 }
  0xe2   : > { %v1334_v48 = vmul.f32 %v5019_v19, %v1006_v35  ;;  %v3975_v20 = vadd.s32 4294967288, %v453_v55  ;;  %v391_v35 = vunpack.c.3.s8 %v5008_v51 }
  0xe3   : > { %v1335_v52 = vmul.f32 %v5019_v19, %v1095_v30  ;;  %789 = vmatmul.bf16.gmra.mxu0 %v649_v27  ;;  %v629_v28 = vcvt.s32.f32 %v4007_v2  ;;  %v5035_v30 = vpop.permute.xlu1 %1189 }
  0xe4   : > { %1398 = vst [vmem:[%s5015_s8 + $0x40] sm:$0xff] %v1334_v48  ;;  %878 = vmatmul.bf16.gmra.mxu1 %v649_v27  ;;  %1047 = vmatmul.bf16.gmra.mxu2 %v537_v41  ;;  %v422_v48 = vand.u32 255, %v390_v32  ;;  %v423_v49 = vand.u32 255, %v391_v35 }
  0xe5   : > { %1399 = vst [vmem:[%s5015_s8 + $0x48] sm:$0xff] %v1335_v52  ;;  %1136 = vmatmul.bf16.gmra.mxu3 %v537_v41  ;;  %v317_v52 = vld [vmem:[%s4876_s22 + $0xa8] sm:$0xff] }
  0xe6   : > { %1279 = vperm.xlu0 %4470, %v317_v52   ;;  %v455_v15 = vand.u32 15, %v423_v49 }
  0xe7   : > { %v1008_v1 = vpop.f32.mrf.mxu2 }
  0xe8   : > { %v1009_v6 = vadd.f32 %v1008_v1, %v750_v40  ;;  %v1097_v13 = vpop.f32.mrf.mxu3  ;;  %v752_v14 = vpop.f32.mrf.mxu0  ;;  %v517_v40 = vcvt.s32.f32 %v3975_v20 }
  0xe9   : > { %v1098_v22 = vadd.f32 %v1097_v13, %v839_v43  ;;  %v841_v23 = vpop.f32.mrf.mxu1  ;;  %v650_v43 = vpack.c.bf16 %v629_v28, %v628_v26  ;;  %v567_v13 = vshra.s32 %v423_v49, 4  ;;  %v5042_v20 = vpop.permute.xlu2 %1194  ;;  %v5045_v26 = vld [vmem:[%s4793_s6 + $0xc0] sm:$0xff] }
  0xea   : > { %v1336_v24 = vmul.f32 %v5026_v59, %v1009_v6  ;;  %v538_v0 = vpack.c.bf16 %v517_v40, %v516_v36  ;;  %v566_v6 = vshra.s32 %v422_v48, 4  ;;  %v3977_v40 = vadd.s32 4294967288, %v455_v15 }
  0xeb   : > { %v1337_v27 = vmul.f32 %v5026_v59, %v1098_v22  ;;  %v392_v49 = vunpack.c.0.s8 %v5045_v26 }
  0xec   : > { %1400 = vst [vmem:[%s5015_s8 + $0x80] sm:$0xff] %v1336_v24  ;;  %v4009_v24 = vadd.s32 4294967288, %v567_v13 }
  0xed   : > { %1401 = vst [vmem:[%s5015_s8 + $0x88] sm:$0xff] %v1337_v27  ;;  %v318_v27 = vld [vmem:[%s4876_s22 + $0xb0] sm:$0xff] }
  0xee   : > { %1284 = vperm.xlu1 %4471, %v318_v27  }
  0xef   : > { %v1010_v41 = vpop.f32.mrf.mxu2 }
  0xf0   : > { %v1011_v53 = vadd.f32 %v1010_v41, %v752_v14  ;;  %v1099_v54 = vpop.f32.mrf.mxu3  ;;  %v755_v55 = vpop.f32.mrf.mxu0  ;;  %v454_v14 = vand.u32 15, %v422_v48 }
  0xf1   : > { %v1100_v1 = vadd.f32 %v1099_v54, %v841_v23  ;;  %v844_v51 = vpop.f32.mrf.mxu1  ;;  %v4008_v23 = vadd.s32 4294967288, %v566_v6  ;;  %v631_v54 = vcvt.s32.f32 %v4009_v24  ;;  %v5054_v6 = vpop.permute.xlu2 %1199 }
  0xf2   : > { %v1338_v2 = vmul.f32 %v5035_v30, %v1011_v53  ;;  %v3976_v36 = vadd.s32 4294967288, %v454_v14  ;;  %v316_v14 = vld [vmem:[%s4876_s22 + $0xa0] sm:$0xff] }
  0xf3   : > { %v1339_v4 = vmul.f32 %v5035_v30, %v1100_v1  ;;  %794 = vmatmul.bf16.gmra.mxu0 %v650_v43  ;;  %v630_v53 = vcvt.s32.f32 %v4008_v23  ;;  %v519_v1 = vcvt.s32.f32 %v3977_v40  ;;  %1274 = vperm.xlu2 %4472, %v316_v14  }
  0xf4   : > { %1402 = vst [vmem:[%s5015_s8 + $0xc0] sm:$0xff] %v1338_v2  ;;  %883 = vmatmul.bf16.gmra.mxu1 %v650_v43  ;;  %1052 = vmatmul.bf16.gmra.mxu2 %v538_v0  ;;  %v424_v2 = vand.u32 255, %v392_v49 }
  0xf5   : > { %1403 = vst [vmem:[%s5015_s8 + $0xc8] sm:$0xff] %v1339_v4  ;;  %1141 = vmatmul.bf16.gmra.mxu3 %v538_v0  ;;  %v393_v0 = vunpack.c.1.s8 %v5045_v26 }
  0xf7   : > { %v1013_v22 = vpop.f32.mrf.mxu2  ;;  %v425_v13 = vand.u32 255, %v393_v0 }
  0xf8   : > { %v1014_v28 = vadd.f32 %v1013_v22, %v755_v55  ;;  %v1102_v32 = vpop.f32.mrf.mxu3  ;;  %v757_v35 = vpop.f32.mrf.mxu0  ;;  %v518_v55 = vcvt.s32.f32 %v3976_v36  ;;  %v568_v36 = vshra.s32 %v424_v2, 4 }
  0xf9   : > { %v1103_v41 = vadd.f32 %v1102_v32, %v844_v51  ;;  %v846_v43 = vpop.f32.mrf.mxu1  ;;  %v651_v51 = vpack.c.bf16 %v631_v54, %v630_v53  ;;  %v5061_v53 = vpop.permute.xlu0 %1204  ;;  %v320_v54 = vld [vmem:[%s4876_s22 + $0xc0] sm:$0xff] }
  0xfa   : > { %v1340_v48 = vmul.f32 %v5042_v20, %v1014_v28  ;;  %v539_v23 = vpack.c.bf16 %v519_v1, %v518_v55  ;;  %v4010_v49 = vadd.s32 4294967288, %v568_v36  ;;  %1294 = vperm.xlu0 %4470, %v320_v54  }
  0xfb   : > { %v1341_v52 = vmul.f32 %v5042_v20, %v1103_v41  ;;  %v569_v41 = vshra.s32 %v425_v13, 4 }
  0xfc   : > { %1404 = vst [vmem:[%s5015_s8 + $0x100] sm:$0xff] %v1340_v48  ;;  %v456_v48 = vand.u32 15, %v424_v2 }
  0xfd   : > { %1405 = vst [vmem:[%s5015_s8 + $0x108] sm:$0xff] %v1341_v52 }
  0xff   : > { %v1015_v4 = vpop.f32.mrf.mxu2 }
 0x100   : > { %v1016_v15 = vadd.f32 %v1015_v4, %v757_v35  ;;  %v1104_v22 = vpop.f32.mrf.mxu3  ;;  %v760_v27 = vpop.f32.mrf.mxu0  ;;  %v457_v35 = vand.u32 15, %v425_v13  ;;  %v3978_v4 = vadd.s32 4294967288, %v456_v48  ;;  %v632_v13 = vcvt.s32.f32 %v4010_v49 }
 0x101   : > { %v1105_v24 = vadd.f32 %v1104_v22, %v846_v43  ;;  %v849_v28 = vpop.f32.mrf.mxu1  ;;  %v4011_v43 = vadd.s32 4294967288, %v569_v41  ;;  %v5070_v41 = vpop.permute.xlu1 %1209 }
 0x102   : > { %v1342_v32 = vmul.f32 %v5054_v6, %v1016_v15  ;;  %v3979_v14 = vadd.s32 4294967288, %v457_v35  ;;  %5889 = vst [vmem:[#allocation12_spill] sm:$0xff] %v5070_v41 }
 0x103   : > { %v1343_v40 = vmul.f32 %v5054_v6, %v1105_v24  ;;  %799 = vmatmul.bf16.gmra.mxu0 %v651_v51  ;;  %v394_v24 = vunpack.c.2.s8 %v5045_v26 }
 0x104   : > { %1406 = vst [vmem:[%s5015_s8 + $0x140] sm:$0xff] %v1342_v32  ;;  %888 = vmatmul.bf16.gmra.mxu1 %v651_v51  ;;  %1057 = vmatmul.bf16.gmra.mxu2 %v539_v23  ;;  %v395_v32 = vunpack.c.3.s8 %v5045_v26  ;;  %v521_v36 = vcvt.s32.f32 %v3979_v14 }
 0x105   : > { %1407 = vst [vmem:[%s5015_s8 + $0x148] sm:$0xff] %v1343_v40  ;;  %1146 = vmatmul.bf16.gmra.mxu3 %v539_v23  ;;  %v633_v23 = vcvt.s32.f32 %v4011_v43  ;;  %v426_v48 = vand.u32 255, %v394_v24 }
 0x106   : > { %v427_v35 = vand.u32 255, %v395_v32  ;;  %v5080_v32 = vld [vmem:[%s4793_s6 + $0xe0] sm:$0xff] }
 0x107   : > { %v1018_v52 = vpop.f32.mrf.mxu2 }
 0x108   : > { %v1019_v0 = vadd.f32 %v1018_v52, %v760_v27  ;;  %v1107_v55 = vpop.f32.mrf.mxu3  ;;  %v762_v1 = vpop.f32.mrf.mxu0  ;;  %v520_v27 = vcvt.s32.f32 %v3978_v4  ;;  %v321_v52 = vld [vmem:[%s4876_s22 + $0xc8] sm:$0xff] }
 0x109   : > { %v1108_v51 = vadd.f32 %v1107_v55, %v849_v28  ;;  %v851_v15 = vpop.f32.mrf.mxu1  ;;  %v652_v28 = vpack.c.bf16 %v633_v23, %v632_v13  ;;  %1299 = vperm.xlu1 %4471, %v321_v52   ;;  %v459_v13 = vand.u32 15, %v427_v35  ;;  %v5077_v23 = vpop.permute.xlu2 %1214 }
 0x10a   : > { %v1344_v2 = vmul.f32 %v5061_v53, %v1019_v0  ;;  %v540_v0 = vpack.c.bf16 %v521_v36, %v520_v27  ;;  %5890 = vst [vmem:[#allocation13_spill] sm:$0xff] %v5077_v23  ;;  %v319_v27 = vld [vmem:[%s4876_s22 + $0xb8] sm:$0xff] }
 0x10b   : > { %v1345_v22 = vmul.f32 %v5061_v53, %v1108_v51  ;;  %v570_v51 = vshra.s32 %v426_v48, 4  ;;  %1289 = vperm.xlu2 %4472, %v319_v27  }
 0x10c   : > { %1408 = vst [vmem:[%s5015_s8 + $0x180] sm:$0xff] %v1344_v2  ;;  %v571_v2 = vshra.s32 %v427_v35, 4 }
 0x10d   : > { %1409 = vst [vmem:[%s5015_s8 + $0x188] sm:$0xff] %v1345_v22 }
 0x10e   : > { %v4013_v24 = vadd.s32 4294967288, %v571_v2 }
 0x10f   : > { %v1020_v40 = vpop.f32.mrf.mxu2 }
 0x110   : > { %v1021_v49 = vadd.f32 %v1020_v40, %v762_v1  ;;  %v1109_v54 = vpop.f32.mrf.mxu3  ;;  %v765_v43 = vpop.f32.mrf.mxu0  ;;  %v458_v1 = vand.u32 15, %v426_v48 }
 0x111   : > { %v1110_v55 = vadd.f32 %v1109_v54, %v851_v15  ;;  %v854_v26 = vpop.f32.mrf.mxu1  ;;  %v4012_v15 = vadd.s32 4294967288, %v570_v51  ;;  %v397_v51 = vunpack.c.1.s8 %v5080_v32 }
 0x112   : > { %v1346_v4 = vmul.f32 %v5070_v41, %v1021_v49  ;;  %v3980_v49 = vadd.s32 4294967288, %v458_v1 }
 0x113   : > { %v1347_v14 = vmul.f32 %v5070_v41, %v1110_v55  ;;  %804 = vmatmul.bf16.gmra.mxu0 %v652_v28  ;;  %v429_v27 = vand.u32 255, %v397_v51  ;;  %v5096_v51 = vpop.permute.xlu1 %1224 }
 0x114   : > { %1410 = vst [vmem:[%s5015_s8 + $0x1c0] sm:$0xff] %v1346_v4  ;;  %893 = vmatmul.bf16.gmra.mxu1 %v652_v28  ;;  %1062 = vmatmul.bf16.gmra.mxu2 %v540_v0  ;;  %v3981_v28 = vadd.s32 4294967288, %v459_v13  ;;  %v634_v4 = vcvt.s32.f32 %v4012_v15 }
 0x115   : > { %1411 = vst [vmem:[%s5015_s8 + $0x1c8] sm:$0xff] %v1347_v14  ;;  %1151 = vmatmul.bf16.gmra.mxu3 %v540_v0  ;;  %v396_v0 = vunpack.c.0.s8 %v5080_v32  ;;  %v635_v14 = vcvt.s32.f32 %v4013_v24 }
 0x116   : > { %v523_v2 = vcvt.s32.f32 %v3981_v28  ;;  %5892 = vst [vmem:[#allocation15_spill] sm:$0xff] %v5096_v51 }
 0x117   : > { %v1023_v22 = vpop.f32.mrf.mxu2  ;;  %v428_v1 = vand.u32 255, %v396_v0  ;;  %v573_v0 = vshra.s32 %v429_v27, 4 }
 0x118   : > { %v1024_v36 = vadd.f32 %v1023_v22, %v765_v43  ;;  %v1112_v40 = vpop.f32.mrf.mxu3  ;;  %v767_v52 = vpop.f32.mrf.mxu0  ;;  %v522_v43 = vcvt.s32.f32 %v3980_v49 }
 0x119   : > { %v1113_v48 = vadd.f32 %v1112_v40, %v854_v26  ;;  %v856_v35 = vpop.f32.mrf.mxu1  ;;  %v5089_v22 = vpop.permute.xlu0 %1219  ;;  %v653_v26 = vpack.c.bf16 %v635_v14, %v634_v4  ;;  %v572_v28 = vshra.s32 %v428_v1, 4 }
 0x11a   : > { %v1348_v54 = vmul.f32 %v5077_v23, %v1024_v36  ;;  %5891 = vst [vmem:[#allocation14_spill] sm:$0xff] %v5089_v22  ;;  %v323_v36 = vld [vmem:[%s4876_s22 + $0xd8] sm:$0xff]  ;;  %v541_v15 = vpack.c.bf16 %v523_v2, %v522_v43 }
 0x11b   : > { %v1349_v55 = vmul.f32 %v5077_v23, %v1113_v48  ;;  %1309 = vperm.xlu0 %4470, %v323_v36   ;;  %v4014_v4 = vadd.s32 4294967288, %v572_v28  ;;  %v398_v28 = vunpack.c.2.s8 %v5080_v32 }
 0x11c   : > { %1412 = vst [vmem:[%s5015_s8 + $0x200] sm:$0xff] %v1348_v54 }
 0x11d   : > { %1413 = vst [vmem:[%s5015_s8 + $0x208] sm:$0xff] %v1349_v55  ;;  %v460_v55 = vand.u32 15, %v428_v1 }
 0x11f   : > { %v1025_v13 = vpop.f32.mrf.mxu2  ;;  %v3982_v36 = vadd.s32 4294967288, %v460_v55 }
 0x120   : > { %v1026_v40 = vadd.f32 %v1025_v13, %v767_v52  ;;  %v1114_v41 = vpop.f32.mrf.mxu3  ;;  %v770_v48 = vpop.f32.mrf.mxu0  ;;  %v461_v52 = vand.u32 15, %v429_v27  ;;  %v636_v27 = vcvt.s32.f32 %v4014_v4 }
 0x121   : > { %v1115_v24 = vadd.f32 %v1114_v41, %v856_v35  ;;  %v859_v23 = vpop.f32.mrf.mxu1  ;;  %v4015_v41 = vadd.s32 4294967288, %v573_v0  ;;  %v324_v35 = vld [vmem:[%s4876_s22 + $0xe0] sm:$0xff] }
 0x122   : > { %v1350_v49 = vmul.f32 %v5089_v22, %v1026_v40  ;;  %v3983_v40 = vadd.s32 4294967288, %v461_v52  ;;  %1314 = vperm.xlu1 %4471, %v324_v35   ;;  %v5105_v52 = vpop.permute.xlu2 %1229 }
 0x123   : > { %v1351_v54 = vmul.f32 %v5089_v22, %v1115_v24  ;;  %809 = vmatmul.bf16.gmra.mxu0 %v653_v26  ;;  %5893 = vst [vmem:[#allocation16_spill] sm:$0xff] %v5105_v52 }
 0x124   : > { %1414 = vst [vmem:[%s5015_s8 + $0x240] sm:$0xff] %v1350_v49  ;;  %898 = vmatmul.bf16.gmra.mxu1 %v653_v26  ;;  %1067 = vmatmul.bf16.gmra.mxu2 %v541_v15  ;;  %v637_v49 = vcvt.s32.f32 %v4015_v41  ;;  %v525_v0 = vcvt.s32.f32 %v3983_v40 }
 0x125   : > { %1415 = vst [vmem:[%s5015_s8 + $0x248] sm:$0xff] %v1351_v54  ;;  %1156 = vmatmul.bf16.gmra.mxu3 %v541_v15  ;;  %v399_v54 = vunpack.c.3.s8 %v5080_v32 }
 0x127   : > { %v1028_v14 = vpop.f32.mrf.mxu2  ;;  %v431_v35 = vand.u32 255, %v399_v54 }
 0x128   : > { %v1029_v43 = vadd.f32 %v1028_v14, %v770_v48  ;;  %v1117_v2 = vpop.f32.mrf.mxu3  ;;  %v772_v13 = vpop.f32.mrf.mxu0  ;;  %v524_v48 = vcvt.s32.f32 %v3982_v36  ;;  %v430_v14 = vand.u32 255, %v398_v28 }
 0x129   : > { %v1118_v26 = vadd.f32 %v1117_v2, %v859_v23  ;;  %v861_v24 = vpop.f32.mrf.mxu1  ;;  %v654_v23 = vpack.c.bf16 %v637_v49, %v636_v27  ;;  %v575_v27 = vshra.s32 %v431_v35, 4  ;;  %v5112_v28 = vpop.permute.xlu0 %1234 }
 0x12a   : > { %v1352_v1 = vmul.f32 %v5096_v51, %v1029_v43  ;;  %v322_v43 = vld [vmem:[%s4876_s22 + $0xd0] sm:$0xff]  ;;  %5894 = vst [vmem:[#allocation17_spill] sm:$0xff] %v5112_v28 }
 0x12b   : > { %v1353_v15 = vmul.f32 %v5096_v51, %v1118_v26  ;;  %v542_v26 = vpack.c.bf16 %v525_v0, %v524_v48  ;;  %1304 = vperm.xlu2 %4472, %v322_v43   ;;  %v4017_v54 = vadd.s32 4294967288, %v575_v27  ;;  %v5115_v48 = vld [vmem:[%s4793_s6 + $0x8] sm:$0xff] }
 0x12c   : > { %1416 = vst [vmem:[%s5015_s8 + $0x280] sm:$0xff] %v1352_v1  ;;  %v574_v1 = vshra.s32 %v430_v14, 4  ;;  %v1469_v27 = vunpack.c.1.s8 %v5115_v48 }
 0x12d   : > { %1417 = vst [vmem:[%s5015_s8 + $0x288] sm:$0xff] %v1353_v15  ;;  %v463_v15 = vand.u32 15, %v431_v35 }
 0x12f   : > { %v1030_v55 = vpop.f32.mrf.mxu2 }
 0x130   : > { %v1031_v4 = vadd.f32 %v1030_v55, %v772_v13  ;;  %v1119_v2 = vpop.f32.mrf.mxu3  ;;  %v775_v41 = vpop.f32.mrf.mxu0  ;;  %v462_v13 = vand.u32 15, %v430_v14 }
 0x131   : > { %v1120_v51 = vadd.f32 %v1119_v2, %v861_v24  ;;  %v864_v32 = vpop.f32.mrf.mxu1  ;;  %v4016_v24 = vadd.s32 4294967288, %v574_v1  ;;  %v639_v1 = vcvt.s32.f32 %v4017_v54 }
 0x132   : > { %v1354_v36 = vmul.f32 %v5105_v52, %v1031_v4  ;;  %v3984_v4 = vadd.s32 4294967288, %v462_v13 }
 0x133   : > { %v1355_v40 = vmul.f32 %v5105_v52, %v1120_v51  ;;  %814 = vmatmul.bf16.gmra.mxu0 %v654_v23  ;;  %v326_v51 = vld [vmem:[%s4876_s22 + $0xf0] sm:$0xff] }
 0x134   : > { %1418 = vst [vmem:[%s5015_s8 + $0x2c0] sm:$0xff] %v1354_v36  ;;  %903 = vmatmul.bf16.gmra.mxu1 %v654_v23  ;;  %1072 = vmatmul.bf16.gmra.mxu2 %v542_v26  ;;  %v3985_v23 = vadd.s32 4294967288, %v463_v15 }
 0x135   : > { %1419 = vst [vmem:[%s5015_s8 + $0x2c8] sm:$0xff] %v1355_v40  ;;  %1161 = vmatmul.bf16.gmra.mxu3 %v542_v26  ;;  %1324 = vperm.xlu0 %4470, %v326_v51   ;;  %v1468_v26 = vunpack.c.0.s8 %v5115_v48  ;;  %v638_v40 = vcvt.s32.f32 %v4016_v24  ;;  %v5124_v51 = vpop.permute.xlu1 %1239 }
 0x137   : > { %v1033_v49 = vpop.f32.mrf.mxu2  ;;  %v1500_v13 = vand.u32 255, %v1468_v26 }
 0x138   : > { %v1034_v0 = vadd.f32 %v1033_v49, %v775_v41  ;;  %v1122_v55 = vpop.f32.mrf.mxu3  ;;  %v777_v43 = vpop.f32.mrf.mxu0  ;;  %v526_v41 = vcvt.s32.f32 %v3984_v4  ;;  %v527_v49 = vcvt.s32.f32 %v3985_v23 }
 0x139   : > { %v1123_v14 = vadd.f32 %v1122_v55, %v864_v32  ;;  %v866_v35 = vpop.f32.mrf.mxu1  ;;  %v655_v32 = vpack.c.bf16 %v639_v1, %v638_v40  ;;  %v1501_v55 = vand.u32 255, %v1469_v27  ;;  %v1644_v23 = vshra.s32 %v1500_v13, 4  ;;  %v5131_v27 = vpop.permute.xlu2 %1244 }
 0x13a   : > { %v1356_v2 = vmul.f32 %v5112_v28, %v1034_v0  ;;  %v327_v0 = vld [vmem:[%s4876_s22 + $0xf8] sm:$0xff]  ;;  %v543_v24 = vpack.c.bf16 %v527_v49, %v526_v41  ;;  %5895 = vst [vmem:[#allocation18_spill] sm:$0xff] %v5131_v27 }
 0x13b   : > { %v1357_v36 = vmul.f32 %v5112_v28, %v1123_v14  ;;  %1329 = vperm.xlu1 %4471, %v327_v0   ;;  %v1645_v26 = vshra.s32 %v1501_v55, 4  ;;  %v4178_v40 = vadd.s32 4294967288, %v1644_v23  ;;  %v1470_v23 = vunpack.c.2.s8 %v5115_v48 }
 0x13c   : > { %1420 = vst [vmem:[%s5015_s8 + $0x300] sm:$0xff] %v1356_v2 }
 0x13d   : > { %1421 = vst [vmem:[%s5015_s8 + $0x308] sm:$0xff] %v1357_v36  ;;  %v1532_v36 = vand.u32 15, %v1500_v13 }
 0x13f   : > { %v1035_v15 = vpop.f32.mrf.mxu2 }
 0x140   : > { %v1036_v52 = vadd.f32 %v1035_v15, %v777_v43  ;;  %v1124_v22 = vpop.f32.mrf.mxu3  ;;  %v780_v14 = vpop.f32.mrf.mxu0  ;;  %v1533_v43 = vand.u32 15, %v1501_v55  ;;  %v4146_v15 = vadd.s32 4294967288, %v1532_v36  ;;  %v1708_v55 = vcvt.s32.f32 %v4178_v40 }
 0x141   : > { %v1125_v54 = vadd.f32 %v1124_v22, %v866_v35  ;;  %v869_v28 = vpop.f32.mrf.mxu1  ;;  %v4179_v22 = vadd.s32 4294967288, %v1645_v26  ;;  %v5140_v36 = vpop.permute.xlu0 %1249 }
 0x142   : > { %v1358_v4 = vmul.f32 %v5124_v51, %v1036_v52  ;;  %v325_v52 = vld [vmem:[%s4876_s22 + $0xe8] sm:$0xff]  ;;  %v4147_v0 = vadd.s32 4294967288, %v1533_v43  ;;  %v1502_v43 = vand.u32 255, %v1470_v23 }
 0x143   : > { %v1359_v2 = vmul.f32 %v5124_v51, %v1125_v54  ;;  %819 = vmatmul.bf16.gmra.mxu0 %v655_v32  ;;  %1319 = vperm.xlu2 %4472, %v325_v52  }
 0x144   : > { %1422 = vst [vmem:[%s5015_s8 + $0x340] sm:$0xff] %v1358_v4  ;;  %908 = vmatmul.bf16.gmra.mxu1 %v655_v32  ;;  %1077 = vmatmul.bf16.gmra.mxu2 %v543_v24  ;;  %v1709_v4 = vcvt.s32.f32 %v4179_v22  ;;  %v1597_v26 = vcvt.s32.f32 %v4147_v0  ;;  %v1646_v0 = vshra.s32 %v1502_v43, 4 }
 0x145   : > { %1423 = vst [vmem:[%s5015_s8 + $0x348] sm:$0xff] %v1359_v2  ;;  %1166 = vmatmul.bf16.gmra.mxu3 %v543_v24  ;;  %v1471_v2 = vunpack.c.3.s8 %v5115_v48 }
 0x147   : > { %v1038_v1 = vpop.f32.mrf.mxu2  ;;  %v1503_v52 = vand.u32 255, %v1471_v2  ;;  %v5152_v2 = vld [vmem:[%s4793_s6 + $0x28] sm:$0xff] }
 0x148   : > { %v1039_v35 = vadd.f32 %v1038_v1, %v780_v14  ;;  %v1127_v41 = vpop.f32.mrf.mxu3  ;;  %v782_v49 = vpop.f32.mrf.mxu0  ;;  %v1596_v14 = vcvt.s32.f32 %v4146_v15 }
 0x149   : > { %v1128_v32 = vadd.f32 %v1127_v41, %v869_v28  ;;  %v871_v54 = vpop.f32.mrf.mxu1  ;;  %v1740_v28 = vpack.c.bf16 %v1709_v4, %v1708_v55  ;;  %v1534_v55 = vand.u32 15, %v1502_v43  ;;  %v4180_v4 = vadd.s32 4294967288, %v1646_v0 }
 0x14a   : > { %v1360_v13 = vmul.f32 %v5131_v27, %v1039_v35  ;;  %v1628_v22 = vpack.c.bf16 %v1597_v26, %v1596_v14 }
 0x14b   : > { %v1361_v24 = vmul.f32 %v5131_v27, %v1128_v32 }
 0x14c   : > { %1424 = vst [vmem:[%s5015_s8 + $0x380] sm:$0xff] %v1360_v13  ;;  %v1647_v13 = vshra.s32 %v1503_v52, 4 }
 0x14d   : > { %1425 = vst [vmem:[%s5015_s8 + $0x388] sm:$0xff] %v1361_v24  ;;  %v1535_v24 = vand.u32 15, %v1503_v52  ;;  %v1472_v52 = vunpack.c.0.s8 %v5152_v2 }
 0x14e   : > { %v4181_v23 = vadd.s32 4294967288, %v1647_v13 }
 0x14f   : > { %v1040_v1 = vpop.f32.mrf.mxu2  ;;  %v4149_v43 = vadd.s32 4294967288, %v1535_v24 }
 0x150   : > { %v1041_v35 = vadd.f32 %v1040_v1, %v782_v49  ;;  %v1129_v40 = vpop.f32.mrf.mxu3  ;;  %v785_v41 = vpop.f32.mrf.mxu0 }
 0x151   : > { %v1130_v32 = vadd.f32 %v1129_v40, %v871_v54  ;;  %v874_v27 = vpop.f32.mrf.mxu1  ;;  %v5149_v54 = vpop.permute.xlu1 %1254  ;;  %v1711_v40 = vcvt.s32.f32 %v4181_v23 }
 0x152   : > { %v1362_v48 = vmul.f32 %v5140_v36, %v1041_v35  ;;  %v1710_v35 = vcvt.s32.f32 %v4180_v4 }
 0x153   : > { %v1363_v15 = vmul.f32 %v5140_v36, %v1130_v32  ;;  %1764 = vmatmul.bf16.vlgmr.msrb.gmra.mxu0 %v1740_v28 }
 0x154   : > { %1426 = vst [vmem:[%s5015_s8 + $0x3c0] sm:$0xff] %v1362_v48  ;;  %1853 = vmatmul.bf16.vlgmr.msrb.gmra.mxu1 %v1740_v28  ;;  %1942 = vmatmul.bf16.vlgmr.msrb.gmra.mxu2 %v1628_v22  ;;  %v4148_v28 = vadd.s32 4294967288, %v1534_v55  ;;  %v1741_v32 = vpack.c.bf16 %v1711_v40, %v1710_v35 }
 0x155   : > { %1427 = vst [vmem:[%s5015_s8 + $0x3c8] sm:$0xff] %v1363_v15  ;;  %2031 = vmatmul.bf16.vlgmr.msrb.gmra.mxu3 %v1628_v22  ;;  %3494 = vmatpush.bf16.msrb.mxu2 %v4814_v8  ;;  %v1599_v22 = vcvt.s32.f32 %v4149_v43 }
 0x156   : > { %3583 = vmatpush.bf16.msrb.mxu3 %v4817_v12  ;;  %3316 = vmatpush.bf16.msrb.mxu0 %v4810_v3 }
 0x157   : > { %v1043_v49 = vpop.f32.mrf.mxu2  ;;  %3405 = vmatpush.bf16.msrb.mxu1 %v4812_v7 }
 0x158   : > { %v1044_v14 = vadd.f32 %v1043_v49, %v785_v41  ;;  %v1132_v26 = vpop.f32.mrf.mxu3  ;;  %v787_v1 = vpop.f32.mrf.mxu0  ;;  %v1473_v41 = vunpack.c.1.s8 %v5152_v2 }
 0x159   : > { %v1133_v8 = vadd.f32 %v1132_v26, %v874_v27  ;;  %v876_v12 = vpop.f32.mrf.mxu1  ;;  %3495 = vmatpush.bf16.msrb.mxu2 %v4826_v21  ;;  %v1598_v27 = vcvt.s32.f32 %v4148_v28  ;;  %v1504_v21 = vand.u32 255, %v1472_v52 }
 0x15a   : > { %v1364_v3 = vmul.f32 %v5149_v54, %v1044_v14  ;;  %3584 = vmatpush.bf16.msrb.mxu3 %v4828_v25  ;;  %3317 = vmatpush.bf16.msrb.mxu0 %v4821_v16  ;;  %v5168_v25 = vpop.permute.xlu2 %1259  ;;  %v1505_v48 = vand.u32 255, %v1473_v41 }
 0x15b   : > { %v1365_v7 = vmul.f32 %v5149_v54, %v1133_v8  ;;  %3406 = vmatpush.bf16.msrb.mxu1 %v4823_v17  ;;  %v1629_v13 = vpack.c.bf16 %v1599_v22, %v1598_v27  ;;  %v1536_v49 = vand.u32 15, %v1504_v21 }
 0x15c   : > { %1428 = vst [vmem:[%s5015_s8 + $0x400] sm:$0xff] %v1364_v3  ;;  %v1537_v4 = vand.u32 15, %v1505_v48  ;;  %v1475_v3 = vunpack.c.3.s8 %v5152_v2 }
 0x15d   : > { %1429 = vst [vmem:[%s5015_s8 + $0x408] sm:$0xff] %v1365_v7  ;;  %3496 = vmatpush.bf16.msrb.mxu2 %v4837_v34 }
 0x15e   : > { %3585 = vmatpush.bf16.msrb.mxu3 %v4840_v38  ;;  %3318 = vmatpush.bf16.msrb.mxu0 %v4831_v29  ;;  %v1648_v29 = vshra.s32 %v1504_v21, 4  ;;  %v4151_v28 = vadd.s32 4294967288, %v1537_v4  ;;  %v1507_v40 = vand.u32 255, %v1475_v3 }
 0x15f   : > { %v1045_v16 = vpop.f32.mrf.mxu2  ;;  %3407 = vmatpush.bf16.msrb.mxu1 %v4835_v33  ;;  %v1649_v33 = vshra.s32 %v1505_v48, 4 }
 0x160   : > { %v1046_v17 = vadd.f32 %v1045_v16, %v787_v1  ;;  %v1134_v15 = vpop.f32.mrf.mxu3  ;;  %v790_v0 = vpop.f32.mrf.mxu0  ;;  %v4150_v1 = vadd.s32 4294967288, %v1536_v49  ;;  %v1601_v7 = vcvt.s32.f32 %v4151_v28  ;;  %v1651_v21 = vshra.s32 %v1507_v40, 4 }
 0x161   : > { %v1135_v55 = vadd.f32 %v1134_v15, %v876_v12  ;;  %v879_v34 = vpop.f32.mrf.mxu1  ;;  %3497 = vmatpush.bf16.msrb.mxu2 %v4855_v46  ;;  %v4182_v46 = vadd.s32 4294967288, %v1648_v29  ;;  %v4183_v23 = vadd.s32 4294967288, %v1649_v33  ;;  %v1474_v12 = vunpack.c.2.s8 %v5152_v2 }
 0x162   : > { %v1366_v38 = vmul.f32 %v5168_v25, %v1046_v17  ;;  %3586 = vmatpush.bf16.msrb.mxu3 %v4858_v50  ;;  %3319 = vmatpush.bf16.msrb.mxu0 %v4843_v44  ;;  %v5182_v50 = vpop.permute.xlu0 %1264  ;;  %v1600_v52 = vcvt.s32.f32 %v4150_v1  ;;  %v5209_v48 = vpop.permute.xlu2 %1274  ;;  %v5212_v17 = vld [vmem:[%s4793_s6 + $0x48] sm:$0xff] }
 0x163   : > { %v1367_v24 = vmul.f32 %v5168_v25, %v1135_v55  ;;  %1769 = vmatmul.bf16.gmra.mxu0 %v1741_v32  ;;  %3408 = vmatpush.bf16.msrb.mxu1 %v4853_v45  ;;  %v1713_v8 = vcvt.s32.f32 %v4183_v23  ;;  %v1506_v35 = vand.u32 255, %v1474_v12 }
 0x164   : > { %1430 = vst [vmem:[%s5015_s8 + $0x440] sm:$0xff] %v1366_v38  ;;  %1858 = vmatmul.bf16.gmra.mxu1 %v1741_v32  ;;  %1947 = vmatmul.bf16.gmra.mxu2 %v1629_v13  ;;  %v1630_v27 = vpack.c.bf16 %v1601_v7, %v1600_v52  ;;  %v1539_v32 = vand.u32 15, %v1507_v40 }
 0x165   : > { %1431 = vst [vmem:[%s5015_s8 + $0x448] sm:$0xff] %v1367_v24  ;;  %2036 = vmatmul.bf16.gmra.mxu3 %v1629_v13  ;;  %3498 = vmatpush.bf16.msrb.mxu2 %v4868_v58  ;;  %v1538_v16 = vand.u32 15, %v1506_v35  ;;  %v1476_v24 = vunpack.c.0.s8 %v5212_v17 }
 0x166   : > { %3587 = vmatpush.bf16.msrb.mxu3 %v4871_v62  ;;  %3320 = vmatpush.bf16.msrb.mxu0 %v4861_v56  ;;  %v1712_v56 = vcvt.s32.f32 %v4182_v46  ;;  %v4153_v55 = vadd.s32 4294967288, %v1539_v32  ;;  %v1477_v46 = vunpack.c.1.s8 %v5212_v17 }
 0x167   : > { %v1048_v44 = vpop.f32.mrf.mxu2  ;;  %3409 = vmatpush.bf16.msrb.mxu1 %v4866_v57 }
 0x168   : > { %v1049_v45 = vadd.f32 %v1048_v44, %v790_v0  ;;  %v1137_v14 = vpop.f32.mrf.mxu3  ;;  %v792_v26 = vpop.f32.mrf.mxu0  ;;  %v1603_v23 = vcvt.s32.f32 %v4153_v55  ;;  %v1509_v28 = vand.u32 255, %v1477_v46 }
 0x169   : > { %v1138_v43 = vadd.f32 %v1137_v14, %v879_v34  ;;  %v881_v58 = vpop.f32.mrf.mxu1  ;;  %3499 = vmatpush.bf16.msrb.mxu2 %v4885_v11  ;;  %v5198_v11 = vpop.permute.xlu1 %1269 }
 0x16a   : > { %v1368_v62 = vmul.f32 %v5182_v50, %v1049_v45  ;;  %3588 = vmatpush.bf16.msrb.mxu3 %v4888_v18  ;;  %3321 = vmatpush.bf16.msrb.mxu0 %v4879_v5  ;;  %v1742_v18 = vpack.c.bf16 %v1713_v8, %v1712_v56  ;;  %v1508_v45 = vand.u32 255, %v1476_v24  ;;  %v1653_v7 = vshra.s32 %v1509_v28, 4 }
 0x16b   : > { %v1369_v57 = vmul.f32 %v5182_v50, %v1138_v43  ;;  %3410 = vmatpush.bf16.msrb.mxu1 %v4883_v10 }
 0x16c   : > { %1432 = vst [vmem:[%s5015_s8 + $0x480] sm:$0xff] %v1368_v62  ;;  %v1652_v3 = vshra.s32 %v1508_v45, 4 }
 0x16d   : > { %1433 = vst [vmem:[%s5015_s8 + $0x488] sm:$0xff] %v1369_v57  ;;  %3500 = vmatpush.bf16.msrb.mxu2 %v4899_v39 }
 0x16e   : > { %3589 = vmatpush.bf16.msrb.mxu3 %v4902_v47  ;;  %3322 = vmatpush.bf16.msrb.mxu0 %v4893_v31 }
 0x16f   : > { %v1050_v5 = vpop.f32.mrf.mxu2  ;;  %3411 = vmatpush.bf16.msrb.mxu1 %v4897_v37  ;;  %v1650_v37 = vshra.s32 %v1506_v35, 4  ;;  %v4186_v35 = vadd.s32 4294967288, %v1652_v3 }
 0x170   : > { %v1051_v10 = vadd.f32 %v1050_v5, %v792_v26  ;;  %v1139_v2 = vpop.f32.mrf.mxu3  ;;  %v795_v41 = vpop.f32.mrf.mxu0  ;;  %v1540_v5 = vand.u32 15, %v1508_v45 }
 0x171   : > { %v1140_v22 = vadd.f32 %v1139_v2, %v881_v58  ;;  %v884_v39 = vpop.f32.mrf.mxu1  ;;  %3501 = vmatpush.bf16.msrb.mxu2 %v4909_v63  ;;  %v5220_v26 = vpop.permute.xlu0 %1279  ;;  %v4187_v2 = vadd.s32 4294967288, %v1653_v7 }
 0x172   : > { %v1370_v31 = vmul.f32 %v5198_v11, %v1051_v10  ;;  %3590 = vmatpush.bf16.msrb.mxu3 %v4915_v9  ;;  %3323 = vmatpush.bf16.msrb.mxu0 %v4905_v60  ;;  %v4184_v9 = vadd.s32 4294967288, %v1650_v37  ;;  %v4185_v60 = vadd.s32 4294967288, %v1651_v21  ;;  %v5226_v10 = vpop.permute.xlu1 %1284 }
 0x173   : > { %v1371_v47 = vmul.f32 %v5198_v11, %v1140_v22  ;;  %1774 = vmatmul.bf16.gmra.mxu0 %v1742_v18  ;;  %3412 = vmatpush.bf16.msrb.mxu1 %v4907_v61  ;;  %v4152_v61 = vadd.s32 4294967288, %v1538_v16  ;;  %v1716_v16 = vcvt.s32.f32 %v4186_v35 }
 0x174   : > { %1434 = vst [vmem:[%s5015_s8 + $0x4c0] sm:$0xff] %v1370_v31  ;;  %1863 = vmatmul.bf16.gmra.mxu1 %v1742_v18  ;;  %1952 = vmatmul.bf16.gmra.mxu2 %v1630_v27  ;;  %v1714_v49 = vcvt.s32.f32 %v4184_v9  ;;  %v1715_v4 = vcvt.s32.f32 %v4185_v60  ;;  %v1541_v18 = vand.u32 15, %v1509_v28  ;;  %v1478_v9 = vunpack.c.2.s8 %v5212_v17 }
 0x175   : > { %1435 = vst [vmem:[%s5015_s8 + $0x4c8] sm:$0xff] %v1371_v47  ;;  %2041 = vmatmul.bf16.gmra.mxu3 %v1630_v27  ;;  %v1602_v44 = vcvt.s32.f32 %v4152_v61  ;;  %v1479_v60 = vunpack.c.3.s8 %v5212_v17  ;;  %v5234_v61 = vpop.permute.xlu2 %1289 }
 0x176   : > { %v1743_v1 = vpack.c.bf16 %v1715_v4, %v1714_v49  ;;  %v4155_v31 = vadd.s32 4294967288, %v1541_v18 }
 0x177   : > { %v1053_v63 = vpop.f32.mrf.mxu2  ;;  %v1631_v56 = vpack.c.bf16 %v1603_v23, %v1602_v44 }
 0x178   : > { %v1054_v15 = vadd.f32 %v1053_v63, %v795_v41  ;;  %v1142_v0 = vpop.f32.mrf.mxu3  ;;  %v797_v13 = vpop.f32.mrf.mxu0  ;;  %v1717_v63 = vcvt.s32.f32 %v4187_v2 }
 0x179   : > { %v1143_v34 = vadd.f32 %v1142_v0, %v884_v39  ;;  %v886_v38 = vpop.f32.mrf.mxu1  ;;  %v4154_v39 = vadd.s32 4294967288, %v1540_v5  ;;  %v1605_v0 = vcvt.s32.f32 %v4155_v31 }
 0x17a   : > { %v1372_v29 = vmul.f32 %v5209_v48, %v1054_v15  ;;  %v1744_v55 = vpack.c.bf16 %v1717_v63, %v1716_v16 }
 0x17b   : > { %v1373_v33 = vmul.f32 %v5209_v48, %v1143_v34  ;;  %v1604_v15 = vcvt.s32.f32 %v4154_v39  ;;  %v1510_v34 = vand.u32 255, %v1478_v9 }
 0x17c   : > { %1436 = vst [vmem:[%s5015_s8 + $0x500] sm:$0xff] %v1372_v29 }
 0x17d   : > { %1437 = vst [vmem:[%s5015_s8 + $0x508] sm:$0xff] %v1373_v33  ;;  %v1632_v49 = vpack.c.bf16 %v1605_v0, %v1604_v15  ;;  %v1654_v23 = vshra.s32 %v1510_v34, 4 }
 0x17f   : > { %v1055_v14 = vpop.f32.mrf.mxu2 }
 0x180   : > { %v1056_v43 = vadd.f32 %v1055_v14, %v797_v13  ;;  %v1144_v58 = vpop.f32.mrf.mxu3  ;;  %v800_v62 = vpop.f32.mrf.mxu0  ;;  %v1542_v14 = vand.u32 15, %v1510_v34 }
 0x181   : > { %v1145_v57 = vadd.f32 %v1144_v58, %v886_v38  ;;  %v889_v8 = vpop.f32.mrf.mxu1  ;;  %v1511_v38 = vand.u32 255, %v1479_v60  ;;  %v4188_v58 = vadd.s32 4294967288, %v1654_v23 }
 0x182   : > { %v1374_v12 = vmul.f32 %v5220_v26, %v1056_v43  ;;  %v5240_v43 = vpop.permute.xlu0 %1294  ;;  %v4156_v3 = vadd.s32 4294967288, %v1542_v14 }
 0x183   : > { %v1375_v52 = vmul.f32 %v5220_v26, %v1145_v57  ;;  %1779 = vmatmul.bf16.gmra.mxu0 %v1743_v1  ;;  %v1655_v45 = vshra.s32 %v1511_v38, 4  ;;  %v1718_v2 = vcvt.s32.f32 %v4188_v58 }
 0x184   : > { %1438 = vst [vmem:[%s5015_s8 + $0x540] sm:$0xff] %v1374_v12  ;;  %1868 = vmatmul.bf16.gmra.mxu1 %v1743_v1  ;;  %1957 = vmatmul.bf16.gmra.mxu2 %v1631_v56  ;;  %v1543_v1 = vand.u32 15, %v1511_v38 }
 0x185   : > { %1439 = vst [vmem:[%s5015_s8 + $0x548] sm:$0xff] %v1375_v52  ;;  %2046 = vmatmul.bf16.gmra.mxu3 %v1631_v56  ;;  %v5243_v56 = vld [vmem:[%s4793_s6 + $0x68] sm:$0xff] }
 0x186   : > { %v4157_v52 = vadd.s32 4294967288, %v1543_v1  ;;  %v1480_v35 = vunpack.c.0.s8 %v5243_v56 }
 0x187   : > { %v1058_v40 = vpop.f32.mrf.mxu2 }
 0x188   : > { %v1059_v41 = vadd.f32 %v1058_v40, %v800_v62  ;;  %v1147_v27 = vpop.f32.mrf.mxu3  ;;  %v802_v22 = vpop.f32.mrf.mxu0  ;;  %v4189_v62 = vadd.s32 4294967288, %v1655_v45  ;;  %v1607_v39 = vcvt.s32.f32 %v4157_v52  ;;  %v1512_v31 = vand.u32 255, %v1480_v35 }
 0x189   : > { %v1148_v47 = vadd.f32 %v1147_v27, %v889_v8  ;;  %v891_v37 = vpop.f32.mrf.mxu1  ;;  %v1481_v27 = vunpack.c.1.s8 %v5243_v56 }
 0x18a   : > { %v1376_v21 = vmul.f32 %v5226_v10, %v1059_v41  ;;  %v1719_v41 = vcvt.s32.f32 %v4189_v62 }
 0x18b   : > { %v1377_v32 = vmul.f32 %v5226_v10, %v1148_v47  ;;  %v1513_v16 = vand.u32 255, %v1481_v27 }
 0x18c   : > { %1440 = vst [vmem:[%s5015_s8 + $0x580] sm:$0xff] %v1376_v21  ;;  %v1745_v21 = vpack.c.bf16 %v1719_v41, %v1718_v2 }
 0x18d   : > { %1441 = vst [vmem:[%s5015_s8 + $0x588] sm:$0xff] %v1377_v32  ;;  %v1657_v38 = vshra.s32 %v1513_v16, 4 }
 0x18f   : > { %v1060_v13 = vpop.f32.mrf.mxu2 }
 0x190   : > { %v1061_v29 = vadd.f32 %v1060_v13, %v802_v22  ;;  %v1149_v24 = vpop.f32.mrf.mxu3  ;;  %v805_v33 = vpop.f32.mrf.mxu0  ;;  %v1606_v22 = vcvt.s32.f32 %v4156_v3  ;;  %v1483_v3 = vunpack.c.3.s8 %v5243_v56 }
 0x191   : > { %v1150_v4 = vadd.f32 %v1149_v24, %v891_v37  ;;  %v894_v46 = vpop.f32.mrf.mxu1  ;;  %v5251_v37 = vpop.permute.xlu1 %1299  ;;  %v1545_v24 = vand.u32 15, %v1513_v16 }
 0x192   : > { %v1378_v17 = vmul.f32 %v5234_v61, %v1061_v29  ;;  %v1633_v60 = vpack.c.bf16 %v1607_v39, %v1606_v22  ;;  %v1544_v29 = vand.u32 15, %v1512_v31  ;;  %v1515_v2 = vand.u32 255, %v1483_v3 }
 0x193   : > { %v1379_v44 = vmul.f32 %v5234_v61, %v1150_v4  ;;  %1784 = vmatmul.bf16.gmra.mxu0 %v1744_v55  ;;  %v5257_v4 = vpop.permute.xlu2 %1304  ;;  %v4159_v14 = vadd.s32 4294967288, %v1545_v24 }
 0x194   : > { %1442 = vst [vmem:[%s5015_s8 + $0x5c0] sm:$0xff] %v1378_v17  ;;  %1873 = vmatmul.bf16.gmra.mxu1 %v1744_v55  ;;  %1962 = vmatmul.bf16.gmra.mxu2 %v1632_v49  ;;  %v1656_v55 = vshra.s32 %v1512_v31, 4  ;;  %v4158_v45 = vadd.s32 4294967288, %v1544_v29 }
 0x195   : > { %1443 = vst [vmem:[%s5015_s8 + $0x5c8] sm:$0xff] %v1379_v44  ;;  %2051 = vmatmul.bf16.gmra.mxu3 %v1632_v49 }
 0x196   : > { %v1608_v52 = vcvt.s32.f32 %v4158_v45 }
 0x197   : > { %v1063_v28 = vpop.f32.mrf.mxu2 }
 0x198   : > { %v1064_v57 = vadd.f32 %v1063_v28, %v805_v33  ;;  %v1152_v8 = vpop.f32.mrf.mxu3  ;;  %v807_v12 = vpop.f32.mrf.mxu0  ;;  %v4190_v33 = vadd.s32 4294967288, %v1656_v55  ;;  %v5274_v55 = vld [vmem:[%s4793_s6 + $0x88] sm:$0xff] }
 0x199   : > { %v1153_v7 = vadd.f32 %v1152_v8, %v894_v46  ;;  %v896_v5 = vpop.f32.mrf.mxu1  ;;  %v4191_v46 = vadd.s32 4294967288, %v1657_v38 }
 0x19a   : > { %v1380_v18 = vmul.f32 %v5240_v43, %v1064_v57  ;;  %v1720_v62 = vcvt.s32.f32 %v4190_v33 }
 0x19b   : > { %v1381_v40 = vmul.f32 %v5240_v43, %v1153_v7  ;;  %v1721_v8 = vcvt.s32.f32 %v4191_v46  ;;  %v1609_v7 = vcvt.s32.f32 %v4159_v14 }
 0x19c   : > { %1444 = vst [vmem:[%s5015_s8 + $0x600] sm:$0xff] %v1380_v18  ;;  %v5265_v18 = vpop.permute.xlu0 %1309 }
 0x19d   : > { %1445 = vst [vmem:[%s5015_s8 + $0x608] sm:$0xff] %v1381_v40  ;;  %v1746_v35 = vpack.c.bf16 %v1721_v8, %v1720_v62  ;;  %v1634_v39 = vpack.c.bf16 %v1609_v7, %v1608_v52  ;;  %v5282_v8 = vpop.permute.xlu2 %1319 }
 0x19f   : > { %v1065_v47 = vpop.f32.mrf.mxu2 }
 0x1a0   : > { %v1066_v32 = vadd.f32 %v1065_v47, %v807_v12  ;;  %v1154_v63 = vpop.f32.mrf.mxu3  ;;  %v810_v9 = vpop.f32.mrf.mxu0  ;;  %v1482_v12 = vunpack.c.2.s8 %v5243_v56 }
 0x1a1   : > { %v1155_v15 = vadd.f32 %v1154_v63, %v896_v5  ;;  %v899_v0 = vpop.f32.mrf.mxu1 }
 0x1a2   : > { %v1382_v13 = vmul.f32 %v5251_v37, %v1066_v32  ;;  %v1514_v40 = vand.u32 255, %v1482_v12  ;;  %v1659_v32 = vshra.s32 %v1515_v2, 4 }
 0x1a3   : > { %v1383_v34 = vmul.f32 %v5251_v37, %v1155_v15  ;;  %1789 = vmatmul.bf16.gmra.mxu0 %v1745_v21  ;;  %v5271_v15 = vpop.permute.xlu1 %1314 }
 0x1a4   : > { %1446 = vst [vmem:[%s5015_s8 + $0x640] sm:$0xff] %v1382_v13  ;;  %1878 = vmatmul.bf16.gmra.mxu1 %v1745_v21  ;;  %1967 = vmatmul.bf16.gmra.mxu2 %v1633_v60  ;;  %v1658_v16 = vshra.s32 %v1514_v40, 4  ;;  %v1546_v63 = vand.u32 15, %v1514_v40  ;;  %v4193_v13 = vadd.s32 4294967288, %v1659_v32 }
 0x1a5   : > { %1447 = vst [vmem:[%s5015_s8 + $0x648] sm:$0xff] %v1383_v34  ;;  %2056 = vmatmul.bf16.gmra.mxu3 %v1633_v60 }
 0x1a6   : > { %v4160_v24 = vadd.s32 4294967288, %v1546_v63  ;;  %v1723_v14 = vcvt.s32.f32 %v4193_v13 }
 0x1a7   : > { %v1068_v49 = vpop.f32.mrf.mxu2 }
 0x1a8   : > { %v1069_v17 = vadd.f32 %v1068_v49, %v810_v9  ;;  %v1157_v44 = vpop.f32.mrf.mxu3  ;;  %v812_v23 = vpop.f32.mrf.mxu0  ;;  %v1547_v9 = vand.u32 15, %v1515_v2 }
 0x1a9   : > { %v1158_v1 = vadd.f32 %v1157_v44, %v899_v0  ;;  %v901_v28 = vpop.f32.mrf.mxu1  ;;  %v4192_v0 = vadd.s32 4294967288, %v1658_v16  ;;  %v1484_v44 = vunpack.c.0.s8 %v5274_v55  ;;  %v5288_v16 = vpop.permute.xlu0 %1324 }
 0x1aa   : > { %v1384_v58 = vmul.f32 %v5257_v4, %v1069_v17  ;;  %v4161_v33 = vadd.s32 4294967288, %v1547_v9 }
 0x1ab   : > { %v1385_v57 = vmul.f32 %v5257_v4, %v1158_v1  ;;  %v1722_v45 = vcvt.s32.f32 %v4192_v0  ;;  %v1485_v1 = vunpack.c.1.s8 %v5274_v55  ;;  %v1516_v62 = vand.u32 255, %v1484_v44 }
 0x1ac   : > { %1448 = vst [vmem:[%s5015_s8 + $0x680] sm:$0xff] %v1384_v58  ;;  %v1611_v58 = vcvt.s32.f32 %v4161_v33 }
 0x1ad   : > { %1449 = vst [vmem:[%s5015_s8 + $0x688] sm:$0xff] %v1385_v57  ;;  %v1747_v12 = vpack.c.bf16 %v1723_v14, %v1722_v45  ;;  %v1517_v3 = vand.u32 255, %v1485_v1  ;;  %v5296_v14 = vpop.permute.xlu1 %1329 }
 0x1af   : > { %v1070_v5 = vpop.f32.mrf.mxu2 }
 0x1b0   : > { %v1071_v41 = vadd.f32 %v1070_v5, %v812_v23  ;;  %v1159_v27 = vpop.f32.mrf.mxu3  ;;  %v815_v22 = vpop.f32.mrf.mxu0 }
 0x1b1   : > { %v1160_v31 = vadd.f32 %v1159_v27, %v901_v28  ;;  %v904_v47 = vpop.f32.mrf.mxu1  ;;  %v1610_v28 = vcvt.s32.f32 %v4160_v24  ;;  %v1660_v27 = vshra.s32 %v1516_v62, 4 }
 0x1b2   : > { %v1386_v56 = vmul.f32 %v5265_v18, %v1071_v41 }
 0x1b3   : > { %v1387_v21 = vmul.f32 %v5265_v18, %v1160_v31  ;;  %1794 = vmatmul.bf16.gmra.mxu0 %v1746_v35  ;;  %v1548_v31 = vand.u32 15, %v1516_v62 }
 0x1b4   : > { %1450 = vst [vmem:[%s5015_s8 + $0x6c0] sm:$0xff] %v1386_v56  ;;  %1883 = vmatmul.bf16.gmra.mxu1 %v1746_v35  ;;  %1972 = vmatmul.bf16.gmra.mxu2 %v1634_v39  ;;  %v1635_v35 = vpack.c.bf16 %v1611_v58, %v1610_v28  ;;  %v4194_v56 = vadd.s32 4294967288, %v1660_v27 }
 0x1b5   : > { %1451 = vst [vmem:[%s5015_s8 + $0x6c8] sm:$0xff] %v1387_v21  ;;  %2061 = vmatmul.bf16.gmra.mxu3 %v1634_v39  ;;  %v1661_v39 = vshra.s32 %v1517_v3, 4  ;;  %v4162_v0 = vadd.s32 4294967288, %v1548_v31  ;;  %v5303_v31 = vld [vmem:[%s4793_s6 + $0xa8] sm:$0xff] }
 0x1b6   : > { %v1724_v24 = vcvt.s32.f32 %v4194_v56 }
 0x1b7   : > { %v1073_v60 = vpop.f32.mrf.mxu2  ;;  %v4195_v32 = vadd.s32 4294967288, %v1661_v39  ;;  %v1612_v44 = vcvt.s32.f32 %v4162_v0 }
 0x1b8   : > { %v1074_v34 = vadd.f32 %v1073_v60, %v815_v22  ;;  %v1162_v38 = vpop.f32.mrf.mxu3  ;;  %v817_v29 = vpop.f32.mrf.mxu0 }
 0x1b9   : > { %v1163_v49 = vadd.f32 %v1162_v38, %v904_v47  ;;  %v906_v46 = vpop.f32.mrf.mxu1  ;;  %v1549_v47 = vand.u32 15, %v1517_v3 }
 0x1ba   : > { %v1388_v17 = vmul.f32 %v5271_v15, %v1074_v34 }
 0x1bb   : > { %v1389_v23 = vmul.f32 %v5271_v15, %v1163_v49  ;;  %v4163_v13 = vadd.s32 4294967288, %v1549_v47  ;;  %v1725_v49 = vcvt.s32.f32 %v4195_v32 }
 0x1bc   : > { %1452 = vst [vmem:[%s5015_s8 + $0x700] sm:$0xff] %v1388_v17  ;;  %v1487_v17 = vunpack.c.3.s8 %v5274_v55 }
 0x1bd   : > { %1453 = vst [vmem:[%s5015_s8 + $0x708] sm:$0xff] %v1389_v23  ;;  %v1613_v23 = vcvt.s32.f32 %v4163_v13  ;;  %v1748_v1 = vpack.c.bf16 %v1725_v49, %v1724_v24  ;;  %v1488_v13 = vunpack.c.0.s8 %v5303_v31  ;;  %v1489_v24 = vunpack.c.1.s8 %v5303_v31 }
 0x1be   : > { %v1519_v58 = vand.u32 255, %v1487_v17 }
 0x1bf   : > { %v1075_v57 = vpop.f32.mrf.mxu2  ;;  %v1636_v3 = vpack.c.bf16 %v1613_v23, %v1612_v44  ;;  %v1521_v23 = vand.u32 255, %v1489_v24 }
 0x1c0   : > { %v1076_v52 = vadd.f32 %v1075_v57, %v817_v29  ;;  %v1164_v7 = vpop.f32.mrf.mxu3  ;;  %v820_v5 = vpop.f32.mrf.mxu0 }
 0x1c1   : > { %v1165_v40 = vadd.f32 %v1164_v7, %v906_v46  ;;  %v909_v2 = vpop.f32.mrf.mxu1  ;;  %v1486_v46 = vunpack.c.2.s8 %v5274_v55 }
 0x1c2   : > { %v1390_v41 = vmul.f32 %v5282_v8, %v1076_v52 }
 0x1c3   : > { %v1391_v22 = vmul.f32 %v5282_v8, %v1165_v40  ;;  %1799 = vmatmul.bf16.gmra.mxu0 %v1747_v12  ;;  %v1518_v28 = vand.u32 255, %v1486_v46  ;;  %v1663_v40 = vshra.s32 %v1519_v58, 4  ;;  %v1520_v46 = vand.u32 255, %v1488_v13 }
 0x1c4   : > { %1454 = vst [vmem:[%s5015_s8 + $0x740] sm:$0xff] %v1390_v41  ;;  %1888 = vmatmul.bf16.gmra.mxu1 %v1747_v12  ;;  %1977 = vmatmul.bf16.gmra.mxu2 %v1635_v35  ;;  %v1551_v41 = vand.u32 15, %v1519_v58  ;;  %v1491_v13 = vunpack.c.3.s8 %v5303_v31 }
 0x1c5   : > { %1455 = vst [vmem:[%s5015_s8 + $0x748] sm:$0xff] %v1391_v22  ;;  %2066 = vmatmul.bf16.gmra.mxu3 %v1635_v35  ;;  %v1662_v35 = vshra.s32 %v1518_v28, 4  ;;  %v4197_v39 = vadd.s32 4294967288, %v1663_v40 }
 0x1c7   : > { %v1078_v21 = vpop.f32.mrf.mxu2  ;;  %v4196_v22 = vadd.s32 4294967288, %v1662_v35 }
 0x1c8   : > { %v1079_v63 = vadd.f32 %v1078_v21, %v820_v5  ;;  %v1167_v9 = vpop.f32.mrf.mxu3  ;;  %v822_v60 = vpop.f32.mrf.mxu0 }
 0x1c9   : > { %v1168_v34 = vadd.f32 %v1167_v9, %v909_v2  ;;  %v911_v38 = vpop.f32.mrf.mxu1  ;;  %v1550_v2 = vand.u32 15, %v1518_v28 }
 0x1ca   : > { %v1392_v29 = vmul.f32 %v5288_v16, %v1079_v63  ;;  %v4165_v63 = vadd.s32 4294967288, %v1551_v41 }
 0x1cb   : > { %v1393_v33 = vmul.f32 %v5288_v16, %v1168_v34  ;;  %v4164_v32 = vadd.s32 4294967288, %v1550_v2 }
 0x1cc   : > { %1456 = vst [vmem:[%s5015_s8 + $0x780] sm:$0xff] %v1392_v29  ;;  %v1727_v29 = vcvt.s32.f32 %v4197_v39  ;;  %v1615_v49 = vcvt.s32.f32 %v4165_v63 }
 0x1cd   : > { %1457 = vst [vmem:[%s5015_s8 + $0x788] sm:$0xff] %v1393_v33  ;;  %v1614_v33 = vcvt.s32.f32 %v4164_v32 }
 0x1cf   : > { %v1080_v45 = vpop.f32.mrf.mxu2  ;;  %v1637_v58 = vpack.c.bf16 %v1615_v49, %v1614_v33  ;;  %v1523_v49 = vand.u32 255, %v1491_v13 }
 0x1d0   : > { %v1081_v62 = vadd.f32 %v1080_v45, %v822_v60  ;;  %v1169_v57 = vpop.f32.mrf.mxu3  ;;  %v1765_v12 = vpop.f32.mrf.mxu0 }
 0x1d1   : > { %v1170_v52 = vadd.f32 %v1169_v57, %v911_v38  ;;  %v1854_v7 = vpop.f32.mrf.mxu1  ;;  %v1726_v38 = vcvt.s32.f32 %v4196_v22 }
 0x1d2   : > { %v1394_v55 = vmul.f32 %v5296_v14, %v1081_v62 }
 0x1d3   : > { %v1395_v5 = vmul.f32 %v5296_v14, %v1170_v52  ;;  %1804 = vmatmul.bf16.gmra.mxu0 %v1748_v1  ;;  %v1749_v44 = vpack.c.bf16 %v1727_v29, %v1726_v38 }
 0x1d4   : > { %1458 = vst [vmem:[%s5015_s8 + $0x7c0] sm:$0xff] %v1394_v55  ;;  %1893 = vmatmul.bf16.gmra.mxu1 %v1748_v1  ;;  %1982 = vmatmul.bf16.gmra.mxu2 %v1636_v3  ;;  %v1552_v55 = vand.u32 15, %v1520_v46 }
 0x1d5   : > { %1459 = vst [vmem:[%s5015_s8 + $0x7c8] sm:$0xff] %v1395_v5  ;;  %2071 = vmatmul.bf16.gmra.mxu3 %v1636_v3  ;;  %v1664_v3 = vshra.s32 %v1520_v46, 4  ;;  %v1553_v5 = vand.u32 15, %v1521_v23 }
 0x1d6   : > { %v4166_v39 = vadd.s32 4294967288, %v1552_v55  ;;  %v5326_v55 = vld [vmem:[%s4793_s6 + $0xc8] sm:$0xff] }
 0x1d7   : > { %v1943_v27 = vpop.f32.mrf.mxu2  ;;  %v4198_v35 = vadd.s32 4294967288, %v1664_v3 }
 0x1d8   : > { %v1944_v47 = vadd.f32 %v1943_v27, %v1765_v12  ;;  %v2032_v56 = vpop.f32.mrf.mxu3  ;;  %v1767_v21 = vpop.f32.mrf.mxu0 }
 0x1d9   : > { %v2033_v9 = vadd.f32 %v2032_v56, %v1854_v7  ;;  %v1856_v60 = vpop.f32.mrf.mxu1  ;;  %v1665_v7 = vshra.s32 %v1521_v23, 4  ;;  %v1728_v63 = vcvt.s32.f32 %v4198_v35 }
 0x1da   : > { %v2112_v0 = vmul.f32 %v1944_v47, %v5004_v42  ;;  %v4167_v47 = vadd.s32 4294967288, %v1553_v5 }
 0x1db   : > { %v2113_v34 = vmul.f32 %v2033_v9, %v5004_v42  ;;  %v4199_v2 = vadd.s32 4294967288, %v1665_v7 }
 0x1dc   : > { %2176 = vst [vmem:[%s5015_s8 + $0x10] sm:$0xff] %v2112_v0  ;;  %v1490_v0 = vunpack.c.2.s8 %v5303_v31  ;;  %v1617_v38 = vcvt.s32.f32 %v4167_v47  ;;  %v1492_v47 = vunpack.c.0.s8 %v5326_v55 }
 0x1dd   : > { %2177 = vst [vmem:[%s5015_s8 + $0x18] sm:$0xff] %v2113_v34  ;;  %v1616_v34 = vcvt.s32.f32 %v4166_v39 }
 0x1de   : > { %v1522_v33 = vand.u32 255, %v1490_v0  ;;  %v1524_v0 = vand.u32 255, %v1492_v47  ;;  %v1495_v47 = vunpack.c.3.s8 %v5326_v55 }
 0x1df   : > { %v1945_v17 = vpop.f32.mrf.mxu2  ;;  %v1638_v23 = vpack.c.bf16 %v1617_v38, %v1616_v34 }
 0x1e0   : > { %v1946_v45 = vadd.f32 %v1945_v17, %v1767_v21  ;;  %v2034_v1 = vpop.f32.mrf.mxu3  ;;  %v1770_v28 = vpop.f32.mrf.mxu0 }
 0x1e1   : > { %v2035_v62 = vadd.f32 %v2034_v1, %v1856_v60  ;;  %v1859_v57 = vpop.f32.mrf.mxu1  ;;  %v1729_v60 = vcvt.s32.f32 %v4199_v2 }
 0x1e2   : > { %v2114_v12 = vmul.f32 %v1946_v45, %v5019_v19 }
 0x1e3   : > { %v2115_v52 = vmul.f32 %v2035_v62, %v5019_v19  ;;  %1809 = vmatmul.bf16.gmra.mxu0 %v1749_v44  ;;  %v1750_v24 = vpack.c.bf16 %v1729_v60, %v1728_v63  ;;  %v1667_v62 = vshra.s32 %v1523_v49, 4  ;;  %v1493_v63 = vunpack.c.1.s8 %v5326_v55 }
 0x1e4   : > { %2178 = vst [vmem:[%s5015_s8 + $0x50] sm:$0xff] %v2114_v12  ;;  %1898 = vmatmul.bf16.gmra.mxu1 %v1749_v44  ;;  %1987 = vmatmul.bf16.gmra.mxu2 %v1637_v58  ;;  %v1555_v12 = vand.u32 15, %v1523_v49 }
 0x1e5   : > { %2179 = vst [vmem:[%s5015_s8 + $0x58] sm:$0xff] %v2115_v52  ;;  %2076 = vmatmul.bf16.gmra.mxu3 %v1637_v58  ;;  %v1666_v58 = vshra.s32 %v1522_v33, 4  ;;  %v4201_v7 = vadd.s32 4294967288, %v1667_v62  ;;  %v1525_v38 = vand.u32 255, %v1493_v63 }
 0x1e7   : > { %v1948_v40 = vpop.f32.mrf.mxu2  ;;  %v4200_v52 = vadd.s32 4294967288, %v1666_v58 }
 0x1e8   : > { %v1949_v41 = vadd.f32 %v1948_v40, %v1770_v28  ;;  %v2037_v27 = vpop.f32.mrf.mxu3  ;;  %v1772_v22 = vpop.f32.mrf.mxu0 }
 0x1e9   : > { %v2038_v56 = vadd.f32 %v2037_v27, %v1859_v57  ;;  %v1861_v21 = vpop.f32.mrf.mxu1  ;;  %v1554_v57 = vand.u32 15, %v1522_v33 }
 0x1ea   : > { %v2116_v32 = vmul.f32 %v1949_v41, %v5026_v59  ;;  %v4169_v41 = vadd.s32 4294967288, %v1555_v12 }
 0x1eb   : > { %v2117_v9 = vmul.f32 %v2038_v56, %v5026_v59  ;;  %v4168_v2 = vadd.s32 4294967288, %v1554_v57 }
 0x1ec   : > { %2180 = vst [vmem:[%s5015_s8 + $0x90] sm:$0xff] %v2116_v32  ;;  %v1731_v32 = vcvt.s32.f32 %v4201_v7  ;;  %v1619_v60 = vcvt.s32.f32 %v4169_v41 }
 0x1ed   : > { %2181 = vst [vmem:[%s5015_s8 + $0x98] sm:$0xff] %v2117_v9  ;;  %v1618_v9 = vcvt.s32.f32 %v4168_v2 }
 0x1ef   : > { %v1950_v29 = vpop.f32.mrf.mxu2  ;;  %v1639_v49 = vpack.c.bf16 %v1619_v60, %v1618_v9  ;;  %v1527_v60 = vand.u32 255, %v1495_v47 }
 0x1f0   : > { %v1951_v46 = vadd.f32 %v1950_v29, %v1772_v22  ;;  %v2039_v17 = vpop.f32.mrf.mxu3  ;;  %v1775_v44 = vpop.f32.mrf.mxu0 }
 0x1f1   : > { %v2040_v45 = vadd.f32 %v2039_v17, %v1861_v21  ;;  %v1864_v1 = vpop.f32.mrf.mxu1  ;;  %v1730_v21 = vcvt.s32.f32 %v4200_v52 }
 0x1f2   : > { %v2118_v28 = vmul.f32 %v1951_v46, %v5035_v30 }
 0x1f3   : > { %v2119_v31 = vmul.f32 %v2040_v45, %v5035_v30  ;;  %1814 = vmatmul.bf16.gmra.mxu0 %v1750_v24  ;;  %v1751_v34 = vpack.c.bf16 %v1731_v32, %v1730_v21 }
 0x1f4   : > { %2182 = vst [vmem:[%s5015_s8 + $0xd0] sm:$0xff] %v2118_v28  ;;  %1903 = vmatmul.bf16.gmra.mxu1 %v1750_v24  ;;  %1992 = vmatmul.bf16.gmra.mxu2 %v1638_v23  ;;  %v1556_v28 = vand.u32 15, %v1524_v0 }
 0x1f5   : > { %2183 = vst [vmem:[%s5015_s8 + $0xd8] sm:$0xff] %v2119_v31  ;;  %2081 = vmatmul.bf16.gmra.mxu3 %v1638_v23  ;;  %v1668_v23 = vshra.s32 %v1524_v0, 4  ;;  %v1557_v31 = vand.u32 15, %v1525_v38 }
 0x1f6   : > { %v4170_v7 = vadd.s32 4294967288, %v1556_v28 }
 0x1f7   : > { %v1953_v3 = vpop.f32.mrf.mxu2  ;;  %v4202_v58 = vadd.s32 4294967288, %v1668_v23  ;;  %v1559_v23 = vand.u32 15, %v1527_v60 }
 0x1f8   : > { %v1954_v5 = vadd.f32 %v1953_v3, %v1775_v44  ;;  %v2042_v35 = vpop.f32.mrf.mxu3  ;;  %v1777_v40 = vpop.f32.mrf.mxu0 }
 0x1f9   : > { %v2043_v27 = vadd.f32 %v2042_v35, %v1864_v1  ;;  %v1866_v22 = vpop.f32.mrf.mxu1  ;;  %v1669_v1 = vshra.s32 %v1525_v38, 4  ;;  %v1732_v41 = vcvt.s32.f32 %v4202_v58 }
 0x1fa   : > { %v2120_v39 = vmul.f32 %v1954_v5, %v5042_v20  ;;  %v4171_v5 = vadd.s32 4294967288, %v1557_v31  ;;  %v5349_v31 = vld [vmem:[%s4793_s6 + $0xe8] sm:$0xff] }
 0x1fb   : > { %v2121_v56 = vmul.f32 %v2043_v27, %v5042_v20  ;;  %v4203_v57 = vadd.s32 4294967288, %v1669_v1 }
 0x1fc   : > { %2184 = vst [vmem:[%s5015_s8 + $0x110] sm:$0xff] %v2120_v39  ;;  %v1494_v39 = vunpack.c.2.s8 %v5326_v55  ;;  %v1621_v21 = vcvt.s32.f32 %v4171_v5  ;;  %v5897_v5 = vld [vmem:[#allocation13_spill] sm:$0xff] }
 0x1fd   : > { %2185 = vst [vmem:[%s5015_s8 + $0x118] sm:$0xff] %v2121_v56  ;;  %v1620_v56 = vcvt.s32.f32 %v4170_v7 }
 0x1fe   : > { %v1526_v9 = vand.u32 255, %v1494_v39 }
 0x1ff   : > { %v1955_v13 = vpop.f32.mrf.mxu2  ;;  %v1640_v38 = vpack.c.bf16 %v1621_v21, %v1620_v56 }
 0x200   : > { %v1956_v29 = vadd.f32 %v1955_v13, %v1777_v40  ;;  %v2044_v24 = vpop.f32.mrf.mxu3  ;;  %v1780_v33 = vpop.f32.mrf.mxu0 }
 0x201   : > { %v2045_v46 = vadd.f32 %v2044_v24, %v1866_v22  ;;  %v1869_v17 = vpop.f32.mrf.mxu1  ;;  %v1733_v22 = vcvt.s32.f32 %v4203_v57 }
 0x202   : > { %v2122_v44 = vmul.f32 %v1956_v29, %v5054_v6 }
 0x203   : > { %v2123_v45 = vmul.f32 %v2045_v46, %v5054_v6  ;;  %1819 = vmatmul.bf16.gmra.mxu0 %v1751_v34  ;;  %v1752_v63 = vpack.c.bf16 %v1733_v22, %v1732_v41  ;;  %v1670_v46 = vshra.s32 %v1526_v9, 4  ;;  %v1497_v22 = vunpack.c.1.s8 %v5349_v31 }
 0x204   : > { %2186 = vst [vmem:[%s5015_s8 + $0x150] sm:$0xff] %v2122_v44  ;;  %1908 = vmatmul.bf16.gmra.mxu1 %v1751_v34  ;;  %1997 = vmatmul.bf16.gmra.mxu2 %v1639_v49  ;;  %v1558_v44 = vand.u32 15, %v1526_v9 }
 0x205   : > { %2187 = vst [vmem:[%s5015_s8 + $0x158] sm:$0xff] %v2123_v45  ;;  %2086 = vmatmul.bf16.gmra.mxu3 %v1639_v49  ;;  %v4204_v1 = vadd.s32 4294967288, %v1670_v46 }
 0x207   : > { %v1958_v62 = vpop.f32.mrf.mxu2  ;;  %v1734_v41 = vcvt.s32.f32 %v4204_v1 }
 0x208   : > { %v1959_v12 = vadd.f32 %v1958_v62, %v1780_v33  ;;  %v2047_v3 = vpop.f32.mrf.mxu3  ;;  %v1782_v52 = vpop.f32.mrf.mxu0  ;;  %v5896_v33 = vld [vmem:[#allocation12_spill] sm:$0xff] }
 0x209   : > { %v2048_v35 = vadd.f32 %v2047_v3, %v1869_v17  ;;  %v1871_v40 = vpop.f32.mrf.mxu1  ;;  %v1671_v17 = vshra.s32 %v1527_v60, 4  ;;  %v4173_v3 = vadd.s32 4294967288, %v1559_v23 }
 0x20a   : > { %v2124_v2 = vmul.f32 %v1959_v12, %v5061_v53  ;;  %v4172_v12 = vadd.s32 4294967288, %v1558_v44 }
 0x20b   : > { %v2125_v27 = vmul.f32 %v2048_v35, %v5061_v53  ;;  %v4205_v28 = vadd.s32 4294967288, %v1671_v17  ;;  %v1623_v47 = vcvt.s32.f32 %v4173_v3 }
 0x20c   : > { %2188 = vst [vmem:[%s5015_s8 + $0x190] sm:$0xff] %v2124_v2  ;;  %v1622_v39 = vcvt.s32.f32 %v4172_v12 }
 0x20d   : > { %2189 = vst [vmem:[%s5015_s8 + $0x198] sm:$0xff] %v2125_v27  ;;  %v1735_v27 = vcvt.s32.f32 %v4205_v28 }
 0x20f   : > { %v1960_v32 = vpop.f32.mrf.mxu2 }
 0x210   : > { %v1961_v0 = vadd.f32 %v1960_v32, %v1782_v52  ;;  %v2049_v13 = vpop.f32.mrf.mxu3  ;;  %v1785_v34 = vpop.f32.mrf.mxu0  ;;  %v1753_v32 = vpack.c.bf16 %v1735_v27, %v1734_v41  ;;  %v1498_v27 = vunpack.c.2.s8 %v5349_v31 }
 0x211   : > { %v2050_v29 = vadd.f32 %v2049_v13, %v1871_v40  ;;  %v1874_v24 = vpop.f32.mrf.mxu1  ;;  %v1496_v40 = vunpack.c.0.s8 %v5349_v31  ;;  %v1641_v13 = vpack.c.bf16 %v1623_v47, %v1622_v39 }
 0x212   : > { %v2126_v49 = vmul.f32 %v1961_v0, %v5896_v33 }
 0x213   : > { %v2127_v55 = vmul.f32 %v2050_v29, %v5896_v33  ;;  %1824 = vmatmul.bf16.gmra.mxu0 %v1752_v63  ;;  %v1528_v56 = vand.u32 255, %v1496_v40  ;;  %v5898_v29 = vld [vmem:[#allocation14_spill] sm:$0xff] }
 0x214   : > { %2190 = vst [vmem:[%s5015_s8 + $0x1d0] sm:$0xff] %v2126_v49  ;;  %1913 = vmatmul.bf16.gmra.mxu1 %v1752_v63  ;;  %2002 = vmatmul.bf16.gmra.mxu2 %v1640_v38  ;;  %v1529_v63 = vand.u32 255, %v1497_v22  ;;  %v1499_v22 = vunpack.c.3.s8 %v5349_v31 }
 0x215   : > { %2191 = vst [vmem:[%s5015_s8 + $0x1d8] sm:$0xff] %v2127_v55  ;;  %2091 = vmatmul.bf16.gmra.mxu3 %v1640_v38  ;;  %v1672_v49 = vshra.s32 %v1528_v56, 4  ;;  %v1560_v17 = vand.u32 15, %v1528_v56 }
 0x216   : > { %v1673_v46 = vshra.s32 %v1529_v63, 4  ;;  %v1561_v44 = vand.u32 15, %v1529_v63  ;;  %v1531_v63 = vand.u32 255, %v1499_v22 }
 0x217   : > { %v1963_v45 = vpop.f32.mrf.mxu2  ;;  %v4206_v23 = vadd.s32 4294967288, %v1672_v49 }
 0x218   : > { %v1964_v58 = vadd.f32 %v1963_v45, %v1785_v34  ;;  %v2052_v62 = vpop.f32.mrf.mxu3  ;;  %v1787_v57 = vpop.f32.mrf.mxu0  ;;  %v4207_v1 = vadd.s32 4294967288, %v1673_v46  ;;  %v4175_v12 = vadd.s32 4294967288, %v1561_v44  ;;  %v1675_v46 = vshra.s32 %v1531_v63, 4 }
 0x219   : > { %v2053_v52 = vadd.f32 %v2052_v62, %v1874_v24  ;;  %v1876_v7 = vpop.f32.mrf.mxu1  ;;  %v1736_v40 = vcvt.s32.f32 %v4206_v23  ;;  %v1563_v44 = vand.u32 15, %v1531_v63 }
 0x21a   : > { %v2128_v35 = vmul.f32 %v1964_v58, %v5897_v5  ;;  %v1737_v41 = vcvt.s32.f32 %v4207_v1  ;;  %v1625_v47 = vcvt.s32.f32 %v4175_v12  ;;  %v4209_v1 = vadd.s32 4294967288, %v1675_v46 }
 0x21b   : > { %v2129_v2 = vmul.f32 %v2053_v52, %v5897_v5 }
 0x21c   : > { %2192 = vst [vmem:[%s5015_s8 + $0x210] sm:$0xff] %v2128_v35 }
 0x21d   : > { %2193 = vst [vmem:[%s5015_s8 + $0x218] sm:$0xff] %v2129_v2 }
 0x21f   : > { %v1965_v21 = vpop.f32.mrf.mxu2 }
 0x220   : > { %v1966_v9 = vadd.f32 %v1965_v21, %v1787_v57  ;;  %v2054_v60 = vpop.f32.mrf.mxu3  ;;  %v1790_v0 = vpop.f32.mrf.mxu0  ;;  %v4174_v57 = vadd.s32 4294967288, %v1560_v17  ;;  %v1754_v21 = vpack.c.bf16 %v1737_v41, %v1736_v40  ;;  %v5901_v40 = vld [vmem:[#allocation17_spill] sm:$0xff] }
 0x221   : > { %v2055_v34 = vadd.f32 %v2054_v60, %v1876_v7  ;;  %v1879_v38 = vpop.f32.mrf.mxu1  ;;  %v5899_v7 = vld [vmem:[#allocation15_spill] sm:$0xff] }
 0x222   : > { %v2130_v24 = vmul.f32 %v1966_v9, %v5898_v29  ;;  %v1624_v39 = vcvt.s32.f32 %v4174_v57 }
 0x223   : > { %v2131_v55 = vmul.f32 %v2055_v34, %v5898_v29  ;;  %1829 = vmatmul.bf16.gmra.mxu0 %v1753_v32 }
 0x224   : > { %2194 = vst [vmem:[%s5015_s8 + $0x250] sm:$0xff] %v2130_v24  ;;  %1918 = vmatmul.bf16.gmra.mxu1 %v1753_v32  ;;  %2007 = vmatmul.bf16.gmra.mxu2 %v1641_v13  ;;  %v1530_v32 = vand.u32 255, %v1498_v27  ;;  %v5900_v24 = vld [vmem:[#allocation16_spill] sm:$0xff] }
 0x225   : > { %2195 = vst [vmem:[%s5015_s8 + $0x258] sm:$0xff] %v2131_v55  ;;  %2096 = vmatmul.bf16.gmra.mxu3 %v1641_v13  ;;  %v1642_v13 = vpack.c.bf16 %v1625_v47, %v1624_v39  ;;  %v1739_v39 = vcvt.s32.f32 %v4209_v1 }
 0x226   : > { %v1674_v55 = vshra.s32 %v1530_v32, 4  ;;  %v1562_v17 = vand.u32 15, %v1530_v32 }
 0x227   : > { %v1968_v45 = vpop.f32.mrf.mxu2 }
 0x228   : > { %v1969_v28 = vadd.f32 %v1968_v45, %v1790_v0  ;;  %v2057_v58 = vpop.f32.mrf.mxu3  ;;  %v1792_v62 = vpop.f32.mrf.mxu0  ;;  %v4208_v45 = vadd.s32 4294967288, %v1674_v55  ;;  %v4176_v12 = vadd.s32 4294967288, %v1562_v17 }
 0x229   : > { %v2058_v3 = vadd.f32 %v2057_v58, %v1879_v38  ;;  %v1881_v52 = vpop.f32.mrf.mxu1 }
 0x22a   : > { %v2132_v35 = vmul.f32 %v1969_v28, %v5899_v7  ;;  %v5372_v28 = vld [vmem:[%s4793_s6 + $0x10] sm:$0xff]  ;;  %v1738_v22 = vcvt.s32.f32 %v4208_v45 }
 0x22b   : > { %v2133_v2 = vmul.f32 %v2058_v3, %v5899_v7  ;;  %v4177_v3 = vadd.s32 4294967288, %v1563_v44  ;;  %v2248_v41 = vunpack.c.0.s8 %v5372_v28  ;;  %v2249_v47 = vunpack.c.1.s8 %v5372_v28 }
 0x22c   : > { %2196 = vst [vmem:[%s5015_s8 + $0x290] sm:$0xff] %v2132_v35 }
 0x22d   : > { %2197 = vst [vmem:[%s5015_s8 + $0x298] sm:$0xff] %v2133_v2  ;;  %v2280_v32 = vand.u32 255, %v2248_v41 }
 0x22f   : > { %v1970_v56 = vpop.f32.mrf.mxu2  ;;  %v2424_v46 = vshra.s32 %v2280_v32, 4 }
 0x230   : > { %v1971_v9 = vadd.f32 %v1970_v56, %v1792_v62  ;;  %v2059_v60 = vpop.f32.mrf.mxu3  ;;  %v1795_v0 = vpop.f32.mrf.mxu0  ;;  %v1626_v56 = vcvt.s32.f32 %v4176_v12 }
 0x231   : > { %v2060_v34 = vadd.f32 %v2059_v60, %v1881_v52  ;;  %v1884_v38 = vpop.f32.mrf.mxu1  ;;  %v2281_v60 = vand.u32 255, %v2249_v47  ;;  %v4242_v1 = vadd.s32 4294967288, %v2424_v46 }
 0x232   : > { %v2134_v49 = vmul.f32 %v1971_v9, %v5900_v24  ;;  %v1755_v9 = vpack.c.bf16 %v1739_v39, %v1738_v22 }
 0x233   : > { %v2135_v31 = vmul.f32 %v2060_v34, %v5900_v24  ;;  %1834 = vmatmul.bf16.gmra.mxu0 %v1754_v21  ;;  %v2425_v44 = vshra.s32 %v2281_v60, 4  ;;  %v2313_v45 = vand.u32 15, %v2281_v60  ;;  %v2488_v39 = vcvt.s32.f32 %v4242_v1 }
 0x234   : > { %2198 = vst [vmem:[%s5015_s8 + $0x2d0] sm:$0xff] %v2134_v49  ;;  %1923 = vmatmul.bf16.gmra.mxu1 %v1754_v21  ;;  %2012 = vmatmul.bf16.gmra.mxu2 %v1642_v13  ;;  %v1627_v21 = vcvt.s32.f32 %v4177_v3 }
 0x235   : > { %2199 = vst [vmem:[%s5015_s8 + $0x2d8] sm:$0xff] %v2135_v31  ;;  %2101 = vmatmul.bf16.gmra.mxu3 %v1642_v13 }
 0x237   : > { %v1973_v23 = vpop.f32.mrf.mxu2 }
 0x238   : > { %v1974_v58 = vadd.f32 %v1973_v23, %v1795_v0  ;;  %v2062_v62 = vpop.f32.mrf.mxu3  ;;  %v1797_v57 = vpop.f32.mrf.mxu0  ;;  %v2312_v23 = vand.u32 15, %v2280_v32  ;;  %v2251_v32 = vunpack.c.3.s8 %v5372_v28 }
 0x239   : > { %v2063_v52 = vadd.f32 %v2062_v62, %v1884_v38  ;;  %v1886_v35 = vpop.f32.mrf.mxu1  ;;  %v1643_v38 = vpack.c.bf16 %v1627_v21, %v1626_v56  ;;  %v4243_v62 = vadd.s32 4294967288, %v2425_v44  ;;  %v2250_v21 = vunpack.c.2.s8 %v5372_v28 }
 0x23a   : > { %v2136_v2 = vmul.f32 %v1974_v58, %v5901_v40 }
 0x23b   : > { %v2137_v27 = vmul.f32 %v2063_v52, %v5901_v40  ;;  %v4210_v52 = vadd.s32 4294967288, %v2312_v23  ;;  %v2489_v56 = vcvt.s32.f32 %v4243_v62 }
 0x23c   : > { %2200 = vst [vmem:[%s5015_s8 + $0x310] sm:$0xff] %v2136_v2 }
 0x23d   : > { %2201 = vst [vmem:[%s5015_s8 + $0x318] sm:$0xff] %v2137_v27  ;;  %v5902_v27 = vld [vmem:[#allocation18_spill] sm:$0xff] }
 0x23f   : > { %v1975_v63 = vpop.f32.mrf.mxu2 }
 0x240   : > { %v1976_v0 = vadd.f32 %v1975_v63, %v1797_v57  ;;  %v2064_v13 = vpop.f32.mrf.mxu3  ;;  %v1800_v34 = vpop.f32.mrf.mxu0  ;;  %v2376_v63 = vcvt.s32.f32 %v4210_v52 }
 0x241   : > { %v2065_v49 = vadd.f32 %v2064_v13, %v1886_v35  ;;  %v1889_v31 = vpop.f32.mrf.mxu1  ;;  %v4211_v35 = vadd.s32 4294967288, %v2313_v45  ;;  %v2282_v13 = vand.u32 255, %v2250_v21 }
 0x242   : > { %v2138_v55 = vmul.f32 %v1976_v0, %v5124_v51  ;;  %v2520_v0 = vpack.c.bf16 %v2489_v56, %v2488_v39 }
 0x243   : > { %v2139_v17 = vmul.f32 %v2065_v49, %v5124_v51  ;;  %1839 = vmatmul.bf16.gmra.mxu0 %v1755_v9  ;;  %v2426_v23 = vshra.s32 %v2282_v13, 4  ;;  %v2314_v1 = vand.u32 15, %v2282_v13 }
 0x244   : > { %2202 = vst [vmem:[%s5015_s8 + $0x350] sm:$0xff] %v2138_v55  ;;  %1928 = vmatmul.bf16.gmra.mxu1 %v1755_v9  ;;  %2017 = vmatmul.bf16.gmra.mxu2 %v1643_v38  ;;  %v2377_v9 = vcvt.s32.f32 %v4211_v35 }
 0x245   : > { %2203 = vst [vmem:[%s5015_s8 + $0x358] sm:$0xff] %v2139_v17  ;;  %2106 = vmatmul.bf16.gmra.mxu3 %v1643_v38 }
 0x246   : > { %v2408_v55 = vpack.c.bf16 %v2377_v9, %v2376_v63 }
 0x247   : > { %v1978_v58 = vpop.f32.mrf.mxu2 }
 0x248   : > { %v1979_v57 = vadd.f32 %v1978_v58, %v1800_v34  ;;  %v2067_v12 = vpop.f32.mrf.mxu3  ;;  %v1802_v3 = vpop.f32.mrf.mxu0  ;;  %v2283_v34 = vand.u32 255, %v2251_v32 }
 0x249   : > { %v2068_v2 = vadd.f32 %v2067_v12, %v1889_v31  ;;  %v1891_v41 = vpop.f32.mrf.mxu1 }
 0x24a   : > { %v2140_v22 = vmul.f32 %v1979_v57, %v5902_v27  ;;  %v2427_v45 = vshra.s32 %v2283_v34, 4  ;;  %v2315_v58 = vand.u32 15, %v2283_v34  ;;  %v4244_v57 = vadd.s32 4294967288, %v2426_v23 }
 0x24b   : > { %v2141_v47 = vmul.f32 %v2068_v2, %v5902_v27 }
 0x24c   : > { %2204 = vst [vmem:[%s5015_s8 + $0x390] sm:$0xff] %v2140_v22  ;;  %v4245_v12 = vadd.s32 4294967288, %v2427_v45  ;;  %v4213_v22 = vadd.s32 4294967288, %v2315_v58  ;;  %v2490_v63 = vcvt.s32.f32 %v4244_v57 }
 0x24d   : > { %2205 = vst [vmem:[%s5015_s8 + $0x398] sm:$0xff] %v2141_v47 }
 0x24e   : > { %v2491_v9 = vcvt.s32.f32 %v4245_v12  ;;  %v2379_v13 = vcvt.s32.f32 %v4213_v22 }
 0x24f   : > { %v1980_v60 = vpop.f32.mrf.mxu2 }
 0x250   : > { %v1981_v38 = vadd.f32 %v1980_v60, %v1802_v3  ;;  %v2069_v49 = vpop.f32.mrf.mxu3  ;;  %v1805_v31 = vpop.f32.mrf.mxu0  ;;  %v5395_v3 = vld [vmem:[%s4793_s6 + $0x30] sm:$0xff] }
 0x251   : > { %v2070_v46 = vadd.f32 %v2069_v49, %v1891_v41  ;;  %v1894_v17 = vpop.f32.mrf.mxu1  ;;  %v4212_v41 = vadd.s32 4294967288, %v2314_v1  ;;  %v2252_v21 = vunpack.c.0.s8 %v5395_v3  ;;  %v2253_v60 = vunpack.c.1.s8 %v5395_v3 }
 0x252   : > { %v2142_v44 = vmul.f32 %v1981_v38, %v5140_v36  ;;  %v2521_v49 = vpack.c.bf16 %v2491_v9, %v2490_v63 }
 0x253   : > { %v2143_v28 = vmul.f32 %v2070_v46, %v5140_v36  ;;  %2544 = vmatmul.bf16.vlgmr.msra.gmra.mxu0 %v2520_v0  ;;  %v2284_v34 = vand.u32 255, %v2252_v21 }
 0x254   : > { %2206 = vst [vmem:[%s5015_s8 + $0x3d0] sm:$0xff] %v2142_v44  ;;  %2633 = vmatmul.bf16.vlgmr.msra.gmra.mxu1 %v2520_v0  ;;  %2722 = vmatmul.bf16.vlgmr.msra.gmra.mxu2 %v2408_v55  ;;  %v2378_v0 = vcvt.s32.f32 %v4212_v41 }
 0x255   : > { %2207 = vst [vmem:[%s5015_s8 + $0x3d8] sm:$0xff] %v2143_v28  ;;  %2811 = vmatmul.bf16.vlgmr.msra.gmra.mxu3 %v2408_v55  ;;  %v2428_v1 = vshra.s32 %v2284_v34, 4  ;;  %v2316_v57 = vand.u32 15, %v2284_v34  ;;  %v2255_v34 = vunpack.c.3.s8 %v5395_v3 }
 0x256   : > { %v2409_v44 = vpack.c.bf16 %v2379_v13, %v2378_v0  ;;  %v2254_v13 = vunpack.c.2.s8 %v5395_v3 }
 0x257   : > { %v1983_v62 = vpop.f32.mrf.mxu2 }
 0x258   : > { %v1984_v52 = vadd.f32 %v1983_v62, %v1805_v31  ;;  %v2072_v35 = vpop.f32.mrf.mxu3  ;;  %v1807_v2 = vpop.f32.mrf.mxu0  ;;  %v2285_v31 = vand.u32 255, %v2253_v60 }
 0x259   : > { %v2073_v39 = vadd.f32 %v2072_v35, %v1894_v17  ;;  %v1896_v47 = vpop.f32.mrf.mxu1 }
 0x25a   : > { %v2144_v56 = vmul.f32 %v1984_v52, %v5149_v54  ;;  %v2429_v62 = vshra.s32 %v2285_v31, 4  ;;  %v2317_v12 = vand.u32 15, %v2285_v31  ;;  %v4246_v52 = vadd.s32 4294967288, %v2428_v1 }
 0x25b   : > { %v2145_v32 = vmul.f32 %v2073_v39, %v5149_v54 }
 0x25c   : > { %2208 = vst [vmem:[%s5015_s8 + $0x410] sm:$0xff] %v2144_v56  ;;  %v4215_v56 = vadd.s32 4294967288, %v2317_v12  ;;  %v2492_v9 = vcvt.s32.f32 %v4246_v52 }
 0x25d   : > { %2209 = vst [vmem:[%s5015_s8 + $0x418] sm:$0xff] %v2145_v32 }
 0x25f   : > { %v1985_v38 = vpop.f32.mrf.mxu2 }
 0x260   : > { %v1986_v55 = vadd.f32 %v1985_v38, %v1807_v2  ;;  %v2074_v46 = vpop.f32.mrf.mxu3  ;;  %v1810_v17 = vpop.f32.mrf.mxu0  ;;  %v4247_v2 = vadd.s32 4294967288, %v2429_v62 }
 0x261   : > { %v2075_v28 = vadd.f32 %v2074_v46, %v1896_v47  ;;  %v1899_v23 = vpop.f32.mrf.mxu1  ;;  %v4214_v47 = vadd.s32 4294967288, %v2316_v57  ;;  %v2286_v46 = vand.u32 255, %v2254_v13 }
 0x262   : > { %v2146_v45 = vmul.f32 %v1986_v55, %v5168_v25  ;;  %v2493_v0 = vcvt.s32.f32 %v4247_v2 }
 0x263   : > { %v2147_v58 = vmul.f32 %v2075_v28, %v5168_v25  ;;  %2549 = vmatmul.bf16.gmra.mxu0 %v2521_v49  ;;  %v2380_v38 = vcvt.s32.f32 %v4214_v47  ;;  %v2430_v57 = vshra.s32 %v2286_v46, 4  ;;  %v2318_v52 = vand.u32 15, %v2286_v46 }
 0x264   : > { %2210 = vst [vmem:[%s5015_s8 + $0x450] sm:$0xff] %v2146_v45  ;;  %2638 = vmatmul.bf16.gmra.mxu1 %v2521_v49  ;;  %2727 = vmatmul.bf16.gmra.mxu2 %v2409_v44  ;;  %v2381_v49 = vcvt.s32.f32 %v4215_v56  ;;  %v2522_v55 = vpack.c.bf16 %v2493_v0, %v2492_v9 }
 0x265   : > { %2211 = vst [vmem:[%s5015_s8 + $0x458] sm:$0xff] %v2147_v58  ;;  %2816 = vmatmul.bf16.gmra.mxu3 %v2409_v44 }
 0x266   : > { %v2410_v45 = vpack.c.bf16 %v2381_v49, %v2380_v38 }
 0x267   : > { %v1988_v35 = vpop.f32.mrf.mxu2 }
 0x268   : > { %v1989_v41 = vadd.f32 %v1988_v35, %v1810_v17  ;;  %v2077_v22 = vpop.f32.mrf.mxu3  ;;  %v1812_v39 = vpop.f32.mrf.mxu0  ;;  %v2287_v17 = vand.u32 255, %v2255_v34 }
 0x269   : > { %v2078_v21 = vadd.f32 %v2077_v22, %v1899_v23  ;;  %v1901_v32 = vpop.f32.mrf.mxu1 }
 0x26a   : > { %v2148_v63 = vmul.f32 %v1989_v41, %v5182_v50  ;;  %v2431_v12 = vshra.s32 %v2287_v17, 4  ;;  %v2319_v35 = vand.u32 15, %v2287_v17  ;;  %v4248_v41 = vadd.s32 4294967288, %v2430_v57 }
 0x26b   : > { %v2149_v60 = vmul.f32 %v2078_v21, %v5182_v50 }
 0x26c   : > { %2212 = vst [vmem:[%s5015_s8 + $0x490] sm:$0xff] %v2148_v63  ;;  %v4249_v22 = vadd.s32 4294967288, %v2431_v12  ;;  %v4217_v63 = vadd.s32 4294967288, %v2319_v35  ;;  %v2494_v38 = vcvt.s32.f32 %v4248_v41 }
 0x26d   : > { %2213 = vst [vmem:[%s5015_s8 + $0x498] sm:$0xff] %v2149_v60 }
 0x26e   : > { %v2495_v49 = vcvt.s32.f32 %v4249_v22  ;;  %v2383_v46 = vcvt.s32.f32 %v4217_v63 }
 0x26f   : > { %v1990_v31 = vpop.f32.mrf.mxu2 }
 0x270   : > { %v1991_v44 = vadd.f32 %v1990_v31, %v1812_v39  ;;  %v2079_v28 = vpop.f32.mrf.mxu3  ;;  %v1815_v23 = vpop.f32.mrf.mxu0  ;;  %v5418_v39 = vld [vmem:[%s4793_s6 + $0x50] sm:$0xff] }
 0x271   : > { %v2080_v1 = vadd.f32 %v2079_v28, %v1901_v32  ;;  %v1904_v58 = vpop.f32.mrf.mxu1  ;;  %v4216_v32 = vadd.s32 4294967288, %v2318_v52  ;;  %v2256_v13 = vunpack.c.0.s8 %v5418_v39  ;;  %v2257_v31 = vunpack.c.1.s8 %v5418_v39 }
 0x272   : > { %v2150_v62 = vmul.f32 %v1991_v44, %v5198_v11  ;;  %v2523_v28 = vpack.c.bf16 %v2495_v49, %v2494_v38 }
 0x273   : > { %v2151_v3 = vmul.f32 %v2080_v1, %v5198_v11  ;;  %2554 = vmatmul.bf16.gmra.mxu0 %v2522_v55  ;;  %v2288_v17 = vand.u32 255, %v2256_v13 }
 0x274   : > { %2214 = vst [vmem:[%s5015_s8 + $0x4d0] sm:$0xff] %v2150_v62  ;;  %2643 = vmatmul.bf16.gmra.mxu1 %v2522_v55  ;;  %2732 = vmatmul.bf16.gmra.mxu2 %v2410_v45  ;;  %v2382_v55 = vcvt.s32.f32 %v4216_v32 }
 0x275   : > { %2215 = vst [vmem:[%s5015_s8 + $0x4d8] sm:$0xff] %v2151_v3  ;;  %2821 = vmatmul.bf16.gmra.mxu3 %v2410_v45  ;;  %v2432_v52 = vshra.s32 %v2288_v17, 4  ;;  %v2320_v41 = vand.u32 15, %v2288_v17  ;;  %v2259_v17 = vunpack.c.3.s8 %v5418_v39 }
 0x276   : > { %v2411_v62 = vpack.c.bf16 %v2383_v46, %v2382_v55  ;;  %v2258_v46 = vunpack.c.2.s8 %v5418_v39 }
 0x277   : > { %v1993_v2 = vpop.f32.mrf.mxu2 }
 0x278   : > { %v1994_v47 = vadd.f32 %v1993_v2, %v1815_v23  ;;  %v2082_v56 = vpop.f32.mrf.mxu3  ;;  %v1817_v21 = vpop.f32.mrf.mxu0  ;;  %v2289_v23 = vand.u32 255, %v2257_v31 }
 0x279   : > { %v2083_v9 = vadd.f32 %v2082_v56, %v1904_v58  ;;  %v1906_v60 = vpop.f32.mrf.mxu1 }
 0x27a   : > { %v2152_v0 = vmul.f32 %v1994_v47, %v5209_v48  ;;  %v2433_v2 = vshra.s32 %v2289_v23, 4  ;;  %v2321_v22 = vand.u32 15, %v2289_v23  ;;  %v4250_v47 = vadd.s32 4294967288, %v2432_v52 }
 0x27b   : > { %v2153_v34 = vmul.f32 %v2083_v9, %v5209_v48 }
 0x27c   : > { %2216 = vst [vmem:[%s5015_s8 + $0x510] sm:$0xff] %v2152_v0  ;;  %v4219_v0 = vadd.s32 4294967288, %v2321_v22  ;;  %v2496_v49 = vcvt.s32.f32 %v4250_v47 }
 0x27d   : > { %2217 = vst [vmem:[%s5015_s8 + $0x518] sm:$0xff] %v2153_v34 }
 0x27f   : > { %v1995_v44 = vpop.f32.mrf.mxu2 }
 0x280   : > { %v1996_v45 = vadd.f32 %v1995_v44, %v1817_v21  ;;  %v2084_v1 = vpop.f32.mrf.mxu3  ;;  %v1820_v58 = vpop.f32.mrf.mxu0  ;;  %v4251_v21 = vadd.s32 4294967288, %v2433_v2 }
 0x281   : > { %v2085_v3 = vadd.f32 %v2084_v1, %v1906_v60  ;;  %v1909_v57 = vpop.f32.mrf.mxu1  ;;  %v4218_v60 = vadd.s32 4294967288, %v2320_v41  ;;  %v2290_v1 = vand.u32 255, %v2258_v46 }
 0x282   : > { %v2154_v12 = vmul.f32 %v1996_v45, %v5220_v26  ;;  %v2497_v55 = vcvt.s32.f32 %v4251_v21 }
 0x283   : > { %v2155_v35 = vmul.f32 %v2085_v3, %v5220_v26  ;;  %2559 = vmatmul.bf16.gmra.mxu0 %v2523_v28  ;;  %v2384_v44 = vcvt.s32.f32 %v4218_v60  ;;  %v2434_v41 = vshra.s32 %v2290_v1, 4  ;;  %v2322_v47 = vand.u32 15, %v2290_v1 }
 0x284   : > { %2218 = vst [vmem:[%s5015_s8 + $0x550] sm:$0xff] %v2154_v12  ;;  %2648 = vmatmul.bf16.gmra.mxu1 %v2523_v28  ;;  %2737 = vmatmul.bf16.gmra.mxu2 %v2411_v62  ;;  %v2385_v28 = vcvt.s32.f32 %v4219_v0  ;;  %v2524_v45 = vpack.c.bf16 %v2497_v55, %v2496_v49 }
 0x285   : > { %2219 = vst [vmem:[%s5015_s8 + $0x558] sm:$0xff] %v2155_v35  ;;  %2826 = vmatmul.bf16.gmra.mxu3 %v2411_v62 }
 0x286   : > { %v2412_v12 = vpack.c.bf16 %v2385_v28, %v2384_v44 }
 0x287   : > { %v1998_v56 = vpop.f32.mrf.mxu2 }
 0x288   : > { %v1999_v32 = vadd.f32 %v1998_v56, %v1820_v58  ;;  %v2087_v63 = vpop.f32.mrf.mxu3  ;;  %v1822_v9 = vpop.f32.mrf.mxu0  ;;  %v2291_v58 = vand.u32 255, %v2259_v17 }
 0x289   : > { %v2088_v13 = vadd.f32 %v2087_v63, %v1909_v57  ;;  %v1911_v34 = vpop.f32.mrf.mxu1 }
 0x28a   : > { %v2156_v38 = vmul.f32 %v1999_v32, %v5226_v10  ;;  %v2435_v22 = vshra.s32 %v2291_v58, 4  ;;  %v2323_v56 = vand.u32 15, %v2291_v58  ;;  %v4252_v32 = vadd.s32 4294967288, %v2434_v41 }
 0x28b   : > { %v2157_v31 = vmul.f32 %v2088_v13, %v5226_v10 }
 0x28c   : > { %2220 = vst [vmem:[%s5015_s8 + $0x590] sm:$0xff] %v2156_v38  ;;  %v4253_v63 = vadd.s32 4294967288, %v2435_v22  ;;  %v4221_v38 = vadd.s32 4294967288, %v2323_v56  ;;  %v2498_v44 = vcvt.s32.f32 %v4252_v32 }
 0x28d   : > { %2221 = vst [vmem:[%s5015_s8 + $0x598] sm:$0xff] %v2157_v31 }
 0x28e   : > { %v2499_v28 = vcvt.s32.f32 %v4253_v63  ;;  %v2387_v1 = vcvt.s32.f32 %v4221_v38 }
 0x28f   : > { %v2000_v23 = vpop.f32.mrf.mxu2 }
 0x290   : > { %v2001_v62 = vadd.f32 %v2000_v23, %v1822_v9  ;;  %v2089_v3 = vpop.f32.mrf.mxu3  ;;  %v1825_v57 = vpop.f32.mrf.mxu0  ;;  %v5441_v9 = vld [vmem:[%s4793_s6 + $0x70] sm:$0xff] }
 0x291   : > { %v2090_v52 = vadd.f32 %v2089_v3, %v1911_v34  ;;  %v1914_v35 = vpop.f32.mrf.mxu1  ;;  %v4220_v34 = vadd.s32 4294967288, %v2322_v47  ;;  %v2260_v46 = vunpack.c.0.s8 %v5441_v9  ;;  %v2261_v23 = vunpack.c.1.s8 %v5441_v9 }
 0x292   : > { %v2158_v2 = vmul.f32 %v2001_v62, %v5234_v61  ;;  %v2525_v3 = vpack.c.bf16 %v2499_v28, %v2498_v44 }
 0x293   : > { %v2159_v39 = vmul.f32 %v2090_v52, %v5234_v61  ;;  %2564 = vmatmul.bf16.gmra.mxu0 %v2524_v45  ;;  %v2292_v58 = vand.u32 255, %v2260_v46 }
 0x294   : > { %2222 = vst [vmem:[%s5015_s8 + $0x5d0] sm:$0xff] %v2158_v2  ;;  %2653 = vmatmul.bf16.gmra.mxu1 %v2524_v45  ;;  %2742 = vmatmul.bf16.gmra.mxu2 %v2412_v12  ;;  %v2386_v45 = vcvt.s32.f32 %v4220_v34 }
 0x295   : > { %2223 = vst [vmem:[%s5015_s8 + $0x5d8] sm:$0xff] %v2159_v39  ;;  %2831 = vmatmul.bf16.gmra.mxu3 %v2412_v12  ;;  %v2436_v47 = vshra.s32 %v2292_v58, 4  ;;  %v2324_v32 = vand.u32 15, %v2292_v58  ;;  %v2263_v58 = vunpack.c.3.s8 %v5441_v9 }
 0x296   : > { %v2413_v2 = vpack.c.bf16 %v2387_v1, %v2386_v45  ;;  %v2262_v1 = vunpack.c.2.s8 %v5441_v9 }
 0x297   : > { %v2003_v21 = vpop.f32.mrf.mxu2 }
 0x298   : > { %v2004_v60 = vadd.f32 %v2003_v21, %v1825_v57  ;;  %v2092_v0 = vpop.f32.mrf.mxu3  ;;  %v1827_v13 = vpop.f32.mrf.mxu0  ;;  %v2293_v57 = vand.u32 255, %v2261_v23 }
 0x299   : > { %v2093_v49 = vadd.f32 %v2092_v0, %v1914_v35  ;;  %v1916_v31 = vpop.f32.mrf.mxu1 }
 0x29a   : > { %v2160_v55 = vmul.f32 %v2004_v60, %v5240_v43  ;;  %v2437_v21 = vshra.s32 %v2293_v57, 4  ;;  %v2325_v63 = vand.u32 15, %v2293_v57  ;;  %v4254_v60 = vadd.s32 4294967288, %v2436_v47 }
 0x29b   : > { %v2161_v17 = vmul.f32 %v2093_v49, %v5240_v43 }
 0x29c   : > { %2224 = vst [vmem:[%s5015_s8 + $0x610] sm:$0xff] %v2160_v55  ;;  %v4223_v55 = vadd.s32 4294967288, %v2325_v63  ;;  %v2500_v28 = vcvt.s32.f32 %v4254_v60 }
 0x29d   : > { %2225 = vst [vmem:[%s5015_s8 + $0x618] sm:$0xff] %v2161_v17 }
 0x29f   : > { %v2005_v62 = vpop.f32.mrf.mxu2 }
 0x2a0   : > { %v2006_v12 = vadd.f32 %v2005_v62, %v1827_v13  ;;  %v2094_v52 = vpop.f32.mrf.mxu3  ;;  %v1830_v35 = vpop.f32.mrf.mxu0  ;;  %v4255_v13 = vadd.s32 4294967288, %v2437_v21 }
 0x2a1   : > { %v2095_v39 = vadd.f32 %v2094_v52, %v1916_v31  ;;  %v1919_v41 = vpop.f32.mrf.mxu1  ;;  %v4222_v31 = vadd.s32 4294967288, %v2324_v32  ;;  %v2294_v52 = vand.u32 255, %v2262_v1 }
 0x2a2   : > { %v2162_v22 = vmul.f32 %v2006_v12, %v5251_v37  ;;  %v2501_v45 = vcvt.s32.f32 %v4255_v13 }
 0x2a3   : > { %v2163_v56 = vmul.f32 %v2095_v39, %v5251_v37  ;;  %2569 = vmatmul.bf16.gmra.mxu0 %v2525_v3  ;;  %v2388_v62 = vcvt.s32.f32 %v4222_v31  ;;  %v2438_v32 = vshra.s32 %v2294_v52, 4  ;;  %v2326_v60 = vand.u32 15, %v2294_v52 }
 0x2a4   : > { %2226 = vst [vmem:[%s5015_s8 + $0x650] sm:$0xff] %v2162_v22  ;;  %2658 = vmatmul.bf16.gmra.mxu1 %v2525_v3  ;;  %2747 = vmatmul.bf16.gmra.mxu2 %v2413_v2  ;;  %v2389_v3 = vcvt.s32.f32 %v4223_v55  ;;  %v2526_v12 = vpack.c.bf16 %v2501_v45, %v2500_v28 }
 0x2a5   : > { %2227 = vst [vmem:[%s5015_s8 + $0x658] sm:$0xff] %v2163_v56  ;;  %2836 = vmatmul.bf16.gmra.mxu3 %v2413_v2 }
 0x2a6   : > { %v2414_v22 = vpack.c.bf16 %v2389_v3, %v2388_v62 }
 0x2a7   : > { %v2008_v0 = vpop.f32.mrf.mxu2 }
 0x2a8   : > { %v2009_v34 = vadd.f32 %v2008_v0, %v1830_v35  ;;  %v2097_v38 = vpop.f32.mrf.mxu3  ;;  %v1832_v49 = vpop.f32.mrf.mxu0  ;;  %v2295_v35 = vand.u32 255, %v2263_v58 }
 0x2a9   : > { %v2098_v46 = vadd.f32 %v2097_v38, %v1919_v41  ;;  %v1921_v17 = vpop.f32.mrf.mxu1 }
 0x2aa   : > { %v2164_v44 = vmul.f32 %v2009_v34, %v5257_v4  ;;  %v2439_v63 = vshra.s32 %v2295_v35, 4  ;;  %v2327_v0 = vand.u32 15, %v2295_v35  ;;  %v4256_v34 = vadd.s32 4294967288, %v2438_v32 }
 0x2ab   : > { %v2165_v23 = vmul.f32 %v2098_v46, %v5257_v4 }
 0x2ac   : > { %2228 = vst [vmem:[%s5015_s8 + $0x690] sm:$0xff] %v2164_v44  ;;  %v4257_v38 = vadd.s32 4294967288, %v2439_v63  ;;  %v4225_v44 = vadd.s32 4294967288, %v2327_v0  ;;  %v2502_v62 = vcvt.s32.f32 %v4256_v34 }
 0x2ad   : > { %2229 = vst [vmem:[%s5015_s8 + $0x698] sm:$0xff] %v2165_v23 }
 0x2ae   : > { %v2503_v3 = vcvt.s32.f32 %v4257_v38  ;;  %v2391_v52 = vcvt.s32.f32 %v4225_v44 }
 0x2af   : > { %v2010_v57 = vpop.f32.mrf.mxu2 }
 0x2b0   : > { %v2011_v2 = vadd.f32 %v2010_v57, %v1832_v49  ;;  %v2099_v39 = vpop.f32.mrf.mxu3  ;;  %v1835_v41 = vpop.f32.mrf.mxu0  ;;  %v5464_v49 = vld [vmem:[%s4793_s6 + $0x90] sm:$0xff] }
 0x2b1   : > { %v2100_v47 = vadd.f32 %v2099_v39, %v1921_v17  ;;  %v1924_v56 = vpop.f32.mrf.mxu1  ;;  %v4224_v17 = vadd.s32 4294967288, %v2326_v60  ;;  %v2264_v1 = vunpack.c.0.s8 %v5464_v49  ;;  %v2265_v57 = vunpack.c.1.s8 %v5464_v49 }
 0x2b2   : > { %v2166_v21 = vmul.f32 %v2011_v2, %v5265_v18  ;;  %v2527_v39 = vpack.c.bf16 %v2503_v3, %v2502_v62 }
 0x2b3   : > { %v2167_v9 = vmul.f32 %v2100_v47, %v5265_v18  ;;  %2574 = vmatmul.bf16.gmra.mxu0 %v2526_v12  ;;  %v2296_v35 = vand.u32 255, %v2264_v1 }
 0x2b4   : > { %2230 = vst [vmem:[%s5015_s8 + $0x6d0] sm:$0xff] %v2166_v21  ;;  %2663 = vmatmul.bf16.gmra.mxu1 %v2526_v12  ;;  %2752 = vmatmul.bf16.gmra.mxu2 %v2414_v22  ;;  %v2390_v12 = vcvt.s32.f32 %v4224_v17 }
 0x2b5   : > { %2231 = vst [vmem:[%s5015_s8 + $0x6d8] sm:$0xff] %v2167_v9  ;;  %2841 = vmatmul.bf16.gmra.mxu3 %v2414_v22  ;;  %v2440_v60 = vshra.s32 %v2296_v35, 4  ;;  %v2328_v34 = vand.u32 15, %v2296_v35  ;;  %v2267_v35 = vunpack.c.3.s8 %v5464_v49 }
 0x2b6   : > { %v2415_v21 = vpack.c.bf16 %v2391_v52, %v2390_v12  ;;  %v2266_v52 = vunpack.c.2.s8 %v5464_v49 }
 0x2b7   : > { %v2013_v13 = vpop.f32.mrf.mxu2 }
 0x2b8   : > { %v2014_v31 = vadd.f32 %v2013_v13, %v1835_v41  ;;  %v2102_v55 = vpop.f32.mrf.mxu3  ;;  %v1837_v46 = vpop.f32.mrf.mxu0  ;;  %v2297_v41 = vand.u32 255, %v2265_v57 }
 0x2b9   : > { %v2103_v28 = vadd.f32 %v2102_v55, %v1924_v56  ;;  %v1926_v23 = vpop.f32.mrf.mxu1 }
 0x2ba   : > { %v2168_v45 = vmul.f32 %v2014_v31, %v5271_v15  ;;  %v2441_v13 = vshra.s32 %v2297_v41, 4  ;;  %v2329_v38 = vand.u32 15, %v2297_v41  ;;  %v4258_v31 = vadd.s32 4294967288, %v2440_v60 }
 0x2bb   : > { %v2169_v58 = vmul.f32 %v2103_v28, %v5271_v15 }
 0x2bc   : > { %2232 = vst [vmem:[%s5015_s8 + $0x710] sm:$0xff] %v2168_v45  ;;  %v4227_v45 = vadd.s32 4294967288, %v2329_v38  ;;  %v2504_v3 = vcvt.s32.f32 %v4258_v31 }
 0x2bd   : > { %2233 = vst [vmem:[%s5015_s8 + $0x718] sm:$0xff] %v2169_v58 }
 0x2bf   : > { %v2015_v2 = vpop.f32.mrf.mxu2 }
 0x2c0   : > { %v2016_v22 = vadd.f32 %v2015_v2, %v1837_v46  ;;  %v2104_v47 = vpop.f32.mrf.mxu3  ;;  %v1840_v56 = vpop.f32.mrf.mxu0  ;;  %v4259_v46 = vadd.s32 4294967288, %v2441_v13 }
 0x2c1   : > { %v2105_v9 = vadd.f32 %v2104_v47, %v1926_v23  ;;  %v1929_v32 = vpop.f32.mrf.mxu1  ;;  %v4226_v23 = vadd.s32 4294967288, %v2328_v34  ;;  %v2298_v47 = vand.u32 255, %v2266_v52 }
 0x2c2   : > { %v2170_v63 = vmul.f32 %v2016_v22, %v5282_v8  ;;  %v2505_v12 = vcvt.s32.f32 %v4259_v46 }
 0x2c3   : > { %v2171_v0 = vmul.f32 %v2105_v9, %v5282_v8  ;;  %2579 = vmatmul.bf16.gmra.mxu0 %v2527_v39  ;;  %v2392_v2 = vcvt.s32.f32 %v4226_v23  ;;  %v2442_v34 = vshra.s32 %v2298_v47, 4  ;;  %v2330_v31 = vand.u32 15, %v2298_v47 }
 0x2c4   : > { %2234 = vst [vmem:[%s5015_s8 + $0x750] sm:$0xff] %v2170_v63  ;;  %2668 = vmatmul.bf16.gmra.mxu1 %v2527_v39  ;;  %2757 = vmatmul.bf16.gmra.mxu2 %v2415_v21  ;;  %v2393_v39 = vcvt.s32.f32 %v4227_v45  ;;  %v2528_v22 = vpack.c.bf16 %v2505_v12, %v2504_v3 }
 0x2c5   : > { %2235 = vst [vmem:[%s5015_s8 + $0x758] sm:$0xff] %v2171_v0  ;;  %2846 = vmatmul.bf16.gmra.mxu3 %v2415_v21 }
 0x2c6   : > { %v2416_v63 = vpack.c.bf16 %v2393_v39, %v2392_v2 }
 0x2c7   : > { %v2018_v55 = vpop.f32.mrf.mxu2 }
 0x2c8   : > { %v2019_v17 = vadd.f32 %v2018_v55, %v1840_v56  ;;  %v2107_v44 = vpop.f32.mrf.mxu3  ;;  %v1842_v28 = vpop.f32.mrf.mxu0  ;;  %v2299_v56 = vand.u32 255, %v2267_v35 }
 0x2c9   : > { %v2108_v1 = vadd.f32 %v2107_v44, %v1929_v32  ;;  %v1931_v58 = vpop.f32.mrf.mxu1 }
 0x2ca   : > { %v2172_v62 = vmul.f32 %v2019_v17, %v5288_v16  ;;  %v2443_v38 = vshra.s32 %v2299_v56, 4  ;;  %v2331_v55 = vand.u32 15, %v2299_v56  ;;  %v4260_v17 = vadd.s32 4294967288, %v2442_v34 }
 0x2cb   : > { %v2173_v57 = vmul.f32 %v2108_v1, %v5288_v16 }
 0x2cc   : > { %2236 = vst [vmem:[%s5015_s8 + $0x790] sm:$0xff] %v2172_v62  ;;  %v4261_v44 = vadd.s32 4294967288, %v2443_v38  ;;  %v4229_v62 = vadd.s32 4294967288, %v2331_v55  ;;  %v2506_v2 = vcvt.s32.f32 %v4260_v17 }
 0x2cd   : > { %2237 = vst [vmem:[%s5015_s8 + $0x798] sm:$0xff] %v2173_v57 }
 0x2ce   : > { %v2507_v39 = vcvt.s32.f32 %v4261_v44  ;;  %v2395_v47 = vcvt.s32.f32 %v4229_v62 }
 0x2cf   : > { %v2020_v41 = vpop.f32.mrf.mxu2 }
 0x2d0   : > { %v2021_v21 = vadd.f32 %v2020_v41, %v1842_v28  ;;  %v2109_v9 = vpop.f32.mrf.mxu3  ;;  %v2545_v32 = vpop.f32.mrf.mxu0  ;;  %v5487_v28 = vld [vmem:[%s4793_s6 + $0xb0] sm:$0xff] }
 0x2d1   : > { %v2110_v60 = vadd.f32 %v2109_v9, %v1931_v58  ;;  %v2634_v0 = vpop.f32.mrf.mxu1  ;;  %v4228_v58 = vadd.s32 4294967288, %v2330_v31  ;;  %v2268_v52 = vunpack.c.0.s8 %v5487_v28  ;;  %v2269_v41 = vunpack.c.1.s8 %v5487_v28 }
 0x2d2   : > { %v2174_v13 = vmul.f32 %v2021_v21, %v5296_v14  ;;  %v2529_v9 = vpack.c.bf16 %v2507_v39, %v2506_v2 }
 0x2d3   : > { %v2175_v49 = vmul.f32 %v2110_v60, %v5296_v14  ;;  %2584 = vmatmul.bf16.gmra.mxu0 %v2528_v22  ;;  %v2300_v56 = vand.u32 255, %v2268_v52 }
 0x2d4   : > { %2238 = vst [vmem:[%s5015_s8 + $0x7d0] sm:$0xff] %v2174_v13  ;;  %2673 = vmatmul.bf16.gmra.mxu1 %v2528_v22  ;;  %2762 = vmatmul.bf16.gmra.mxu2 %v2416_v63  ;;  %v2394_v22 = vcvt.s32.f32 %v4228_v58 }
 0x2d5   : > { %2239 = vst [vmem:[%s5015_s8 + $0x7d8] sm:$0xff] %v2175_v49  ;;  %2851 = vmatmul.bf16.gmra.mxu3 %v2416_v63  ;;  %v2444_v31 = vshra.s32 %v2300_v56, 4  ;;  %v2332_v17 = vand.u32 15, %v2300_v56  ;;  %v2271_v56 = vunpack.c.3.s8 %v5487_v28 }
 0x2d6   : > { %v2417_v13 = vpack.c.bf16 %v2395_v47, %v2394_v22  ;;  %v2270_v47 = vunpack.c.2.s8 %v5487_v28 }
 0x2d7   : > { %v2723_v46 = vpop.f32.mrf.mxu2 }
 0x2d8   : > { %v2724_v23 = vadd.f32 %v2723_v46, %v2545_v32  ;;  %v2812_v45 = vpop.f32.mrf.mxu3  ;;  %v2547_v1 = vpop.f32.mrf.mxu0  ;;  %v2301_v32 = vand.u32 255, %v2269_v41 }
 0x2d9   : > { %v2813_v3 = vadd.f32 %v2812_v45, %v2634_v0  ;;  %v2636_v57 = vpop.f32.mrf.mxu1 }
 0x2da   : > { %v2892_v12 = vmul.f32 %v2724_v23, %v5004_v42  ;;  %v2445_v46 = vshra.s32 %v2301_v32, 4  ;;  %v2333_v44 = vand.u32 15, %v2301_v32  ;;  %v4262_v23 = vadd.s32 4294967288, %v2444_v31 }
 0x2db   : > { %v2893_v35 = vmul.f32 %v2813_v3, %v5004_v42 }
 0x2dc   : > { %2956 = vst [vmem:[%s5015_s8 + $0x20] sm:$0xff] %v2892_v12  ;;  %v4231_v12 = vadd.s32 4294967288, %v2333_v44  ;;  %v2508_v39 = vcvt.s32.f32 %v4262_v23 }
 0x2dd   : > { %2957 = vst [vmem:[%s5015_s8 + $0x28] sm:$0xff] %v2893_v35 }
 0x2df   : > { %v2725_v21 = vpop.f32.mrf.mxu2 }
 0x2e0   : > { %v2726_v63 = vadd.f32 %v2725_v21, %v2547_v1  ;;  %v2814_v60 = vpop.f32.mrf.mxu3  ;;  %v2550_v0 = vpop.f32.mrf.mxu0  ;;  %v4263_v1 = vadd.s32 4294967288, %v2445_v46 }
 0x2e1   : > { %v2815_v49 = vadd.f32 %v2814_v60, %v2636_v57  ;;  %v2639_v34 = vpop.f32.mrf.mxu1  ;;  %v4230_v57 = vadd.s32 4294967288, %v2332_v17  ;;  %v2302_v60 = vand.u32 255, %v2270_v47 }
 0x2e2   : > { %v2894_v38 = vmul.f32 %v2726_v63, %v5019_v19  ;;  %v2509_v22 = vcvt.s32.f32 %v4263_v1 }
 0x2e3   : > { %v2895_v55 = vmul.f32 %v2815_v49, %v5019_v19  ;;  %2589 = vmatmul.bf16.gmra.mxu0 %v2529_v9  ;;  %v2396_v21 = vcvt.s32.f32 %v4230_v57  ;;  %v2446_v17 = vshra.s32 %v2302_v60, 4  ;;  %v2334_v23 = vand.u32 15, %v2302_v60 }
 0x2e4   : > { %2958 = vst [vmem:[%s5015_s8 + $0x60] sm:$0xff] %v2894_v38  ;;  %2678 = vmatmul.bf16.gmra.mxu1 %v2529_v9  ;;  %2767 = vmatmul.bf16.gmra.mxu2 %v2417_v13  ;;  %v2397_v9 = vcvt.s32.f32 %v4231_v12  ;;  %v2530_v63 = vpack.c.bf16 %v2509_v22, %v2508_v39 }
 0x2e5   : > { %2959 = vst [vmem:[%s5015_s8 + $0x68] sm:$0xff] %v2895_v55  ;;  %2856 = vmatmul.bf16.gmra.mxu3 %v2417_v13 }
 0x2e6   : > { %v2418_v38 = vpack.c.bf16 %v2397_v9, %v2396_v21 }
 0x2e7   : > { %v2728_v45 = vpop.f32.mrf.mxu2 }
 0x2e8   : > { %v2729_v58 = vadd.f32 %v2728_v45, %v2550_v0  ;;  %v2817_v62 = vpop.f32.mrf.mxu3  ;;  %v2552_v3 = vpop.f32.mrf.mxu0  ;;  %v2303_v0 = vand.u32 255, %v2271_v56 }
 0x2e9   : > { %v2818_v52 = vadd.f32 %v2817_v62, %v2639_v34  ;;  %v2641_v35 = vpop.f32.mrf.mxu1 }
 0x2ea   : > { %v2896_v2 = vmul.f32 %v2729_v58, %v5026_v59  ;;  %v2447_v44 = vshra.s32 %v2303_v0, 4  ;;  %v2335_v45 = vand.u32 15, %v2303_v0  ;;  %v4264_v58 = vadd.s32 4294967288, %v2446_v17 }
 0x2eb   : > { %v2897_v41 = vmul.f32 %v2818_v52, %v5026_v59 }
 0x2ec   : > { %2960 = vst [vmem:[%s5015_s8 + $0xa0] sm:$0xff] %v2896_v2  ;;  %v4265_v62 = vadd.s32 4294967288, %v2447_v44  ;;  %v4233_v2 = vadd.s32 4294967288, %v2335_v45  ;;  %v2510_v21 = vcvt.s32.f32 %v4264_v58 }
 0x2ed   : > { %2961 = vst [vmem:[%s5015_s8 + $0xa8] sm:$0xff] %v2897_v41 }
 0x2ee   : > { %v2511_v9 = vcvt.s32.f32 %v4265_v62  ;;  %v2399_v60 = vcvt.s32.f32 %v4233_v2 }
 0x2ef   : > { %v2730_v32 = vpop.f32.mrf.mxu2 }
 0x2f0   : > { %v2731_v13 = vadd.f32 %v2730_v32, %v2552_v3  ;;  %v2819_v49 = vpop.f32.mrf.mxu3  ;;  %v2555_v34 = vpop.f32.mrf.mxu0  ;;  %v5510_v3 = vld [vmem:[%s4793_s6 + $0xd0] sm:$0xff] }
 0x2f1   : > { %v2820_v31 = vadd.f32 %v2819_v49, %v2641_v35  ;;  %v2644_v55 = vpop.f32.mrf.mxu1  ;;  %v4232_v35 = vadd.s32 4294967288, %v2334_v23  ;;  %v2272_v47 = vunpack.c.0.s8 %v5510_v3  ;;  %v2273_v32 = vunpack.c.1.s8 %v5510_v3 }
 0x2f2   : > { %v2898_v46 = vmul.f32 %v2731_v13, %v5035_v30  ;;  %v2531_v49 = vpack.c.bf16 %v2511_v9, %v2510_v21 }
 0x2f3   : > { %v2899_v28 = vmul.f32 %v2820_v31, %v5035_v30  ;;  %2594 = vmatmul.bf16.gmra.mxu0 %v2530_v63  ;;  %v2304_v0 = vand.u32 255, %v2272_v47 }
 0x2f4   : > { %2962 = vst [vmem:[%s5015_s8 + $0xe0] sm:$0xff] %v2898_v46  ;;  %2683 = vmatmul.bf16.gmra.mxu1 %v2530_v63  ;;  %2772 = vmatmul.bf16.gmra.mxu2 %v2418_v38  ;;  %v2398_v63 = vcvt.s32.f32 %v4232_v35 }
 0x2f5   : > { %2963 = vst [vmem:[%s5015_s8 + $0xe8] sm:$0xff] %v2899_v28  ;;  %2861 = vmatmul.bf16.gmra.mxu3 %v2418_v38  ;;  %v2448_v23 = vshra.s32 %v2304_v0, 4  ;;  %v2336_v58 = vand.u32 15, %v2304_v0  ;;  %v2275_v0 = vunpack.c.3.s8 %v5510_v3 }
 0x2f6   : > { %v2419_v46 = vpack.c.bf16 %v2399_v60, %v2398_v63  ;;  %v2274_v60 = vunpack.c.2.s8 %v5510_v3 }
 0x2f7   : > { %v2733_v1 = vpop.f32.mrf.mxu2 }
 0x2f8   : > { %v2734_v57 = vadd.f32 %v2733_v1, %v2555_v34  ;;  %v2822_v12 = vpop.f32.mrf.mxu3  ;;  %v2557_v52 = vpop.f32.mrf.mxu0  ;;  %v2305_v34 = vand.u32 255, %v2273_v32 }
 0x2f9   : > { %v2823_v39 = vadd.f32 %v2822_v12, %v2644_v55  ;;  %v2646_v41 = vpop.f32.mrf.mxu1 }
 0x2fa   : > { %v2900_v22 = vmul.f32 %v2734_v57, %v5042_v20  ;;  %v2449_v1 = vshra.s32 %v2305_v34, 4  ;;  %v2337_v62 = vand.u32 15, %v2305_v34  ;;  %v4266_v57 = vadd.s32 4294967288, %v2448_v23 }
 0x2fb   : > { %v2901_v56 = vmul.f32 %v2823_v39, %v5042_v20 }
 0x2fc   : > { %2964 = vst [vmem:[%s5015_s8 + $0x120] sm:$0xff] %v2900_v22  ;;  %v4235_v22 = vadd.s32 4294967288, %v2337_v62  ;;  %v2512_v9 = vcvt.s32.f32 %v4266_v57 }
 0x2fd   : > { %2965 = vst [vmem:[%s5015_s8 + $0x128] sm:$0xff] %v2901_v56 }
 0x2ff   : > { %v2735_v13 = vpop.f32.mrf.mxu2 }
 0x300   : > { %v2736_v38 = vadd.f32 %v2735_v13, %v2557_v52  ;;  %v2824_v31 = vpop.f32.mrf.mxu3  ;;  %v2560_v55 = vpop.f32.mrf.mxu0  ;;  %v4267_v52 = vadd.s32 4294967288, %v2449_v1 }
 0x301   : > { %v2825_v28 = vadd.f32 %v2824_v31, %v2646_v41  ;;  %v2649_v17 = vpop.f32.mrf.mxu1  ;;  %v4234_v41 = vadd.s32 4294967288, %v2336_v58  ;;  %v2306_v31 = vand.u32 255, %v2274_v60 }
 0x302   : > { %v2902_v44 = vmul.f32 %v2736_v38, %v5054_v6  ;;  %v2513_v63 = vcvt.s32.f32 %v4267_v52 }
 0x303   : > { %v2903_v45 = vmul.f32 %v2825_v28, %v5054_v6  ;;  %2599 = vmatmul.bf16.gmra.mxu0 %v2531_v49  ;;  %v2400_v13 = vcvt.s32.f32 %v4234_v41  ;;  %v2450_v58 = vshra.s32 %v2306_v31, 4  ;;  %v2338_v57 = vand.u32 15, %v2306_v31 }
 0x304   : > { %2966 = vst [vmem:[%s5015_s8 + $0x160] sm:$0xff] %v2902_v44  ;;  %2688 = vmatmul.bf16.gmra.mxu1 %v2531_v49  ;;  %2777 = vmatmul.bf16.gmra.mxu2 %v2419_v46  ;;  %v2401_v49 = vcvt.s32.f32 %v4235_v22  ;;  %v2532_v38 = vpack.c.bf16 %v2513_v63, %v2512_v9 }
 0x305   : > { %2967 = vst [vmem:[%s5015_s8 + $0x168] sm:$0xff] %v2903_v45  ;;  %2866 = vmatmul.bf16.gmra.mxu3 %v2419_v46 }
 0x306   : > { %v2420_v44 = vpack.c.bf16 %v2401_v49, %v2400_v13 }
 0x307   : > { %v2738_v12 = vpop.f32.mrf.mxu2 }
 0x308   : > { %v2739_v35 = vadd.f32 %v2738_v12, %v2560_v55  ;;  %v2827_v2 = vpop.f32.mrf.mxu3  ;;  %v2562_v39 = vpop.f32.mrf.mxu0  ;;  %v2307_v55 = vand.u32 255, %v2275_v0 }
 0x309   : > { %v2828_v47 = vadd.f32 %v2827_v2, %v2649_v17  ;;  %v2651_v56 = vpop.f32.mrf.mxu1 }
 0x30a   : > { %v2904_v21 = vmul.f32 %v2739_v35, %v5061_v53  ;;  %v2451_v62 = vshra.s32 %v2307_v55, 4  ;;  %v2339_v12 = vand.u32 15, %v2307_v55  ;;  %v4268_v35 = vadd.s32 4294967288, %v2450_v58 }
 0x30b   : > { %v2905_v32 = vmul.f32 %v2828_v47, %v5061_v53 }
 0x30c   : > { %2968 = vst [vmem:[%s5015_s8 + $0x1a0] sm:$0xff] %v2904_v21  ;;  %v4269_v2 = vadd.s32 4294967288, %v2451_v62  ;;  %v4237_v21 = vadd.s32 4294967288, %v2339_v12  ;;  %v2514_v13 = vcvt.s32.f32 %v4268_v35 }
 0x30d   : > { %2969 = vst [vmem:[%s5015_s8 + $0x1a8] sm:$0xff] %v2905_v32 }
 0x30e   : > { %v2515_v49 = vcvt.s32.f32 %v4269_v2  ;;  %v2403_v31 = vcvt.s32.f32 %v4237_v21 }
 0x30f   : > { %v2740_v34 = vpop.f32.mrf.mxu2 }
 0x310   : > { %v2741_v46 = vadd.f32 %v2740_v34, %v2562_v39  ;;  %v2829_v28 = vpop.f32.mrf.mxu3  ;;  %v2565_v17 = vpop.f32.mrf.mxu0  ;;  %v5533_v39 = vld [vmem:[%s4793_s6 + $0xf0] sm:$0xff] }
 0x311   : > { %v2830_v23 = vadd.f32 %v2829_v28, %v2651_v56  ;;  %v2654_v45 = vpop.f32.mrf.mxu1  ;;  %v4236_v56 = vadd.s32 4294967288, %v2338_v57  ;;  %v2276_v60 = vunpack.c.0.s8 %v5533_v39  ;;  %v2277_v34 = vunpack.c.1.s8 %v5533_v39 }
 0x312   : > { %v2906_v1 = vmul.f32 %v2741_v46, %v5896_v33  ;;  %v2533_v28 = vpack.c.bf16 %v2515_v49, %v2514_v13 }
 0x313   : > { %v2907_v3 = vmul.f32 %v2830_v23, %v5896_v33  ;;  %2604 = vmatmul.bf16.gmra.mxu0 %v2532_v38  ;;  %v2308_v55 = vand.u32 255, %v2276_v60 }
 0x314   : > { %2970 = vst [vmem:[%s5015_s8 + $0x1e0] sm:$0xff] %v2906_v1  ;;  %2693 = vmatmul.bf16.gmra.mxu1 %v2532_v38  ;;  %2782 = vmatmul.bf16.gmra.mxu2 %v2420_v44  ;;  %v2402_v38 = vcvt.s32.f32 %v4236_v56 }
 0x315   : > { %2971 = vst [vmem:[%s5015_s8 + $0x1e8] sm:$0xff] %v2907_v3  ;;  %2871 = vmatmul.bf16.gmra.mxu3 %v2420_v44  ;;  %v2452_v57 = vshra.s32 %v2308_v55, 4  ;;  %v2340_v35 = vand.u32 15, %v2308_v55  ;;  %v2279_v55 = vunpack.c.3.s8 %v5533_v39 }
 0x316   : > { %v2421_v1 = vpack.c.bf16 %v2403_v31, %v2402_v38  ;;  %v2278_v31 = vunpack.c.2.s8 %v5533_v39 }
 0x317   : > { %v2743_v52 = vpop.f32.mrf.mxu2 }
 0x318   : > { %v2744_v41 = vadd.f32 %v2743_v52, %v2565_v17  ;;  %v2832_v22 = vpop.f32.mrf.mxu3  ;;  %v2567_v47 = vpop.f32.mrf.mxu0  ;;  %v2309_v17 = vand.u32 255, %v2277_v34 }
 0x319   : > { %v2833_v9 = vadd.f32 %v2832_v22, %v2654_v45  ;;  %v2656_v32 = vpop.f32.mrf.mxu1 }
 0x31a   : > { %v2908_v63 = vmul.f32 %v2744_v41, %v5897_v5  ;;  %v2453_v52 = vshra.s32 %v2309_v17, 4  ;;  %v2341_v2 = vand.u32 15, %v2309_v17  ;;  %v4270_v41 = vadd.s32 4294967288, %v2452_v57 }
 0x31b   : > { %v2909_v0 = vmul.f32 %v2833_v9, %v5897_v5 }
 0x31c   : > { %2972 = vst [vmem:[%s5015_s8 + $0x220] sm:$0xff] %v2908_v63  ;;  %v4239_v63 = vadd.s32 4294967288, %v2341_v2  ;;  %v2516_v49 = vcvt.s32.f32 %v4270_v41 }
 0x31d   : > { %2973 = vst [vmem:[%s5015_s8 + $0x228] sm:$0xff] %v2909_v0 }
 0x31f   : > { %v2745_v46 = vpop.f32.mrf.mxu2 }
 0x320   : > { %v2746_v44 = vadd.f32 %v2745_v46, %v2567_v47  ;;  %v2834_v23 = vpop.f32.mrf.mxu3  ;;  %v2570_v45 = vpop.f32.mrf.mxu0  ;;  %v4271_v47 = vadd.s32 4294967288, %v2453_v52 }
 0x321   : > { %v2835_v3 = vadd.f32 %v2834_v23, %v2656_v32  ;;  %v2659_v58 = vpop.f32.mrf.mxu1  ;;  %v4238_v32 = vadd.s32 4294967288, %v2340_v35  ;;  %v2310_v23 = vand.u32 255, %v2278_v31 }
 0x322   : > { %v2910_v62 = vmul.f32 %v2746_v44, %v5898_v29  ;;  %v2517_v38 = vcvt.s32.f32 %v4271_v47 }
 0x323   : > { %v2911_v12 = vmul.f32 %v2835_v3, %v5898_v29  ;;  %2609 = vmatmul.bf16.gmra.mxu0 %v2533_v28  ;;  %v2404_v46 = vcvt.s32.f32 %v4238_v32  ;;  %v2454_v35 = vshra.s32 %v2310_v23, 4  ;;  %v2342_v41 = vand.u32 15, %v2310_v23 }
 0x324   : > { %2974 = vst [vmem:[%s5015_s8 + $0x260] sm:$0xff] %v2910_v62  ;;  %2698 = vmatmul.bf16.gmra.mxu1 %v2533_v28  ;;  %2787 = vmatmul.bf16.gmra.mxu2 %v2421_v1  ;;  %v2405_v28 = vcvt.s32.f32 %v4239_v63  ;;  %v2534_v44 = vpack.c.bf16 %v2517_v38, %v2516_v49 }
 0x325   : > { %2975 = vst [vmem:[%s5015_s8 + $0x268] sm:$0xff] %v2911_v12  ;;  %2876 = vmatmul.bf16.gmra.mxu3 %v2421_v1 }
 0x326   : > { %v2422_v62 = vpack.c.bf16 %v2405_v28, %v2404_v46 }
 0x327   : > { %v2748_v22 = vpop.f32.mrf.mxu2 }
 0x328   : > { %v2749_v56 = vadd.f32 %v2748_v22, %v2570_v45  ;;  %v2837_v21 = vpop.f32.mrf.mxu3  ;;  %v2572_v9 = vpop.f32.mrf.mxu0  ;;  %v2311_v45 = vand.u32 255, %v2279_v55 }
 0x329   : > { %v2838_v60 = vadd.f32 %v2837_v21, %v2659_v58  ;;  %v2661_v0 = vpop.f32.mrf.mxu1 }
 0x32a   : > { %v2912_v13 = vmul.f32 %v2749_v56, %v5899_v7  ;;  %v2455_v2 = vshra.s32 %v2311_v45, 4  ;;  %v2343_v22 = vand.u32 15, %v2311_v45  ;;  %v4272_v56 = vadd.s32 4294967288, %v2454_v35 }
 0x32b   : > { %v2913_v34 = vmul.f32 %v2838_v60, %v5899_v7 }
 0x32c   : > { %2976 = vst [vmem:[%s5015_s8 + $0x2a0] sm:$0xff] %v2912_v13  ;;  %v4273_v21 = vadd.s32 4294967288, %v2455_v2  ;;  %v4241_v13 = vadd.s32 4294967288, %v2343_v22  ;;  %v2518_v46 = vcvt.s32.f32 %v4272_v56 }
 0x32d   : > { %2977 = vst [vmem:[%s5015_s8 + $0x2a8] sm:$0xff] %v2913_v34 }
 0x32e   : > { %v2519_v28 = vcvt.s32.f32 %v4273_v21  ;;  %v2407_v23 = vcvt.s32.f32 %v4241_v13 }
 0x32f   : > { %v2750_v17 = vpop.f32.mrf.mxu2 }
 0x330   : > { %v2751_v1 = vadd.f32 %v2750_v17, %v2572_v9  ;;  %v2839_v3 = vpop.f32.mrf.mxu3  ;;  %v2575_v58 = vpop.f32.mrf.mxu0  ;;  %v5556_v9 = vld [vmem:[%s4793_s6 + $0x18] sm:$0xff] }
 0x331   : > { %v2840_v57 = vadd.f32 %v2839_v3, %v2661_v0  ;;  %v2664_v12 = vpop.f32.mrf.mxu1  ;;  %v4240_v0 = vadd.s32 4294967288, %v2342_v41  ;;  %v3028_v31 = vunpack.c.0.s8 %v5556_v9  ;;  %v3029_v17 = vunpack.c.1.s8 %v5556_v9 }
 0x332   : > { %v2914_v52 = vmul.f32 %v2751_v1, %v5900_v24  ;;  %v2535_v3 = vpack.c.bf16 %v2519_v28, %v2518_v46 }
 0x333   : > { %v2915_v39 = vmul.f32 %v2840_v57, %v5900_v24  ;;  %2614 = vmatmul.bf16.gmra.mxu0 %v2534_v44  ;;  %v3060_v45 = vand.u32 255, %v3028_v31 }
 0x334   : > { %2978 = vst [vmem:[%s5015_s8 + $0x2e0] sm:$0xff] %v2914_v52  ;;  %2703 = vmatmul.bf16.gmra.mxu1 %v2534_v44  ;;  %2792 = vmatmul.bf16.gmra.mxu2 %v2422_v62  ;;  %v2406_v44 = vcvt.s32.f32 %v4240_v0 }
 0x335   : > { %2979 = vst [vmem:[%s5015_s8 + $0x2e8] sm:$0xff] %v2915_v39  ;;  %2881 = vmatmul.bf16.gmra.mxu3 %v2422_v62  ;;  %v3204_v41 = vshra.s32 %v3060_v45, 4  ;;  %v3092_v56 = vand.u32 15, %v3060_v45  ;;  %v3031_v45 = vunpack.c.3.s8 %v5556_v9 }
 0x336   : > { %v2423_v52 = vpack.c.bf16 %v2407_v23, %v2406_v44  ;;  %v3030_v23 = vunpack.c.2.s8 %v5556_v9 }
 0x337   : > { %v2753_v47 = vpop.f32.mrf.mxu2 }
 0x338   : > { %v2754_v32 = vadd.f32 %v2753_v47, %v2575_v58  ;;  %v2842_v63 = vpop.f32.mrf.mxu3  ;;  %v2577_v60 = vpop.f32.mrf.mxu0  ;;  %v3061_v58 = vand.u32 255, %v3029_v17 }
 0x339   : > { %v2843_v49 = vadd.f32 %v2842_v63, %v2664_v12  ;;  %v2666_v34 = vpop.f32.mrf.mxu1 }
 0x33a   : > { %v2916_v38 = vmul.f32 %v2754_v32, %v5901_v40  ;;  %v3205_v47 = vshra.s32 %v3061_v58, 4  ;;  %v3093_v21 = vand.u32 15, %v3061_v58  ;;  %v4306_v32 = vadd.s32 4294967288, %v3204_v41 }
 0x33b   : > { %v2917_v55 = vmul.f32 %v2843_v49, %v5901_v40 }
 0x33c   : > { %2980 = vst [vmem:[%s5015_s8 + $0x320] sm:$0xff] %v2916_v38  ;;  %v4275_v38 = vadd.s32 4294967288, %v3093_v21  ;;  %v3268_v28 = vcvt.s32.f32 %v4306_v32 }
 0x33d   : > { %2981 = vst [vmem:[%s5015_s8 + $0x328] sm:$0xff] %v2917_v55 }
 0x33f   : > { %v2755_v1 = vpop.f32.mrf.mxu2 }
 0x340   : > { %v2756_v62 = vadd.f32 %v2755_v1, %v2577_v60  ;;  %v2844_v57 = vpop.f32.mrf.mxu3  ;;  %v2580_v12 = vpop.f32.mrf.mxu0  ;;  %v4307_v60 = vadd.s32 4294967288, %v3205_v47 }
 0x341   : > { %v2845_v39 = vadd.f32 %v2844_v57, %v2666_v34  ;;  %v2669_v35 = vpop.f32.mrf.mxu1  ;;  %v4274_v34 = vadd.s32 4294967288, %v3092_v56  ;;  %v3062_v57 = vand.u32 255, %v3030_v23 }
 0x342   : > { %v2918_v2 = vmul.f32 %v2756_v62, %v5124_v51  ;;  %v3269_v44 = vcvt.s32.f32 %v4307_v60 }
 0x343   : > { %v2919_v22 = vmul.f32 %v2845_v39, %v5124_v51  ;;  %2619 = vmatmul.bf16.gmra.mxu0 %v2535_v3  ;;  %v3156_v1 = vcvt.s32.f32 %v4274_v34  ;;  %v3206_v56 = vshra.s32 %v3062_v57, 4  ;;  %v3094_v32 = vand.u32 15, %v3062_v57 }
 0x344   : > { %2982 = vst [vmem:[%s5015_s8 + $0x360] sm:$0xff] %v2918_v2  ;;  %2708 = vmatmul.bf16.gmra.mxu1 %v2535_v3  ;;  %2797 = vmatmul.bf16.gmra.mxu2 %v2423_v52  ;;  %v3157_v3 = vcvt.s32.f32 %v4275_v38  ;;  %v3300_v62 = vpack.c.bf16 %v3269_v44, %v3268_v28 }
 0x345   : > { %2983 = vst [vmem:[%s5015_s8 + $0x368] sm:$0xff] %v2919_v22  ;;  %2886 = vmatmul.bf16.gmra.mxu3 %v2423_v52 }
 0x346   : > { %v3188_v2 = vpack.c.bf16 %v3157_v3, %v3156_v1 }
 0x347   : > { %v2758_v63 = vpop.f32.mrf.mxu2 }
 0x348   : > { %v2759_v0 = vadd.f32 %v2758_v63, %v2580_v12  ;;  %v2847_v13 = vpop.f32.mrf.mxu3  ;;  %v2582_v49 = vpop.f32.mrf.mxu0  ;;  %v3063_v12 = vand.u32 255, %v3031_v45 }
 0x349   : > { %v2848_v31 = vadd.f32 %v2847_v13, %v2669_v35  ;;  %v2671_v55 = vpop.f32.mrf.mxu1 }
 0x34a   : > { %v2920_v46 = vmul.f32 %v2759_v0, %v5902_v27  ;;  %v3207_v21 = vshra.s32 %v3063_v12, 4  ;;  %v3095_v63 = vand.u32 15, %v3063_v12  ;;  %v4308_v0 = vadd.s32 4294967288, %v3206_v56 }
 0x34b   : > { %v2921_v17 = vmul.f32 %v2848_v31, %v5902_v27 }
 0x34c   : > { %2984 = vst [vmem:[%s5015_s8 + $0x3a0] sm:$0xff] %v2920_v46  ;;  %v4309_v13 = vadd.s32 4294967288, %v3207_v21  ;;  %v4277_v46 = vadd.s32 4294967288, %v3095_v63  ;;  %v3270_v1 = vcvt.s32.f32 %v4308_v0 }
 0x34d   : > { %2985 = vst [vmem:[%s5015_s8 + $0x3a8] sm:$0xff] %v2921_v17 }
 0x34e   : > { %v3271_v3 = vcvt.s32.f32 %v4309_v13  ;;  %v3159_v57 = vcvt.s32.f32 %v4277_v46 }
 0x34f   : > { %v2760_v58 = vpop.f32.mrf.mxu2 }
 0x350   : > { %v2761_v52 = vadd.f32 %v2760_v58, %v2582_v49  ;;  %v2849_v39 = vpop.f32.mrf.mxu3  ;;  %v2585_v35 = vpop.f32.mrf.mxu0  ;;  %v5579_v49 = vld [vmem:[%s4793_s6 + $0x38] sm:$0xff] }
 0x351   : > { %v2850_v41 = vadd.f32 %v2849_v39, %v2671_v55  ;;  %v2674_v22 = vpop.f32.mrf.mxu1  ;;  %v4276_v55 = vadd.s32 4294967288, %v3094_v32  ;;  %v3032_v23 = vunpack.c.0.s8 %v5579_v49  ;;  %v3033_v58 = vunpack.c.1.s8 %v5579_v49 }
 0x352   : > { %v2922_v47 = vmul.f32 %v2761_v52, %v5140_v36  ;;  %v3301_v39 = vpack.c.bf16 %v3271_v3, %v3270_v1 }
 0x353   : > { %v2923_v9 = vmul.f32 %v2850_v41, %v5140_v36  ;;  %3324 = vmatmul.bf16.vlgmr.msrb.gmra.mxu0 %v3300_v62  ;;  %v3064_v12 = vand.u32 255, %v3032_v23 }
 0x354   : > { %2986 = vst [vmem:[%s5015_s8 + $0x3e0] sm:$0xff] %v2922_v47  ;;  %3413 = vmatmul.bf16.vlgmr.msrb.gmra.mxu1 %v3300_v62  ;;  %3502 = vmatmul.bf16.vlgmr.msrb.gmra.mxu2 %v3188_v2  ;;  %v3158_v62 = vcvt.s32.f32 %v4276_v55 }
 0x355   : > { %2987 = vst [vmem:[%s5015_s8 + $0x3e8] sm:$0xff] %v2923_v9  ;;  %3591 = vmatmul.bf16.vlgmr.msrb.gmra.mxu3 %v3188_v2  ;;  %v3208_v32 = vshra.s32 %v3064_v12, 4  ;;  %v3096_v0 = vand.u32 15, %v3064_v12  ;;  %v3035_v12 = vunpack.c.3.s8 %v5579_v49 }
 0x356   : > { %v3189_v47 = vpack.c.bf16 %v3159_v57, %v3158_v62  ;;  %v3034_v57 = vunpack.c.2.s8 %v5579_v49 }
 0x357   : > { %v2763_v60 = vpop.f32.mrf.mxu2 }
 0x358   : > { %v2764_v34 = vadd.f32 %v2763_v60, %v2585_v35  ;;  %v2852_v38 = vpop.f32.mrf.mxu3  ;;  %v2587_v31 = vpop.f32.mrf.mxu0  ;;  %v3065_v35 = vand.u32 255, %v3033_v58 }
 0x359   : > { %v2853_v28 = vadd.f32 %v2852_v38, %v2674_v22  ;;  %v2676_v17 = vpop.f32.mrf.mxu1 }
 0x35a   : > { %v2924_v44 = vmul.f32 %v2764_v34, %v5149_v54  ;;  %v3209_v60 = vshra.s32 %v3065_v35, 4  ;;  %v3097_v13 = vand.u32 15, %v3065_v35  ;;  %v4310_v34 = vadd.s32 4294967288, %v3208_v32 }
 0x35b   : > { %v2925_v45 = vmul.f32 %v2853_v28, %v5149_v54 }
 0x35c   : > { %2988 = vst [vmem:[%s5015_s8 + $0x420] sm:$0xff] %v2924_v44  ;;  %v4279_v44 = vadd.s32 4294967288, %v3097_v13  ;;  %v3272_v3 = vcvt.s32.f32 %v4310_v34 }
 0x35d   : > { %2989 = vst [vmem:[%s5015_s8 + $0x428] sm:$0xff] %v2925_v45 }
 0x35f   : > { %v2765_v52 = vpop.f32.mrf.mxu2 }
 0x360   : > { %v2766_v2 = vadd.f32 %v2765_v52, %v2587_v31  ;;  %v2854_v41 = vpop.f32.mrf.mxu3  ;;  %v2590_v22 = vpop.f32.mrf.mxu0  ;;  %v4311_v31 = vadd.s32 4294967288, %v3209_v60 }
 0x361   : > { %v2855_v9 = vadd.f32 %v2854_v41, %v2676_v17  ;;  %v2679_v56 = vpop.f32.mrf.mxu1  ;;  %v4278_v17 = vadd.s32 4294967288, %v3096_v0  ;;  %v3066_v41 = vand.u32 255, %v3034_v57 }
 0x362   : > { %v2926_v21 = vmul.f32 %v2766_v2, %v5168_v25  ;;  %v3273_v62 = vcvt.s32.f32 %v4311_v31 }
 0x363   : > { %v2927_v63 = vmul.f32 %v2855_v9, %v5168_v25  ;;  %3329 = vmatmul.bf16.gmra.mxu0 %v3301_v39  ;;  %v3160_v52 = vcvt.s32.f32 %v4278_v17  ;;  %v3210_v0 = vshra.s32 %v3066_v41, 4  ;;  %v3098_v34 = vand.u32 15, %v3066_v41 }
 0x364   : > { %2990 = vst [vmem:[%s5015_s8 + $0x460] sm:$0xff] %v2926_v21  ;;  %3418 = vmatmul.bf16.gmra.mxu1 %v3301_v39  ;;  %3507 = vmatmul.bf16.gmra.mxu2 %v3189_v47  ;;  %v3161_v39 = vcvt.s32.f32 %v4279_v44  ;;  %v3302_v2 = vpack.c.bf16 %v3273_v62, %v3272_v3 }
 0x365   : > { %2991 = vst [vmem:[%s5015_s8 + $0x468] sm:$0xff] %v2927_v63  ;;  %3596 = vmatmul.bf16.gmra.mxu3 %v3189_v47 }
 0x366   : > { %v3190_v21 = vpack.c.bf16 %v3161_v39, %v3160_v52 }
 0x367   : > { %v2768_v38 = vpop.f32.mrf.mxu2 }
 0x368   : > { %v2769_v55 = vadd.f32 %v2768_v38, %v2590_v22  ;;  %v2857_v46 = vpop.f32.mrf.mxu3  ;;  %v2592_v28 = vpop.f32.mrf.mxu0  ;;  %v3067_v22 = vand.u32 255, %v3035_v12 }
 0x369   : > { %v2858_v23 = vadd.f32 %v2857_v46, %v2679_v56  ;;  %v2681_v45 = vpop.f32.mrf.mxu1 }
 0x36a   : > { %v2928_v1 = vmul.f32 %v2769_v55, %v5182_v50  ;;  %v3211_v13 = vshra.s32 %v3067_v22, 4  ;;  %v3099_v38 = vand.u32 15, %v3067_v22  ;;  %v4312_v55 = vadd.s32 4294967288, %v3210_v0 }
 0x36b   : > { %v2929_v58 = vmul.f32 %v2858_v23, %v5182_v50 }
 0x36c   : > { %2992 = vst [vmem:[%s5015_s8 + $0x4a0] sm:$0xff] %v2928_v1  ;;  %v4313_v46 = vadd.s32 4294967288, %v3211_v13  ;;  %v4281_v1 = vadd.s32 4294967288, %v3099_v38  ;;  %v3274_v52 = vcvt.s32.f32 %v4312_v55 }
 0x36d   : > { %2993 = vst [vmem:[%s5015_s8 + $0x4a8] sm:$0xff] %v2929_v58 }
 0x36e   : > { %v3275_v39 = vcvt.s32.f32 %v4313_v46  ;;  %v3163_v41 = vcvt.s32.f32 %v4281_v1 }
 0x36f   : > { %v2770_v35 = vpop.f32.mrf.mxu2 }
 0x370   : > { %v2771_v47 = vadd.f32 %v2770_v35, %v2592_v28  ;;  %v2859_v9 = vpop.f32.mrf.mxu3  ;;  %v2595_v56 = vpop.f32.mrf.mxu0  ;;  %v5602_v28 = vld [vmem:[%s4793_s6 + $0x58] sm:$0xff] }
 0x371   : > { %v2860_v32 = vadd.f32 %v2859_v9, %v2681_v45  ;;  %v2684_v63 = vpop.f32.mrf.mxu1  ;;  %v4280_v45 = vadd.s32 4294967288, %v3098_v34  ;;  %v3036_v57 = vunpack.c.0.s8 %v5602_v28  ;;  %v3037_v35 = vunpack.c.1.s8 %v5602_v28 }
 0x372   : > { %v2930_v60 = vmul.f32 %v2771_v47, %v5198_v11  ;;  %v3303_v9 = vpack.c.bf16 %v3275_v39, %v3274_v52 }
 0x373   : > { %v2931_v49 = vmul.f32 %v2860_v32, %v5198_v11  ;;  %3334 = vmatmul.bf16.gmra.mxu0 %v3302_v2  ;;  %v3068_v22 = vand.u32 255, %v3036_v57 }
 0x374   : > { %2994 = vst [vmem:[%s5015_s8 + $0x4e0] sm:$0xff] %v2930_v60  ;;  %3423 = vmatmul.bf16.gmra.mxu1 %v3302_v2  ;;  %3512 = vmatmul.bf16.gmra.mxu2 %v3190_v21  ;;  %v3162_v2 = vcvt.s32.f32 %v4280_v45 }
 0x375   : > { %2995 = vst [vmem:[%s5015_s8 + $0x4e8] sm:$0xff] %v2931_v49  ;;  %3601 = vmatmul.bf16.gmra.mxu3 %v3190_v21  ;;  %v3212_v34 = vshra.s32 %v3068_v22, 4  ;;  %v3100_v55 = vand.u32 15, %v3068_v22  ;;  %v3039_v22 = vunpack.c.3.s8 %v5602_v28 }
 0x376   : > { %v3191_v60 = vpack.c.bf16 %v3163_v41, %v3162_v2  ;;  %v3038_v41 = vunpack.c.2.s8 %v5602_v28 }
 0x377   : > { %v2773_v31 = vpop.f32.mrf.mxu2 }
 0x378   : > { %v2774_v17 = vadd.f32 %v2773_v31, %v2595_v56  ;;  %v2862_v44 = vpop.f32.mrf.mxu3  ;;  %v2597_v23 = vpop.f32.mrf.mxu0  ;;  %v3069_v56 = vand.u32 255, %v3037_v35 }
 0x379   : > { %v2863_v3 = vadd.f32 %v2862_v44, %v2684_v63  ;;  %v2686_v58 = vpop.f32.mrf.mxu1 }
 0x37a   : > { %v2932_v62 = vmul.f32 %v2774_v17, %v5209_v48  ;;  %v3213_v31 = vshra.s32 %v3069_v56, 4  ;;  %v3101_v46 = vand.u32 15, %v3069_v56  ;;  %v4314_v17 = vadd.s32 4294967288, %v3212_v34 }
 0x37b   : > { %v2933_v12 = vmul.f32 %v2863_v3, %v5209_v48 }
 0x37c   : > { %2996 = vst [vmem:[%s5015_s8 + $0x520] sm:$0xff] %v2932_v62  ;;  %v4283_v62 = vadd.s32 4294967288, %v3101_v46  ;;  %v3276_v39 = vcvt.s32.f32 %v4314_v17 }
 0x37d   : > { %2997 = vst [vmem:[%s5015_s8 + $0x528] sm:$0xff] %v2933_v12 }
 0x37f   : > { %v2775_v47 = vpop.f32.mrf.mxu2 }
 0x380   : > { %v2776_v21 = vadd.f32 %v2775_v47, %v2597_v23  ;;  %v2864_v32 = vpop.f32.mrf.mxu3  ;;  %v2600_v63 = vpop.f32.mrf.mxu0  ;;  %v4315_v23 = vadd.s32 4294967288, %v3213_v31 }
 0x381   : > { %v2865_v49 = vadd.f32 %v2864_v32, %v2686_v58  ;;  %v2689_v0 = vpop.f32.mrf.mxu1  ;;  %v4282_v58 = vadd.s32 4294967288, %v3100_v55  ;;  %v3070_v32 = vand.u32 255, %v3038_v41 }
 0x382   : > { %v2934_v13 = vmul.f32 %v2776_v21, %v5220_v26  ;;  %v3277_v2 = vcvt.s32.f32 %v4315_v23 }
 0x383   : > { %v2935_v38 = vmul.f32 %v2865_v49, %v5220_v26  ;;  %3339 = vmatmul.bf16.gmra.mxu0 %v3303_v9  ;;  %v3164_v47 = vcvt.s32.f32 %v4282_v58  ;;  %v3214_v55 = vshra.s32 %v3070_v32, 4  ;;  %v3102_v17 = vand.u32 15, %v3070_v32 }
 0x384   : > { %2998 = vst [vmem:[%s5015_s8 + $0x560] sm:$0xff] %v2934_v13  ;;  %3428 = vmatmul.bf16.gmra.mxu1 %v3303_v9  ;;  %3517 = vmatmul.bf16.gmra.mxu2 %v3191_v60  ;;  %v3165_v9 = vcvt.s32.f32 %v4283_v62  ;;  %v3304_v21 = vpack.c.bf16 %v3277_v2, %v3276_v39 }
 0x385   : > { %2999 = vst [vmem:[%s5015_s8 + $0x568] sm:$0xff] %v2935_v38  ;;  %3606 = vmatmul.bf16.gmra.mxu3 %v3191_v60 }
 0x386   : > { %v3192_v13 = vpack.c.bf16 %v3165_v9, %v3164_v47 }
 0x387   : > { %v2778_v44 = vpop.f32.mrf.mxu2 }
 0x388   : > { %v2779_v45 = vadd.f32 %v2778_v44, %v2600_v63  ;;  %v2867_v1 = vpop.f32.mrf.mxu3  ;;  %v2602_v3 = vpop.f32.mrf.mxu0  ;;  %v3071_v63 = vand.u32 255, %v3039_v22 }
 0x389   : > { %v2868_v57 = vadd.f32 %v2867_v1, %v2689_v0  ;;  %v2691_v12 = vpop.f32.mrf.mxu1 }
 0x38a   : > { %v2936_v52 = vmul.f32 %v2779_v45, %v5226_v10  ;;  %v3215_v46 = vshra.s32 %v3071_v63, 4  ;;  %v3103_v44 = vand.u32 15, %v3071_v63  ;;  %v4316_v45 = vadd.s32 4294967288, %v3214_v55 }
 0x38b   : > { %v2937_v35 = vmul.f32 %v2868_v57, %v5226_v10 }
 0x38c   : > { %3000 = vst [vmem:[%s5015_s8 + $0x5a0] sm:$0xff] %v2936_v52  ;;  %v4317_v1 = vadd.s32 4294967288, %v3215_v46  ;;  %v4285_v52 = vadd.s32 4294967288, %v3103_v44  ;;  %v3278_v47 = vcvt.s32.f32 %v4316_v45 }
 0x38d   : > { %3001 = vst [vmem:[%s5015_s8 + $0x5a8] sm:$0xff] %v2937_v35 }
 0x38e   : > { %v3279_v9 = vcvt.s32.f32 %v4317_v1  ;;  %v3167_v32 = vcvt.s32.f32 %v4285_v52 }
 0x38f   : > { %v2780_v56 = vpop.f32.mrf.mxu2 }
 0x390   : > { %v2781_v60 = vadd.f32 %v2780_v56, %v2602_v3  ;;  %v2869_v49 = vpop.f32.mrf.mxu3  ;;  %v2605_v0 = vpop.f32.mrf.mxu0  ;;  %v5625_v3 = vld [vmem:[%s4793_s6 + $0x78] sm:$0xff] }
 0x391   : > { %v2870_v34 = vadd.f32 %v2869_v49, %v2691_v12  ;;  %v2694_v38 = vpop.f32.mrf.mxu1  ;;  %v4284_v12 = vadd.s32 4294967288, %v3102_v17  ;;  %v3040_v41 = vunpack.c.0.s8 %v5625_v3  ;;  %v3041_v56 = vunpack.c.1.s8 %v5625_v3 }
 0x392   : > { %v2938_v31 = vmul.f32 %v2781_v60, %v5234_v61  ;;  %v3305_v49 = vpack.c.bf16 %v3279_v9, %v3278_v47 }
 0x393   : > { %v2939_v28 = vmul.f32 %v2870_v34, %v5234_v61  ;;  %3344 = vmatmul.bf16.gmra.mxu0 %v3304_v21  ;;  %v3072_v63 = vand.u32 255, %v3040_v41 }
 0x394   : > { %3002 = vst [vmem:[%s5015_s8 + $0x5e0] sm:$0xff] %v2938_v31  ;;  %3433 = vmatmul.bf16.gmra.mxu1 %v3304_v21  ;;  %3522 = vmatmul.bf16.gmra.mxu2 %v3192_v13  ;;  %v3166_v21 = vcvt.s32.f32 %v4284_v12 }
 0x395   : > { %3003 = vst [vmem:[%s5015_s8 + $0x5e8] sm:$0xff] %v2939_v28  ;;  %3611 = vmatmul.bf16.gmra.mxu3 %v3192_v13  ;;  %v3216_v17 = vshra.s32 %v3072_v63, 4  ;;  %v3104_v45 = vand.u32 15, %v3072_v63  ;;  %v3043_v63 = vunpack.c.3.s8 %v5625_v3 }
 0x396   : > { %v3193_v31 = vpack.c.bf16 %v3167_v32, %v3166_v21  ;;  %v3042_v32 = vunpack.c.2.s8 %v5625_v3 }
 0x397   : > { %v2783_v23 = vpop.f32.mrf.mxu2 }
 0x398   : > { %v2784_v58 = vadd.f32 %v2783_v23, %v2605_v0  ;;  %v2872_v62 = vpop.f32.mrf.mxu3  ;;  %v2607_v57 = vpop.f32.mrf.mxu0  ;;  %v3073_v0 = vand.u32 255, %v3041_v56 }
 0x399   : > { %v2873_v39 = vadd.f32 %v2872_v62, %v2694_v38  ;;  %v2696_v35 = vpop.f32.mrf.mxu1 }
 0x39a   : > { %v2940_v2 = vmul.f32 %v2784_v58, %v5240_v43  ;;  %v3217_v23 = vshra.s32 %v3073_v0, 4  ;;  %v3105_v1 = vand.u32 15, %v3073_v0  ;;  %v4318_v58 = vadd.s32 4294967288, %v3216_v17 }
 0x39b   : > { %v2941_v22 = vmul.f32 %v2873_v39, %v5240_v43 }
 0x39c   : > { %3004 = vst [vmem:[%s5015_s8 + $0x620] sm:$0xff] %v2940_v2  ;;  %v4287_v2 = vadd.s32 4294967288, %v3105_v1  ;;  %v3280_v9 = vcvt.s32.f32 %v4318_v58 }
 0x39d   : > { %3005 = vst [vmem:[%s5015_s8 + $0x628] sm:$0xff] %v2941_v22 }
 0x39f   : > { %v2785_v60 = vpop.f32.mrf.mxu2 }
 0x3a0   : > { %v2786_v13 = vadd.f32 %v2785_v60, %v2607_v57  ;;  %v2874_v34 = vpop.f32.mrf.mxu3  ;;  %v2610_v38 = vpop.f32.mrf.mxu0  ;;  %v4319_v57 = vadd.s32 4294967288, %v3217_v23 }
 0x3a1   : > { %v2875_v28 = vadd.f32 %v2874_v34, %v2696_v35  ;;  %v2699_v55 = vpop.f32.mrf.mxu1  ;;  %v4286_v35 = vadd.s32 4294967288, %v3104_v45  ;;  %v3074_v34 = vand.u32 255, %v3042_v32 }
 0x3a2   : > { %v2942_v46 = vmul.f32 %v2786_v13, %v5251_v37  ;;  %v3281_v21 = vcvt.s32.f32 %v4319_v57 }
 0x3a3   : > { %v2943_v44 = vmul.f32 %v2875_v28, %v5251_v37  ;;  %3349 = vmatmul.bf16.gmra.mxu0 %v3305_v49  ;;  %v3168_v60 = vcvt.s32.f32 %v4286_v35  ;;  %v3218_v45 = vshra.s32 %v3074_v34, 4  ;;  %v3106_v58 = vand.u32 15, %v3074_v34 }
 0x3a4   : > { %3006 = vst [vmem:[%s5015_s8 + $0x660] sm:$0xff] %v2942_v46  ;;  %3438 = vmatmul.bf16.gmra.mxu1 %v3305_v49  ;;  %3527 = vmatmul.bf16.gmra.mxu2 %v3193_v31  ;;  %v3169_v49 = vcvt.s32.f32 %v4287_v2  ;;  %v3306_v13 = vpack.c.bf16 %v3281_v21, %v3280_v9 }
 0x3a5   : > { %3007 = vst [vmem:[%s5015_s8 + $0x668] sm:$0xff] %v2943_v44  ;;  %3616 = vmatmul.bf16.gmra.mxu3 %v3193_v31 }
 0x3a6   : > { %v3194_v46 = vpack.c.bf16 %v3169_v49, %v3168_v60 }
 0x3a7   : > { %v2788_v62 = vpop.f32.mrf.mxu2 }
 0x3a8   : > { %v2789_v12 = vadd.f32 %v2788_v62, %v2610_v38  ;;  %v2877_v52 = vpop.f32.mrf.mxu3  ;;  %v2612_v39 = vpop.f32.mrf.mxu0  ;;  %v3075_v38 = vand.u32 255, %v3043_v63 }
 0x3a9   : > { %v2878_v41 = vadd.f32 %v2877_v52, %v2699_v55  ;;  %v2701_v22 = vpop.f32.mrf.mxu1 }
 0x3aa   : > { %v2944_v47 = vmul.f32 %v2789_v12, %v5257_v4  ;;  %v3219_v1 = vshra.s32 %v3075_v38, 4  ;;  %v3107_v62 = vand.u32 15, %v3075_v38  ;;  %v4320_v12 = vadd.s32 4294967288, %v3218_v45 }
 0x3ab   : > { %v2945_v56 = vmul.f32 %v2878_v41, %v5257_v4 }
 0x3ac   : > { %3008 = vst [vmem:[%s5015_s8 + $0x6a0] sm:$0xff] %v2944_v47  ;;  %v4321_v52 = vadd.s32 4294967288, %v3219_v1  ;;  %v4289_v47 = vadd.s32 4294967288, %v3107_v62  ;;  %v3282_v60 = vcvt.s32.f32 %v4320_v12 }
 0x3ad   : > { %3009 = vst [vmem:[%s5015_s8 + $0x6a8] sm:$0xff] %v2945_v56 }
 0x3ae   : > { %v3283_v49 = vcvt.s32.f32 %v4321_v52  ;;  %v3171_v34 = vcvt.s32.f32 %v4289_v47 }
 0x3af   : > { %v2790_v0 = vpop.f32.mrf.mxu2 }
 0x3b0   : > { %v2791_v31 = vadd.f32 %v2790_v0, %v2612_v39  ;;  %v2879_v28 = vpop.f32.mrf.mxu3  ;;  %v2615_v55 = vpop.f32.mrf.mxu0  ;;  %v5648_v39 = vld [vmem:[%s4793_s6 + $0x98] sm:$0xff] }
 0x3b1   : > { %v2880_v17 = vadd.f32 %v2879_v28, %v2701_v22  ;;  %v2704_v44 = vpop.f32.mrf.mxu1  ;;  %v4288_v22 = vadd.s32 4294967288, %v3106_v58  ;;  %v3044_v32 = vunpack.c.0.s8 %v5648_v39  ;;  %v3045_v0 = vunpack.c.1.s8 %v5648_v39 }
 0x3b2   : > { %v2946_v23 = vmul.f32 %v2791_v31, %v5265_v18  ;;  %v3307_v28 = vpack.c.bf16 %v3283_v49, %v3282_v60 }
 0x3b3   : > { %v2947_v3 = vmul.f32 %v2880_v17, %v5265_v18  ;;  %3354 = vmatmul.bf16.gmra.mxu0 %v3306_v13  ;;  %v3076_v38 = vand.u32 255, %v3044_v32 }
 0x3b4   : > { %3010 = vst [vmem:[%s5015_s8 + $0x6e0] sm:$0xff] %v2946_v23  ;;  %3443 = vmatmul.bf16.gmra.mxu1 %v3306_v13  ;;  %3532 = vmatmul.bf16.gmra.mxu2 %v3194_v46  ;;  %v3170_v13 = vcvt.s32.f32 %v4288_v22 }
 0x3b5   : > { %3011 = vst [vmem:[%s5015_s8 + $0x6e8] sm:$0xff] %v2947_v3  ;;  %3621 = vmatmul.bf16.gmra.mxu3 %v3194_v46  ;;  %v3220_v58 = vshra.s32 %v3076_v38, 4  ;;  %v3108_v12 = vand.u32 15, %v3076_v38  ;;  %v3047_v38 = vunpack.c.3.s8 %v5648_v39 }
 0x3b6   : > { %v3195_v23 = vpack.c.bf16 %v3171_v34, %v3170_v13  ;;  %v3046_v34 = vunpack.c.2.s8 %v5648_v39 }
 0x3b7   : > { %v2793_v57 = vpop.f32.mrf.mxu2 }
 0x3b8   : > { %v2794_v35 = vadd.f32 %v2793_v57, %v2615_v55  ;;  %v2882_v2 = vpop.f32.mrf.mxu3  ;;  %v2617_v41 = vpop.f32.mrf.mxu0  ;;  %v3077_v55 = vand.u32 255, %v3045_v0 }
 0x3b9   : > { %v2883_v9 = vadd.f32 %v2882_v2, %v2704_v44  ;;  %v2706_v56 = vpop.f32.mrf.mxu1 }
 0x3ba   : > { %v2948_v21 = vmul.f32 %v2794_v35, %v5271_v15  ;;  %v3221_v57 = vshra.s32 %v3077_v55, 4  ;;  %v3109_v52 = vand.u32 15, %v3077_v55  ;;  %v4322_v35 = vadd.s32 4294967288, %v3220_v58 }
 0x3bb   : > { %v2949_v63 = vmul.f32 %v2883_v9, %v5271_v15 }
 0x3bc   : > { %3012 = vst [vmem:[%s5015_s8 + $0x720] sm:$0xff] %v2948_v21  ;;  %v4291_v21 = vadd.s32 4294967288, %v3109_v52  ;;  %v3284_v49 = vcvt.s32.f32 %v4322_v35 }
 0x3bd   : > { %3013 = vst [vmem:[%s5015_s8 + $0x728] sm:$0xff] %v2949_v63 }
 0x3bf   : > { %v2795_v31 = vpop.f32.mrf.mxu2 }
 0x3c0   : > { %v2796_v46 = vadd.f32 %v2795_v31, %v2617_v41  ;;  %v2884_v17 = vpop.f32.mrf.mxu3  ;;  %v2620_v44 = vpop.f32.mrf.mxu0  ;;  %v4323_v41 = vadd.s32 4294967288, %v3221_v57 }
 0x3c1   : > { %v2885_v3 = vadd.f32 %v2884_v17, %v2706_v56  ;;  %v2709_v45 = vpop.f32.mrf.mxu1  ;;  %v4290_v56 = vadd.s32 4294967288, %v3108_v12  ;;  %v3078_v17 = vand.u32 255, %v3046_v34 }
 0x3c2   : > { %v2950_v1 = vmul.f32 %v2796_v46, %v5282_v8  ;;  %v3285_v13 = vcvt.s32.f32 %v4323_v41 }
 0x3c3   : > { %v2951_v62 = vmul.f32 %v2885_v3, %v5282_v8  ;;  %3359 = vmatmul.bf16.gmra.mxu0 %v3307_v28  ;;  %v3172_v31 = vcvt.s32.f32 %v4290_v56  ;;  %v3222_v12 = vshra.s32 %v3078_v17, 4  ;;  %v3110_v35 = vand.u32 15, %v3078_v17 }
 0x3c4   : > { %3014 = vst [vmem:[%s5015_s8 + $0x760] sm:$0xff] %v2950_v1  ;;  %3448 = vmatmul.bf16.gmra.mxu1 %v3307_v28  ;;  %3537 = vmatmul.bf16.gmra.mxu2 %v3195_v23  ;;  %v3173_v28 = vcvt.s32.f32 %v4291_v21  ;;  %v3308_v46 = vpack.c.bf16 %v3285_v13, %v3284_v49 }
 0x3c5   : > { %3015 = vst [vmem:[%s5015_s8 + $0x768] sm:$0xff] %v2951_v62  ;;  %3626 = vmatmul.bf16.gmra.mxu3 %v3195_v23 }
 0x3c6   : > { %v3196_v1 = vpack.c.bf16 %v3173_v28, %v3172_v31 }
 0x3c7   : > { %v2798_v2 = vpop.f32.mrf.mxu2 }
 0x3c8   : > { %v2799_v22 = vadd.f32 %v2798_v2, %v2620_v44  ;;  %v2887_v47 = vpop.f32.mrf.mxu3  ;;  %v2622_v9 = vpop.f32.mrf.mxu0  ;;  %v3079_v44 = vand.u32 255, %v3047_v38 }
 0x3c9   : > { %v2888_v32 = vadd.f32 %v2887_v47, %v2709_v45  ;;  %v2711_v63 = vpop.f32.mrf.mxu1 }
 0x3ca   : > { %v2952_v60 = vmul.f32 %v2799_v22, %v5288_v16  ;;  %v3223_v52 = vshra.s32 %v3079_v44, 4  ;;  %v3111_v2 = vand.u32 15, %v3079_v44  ;;  %v4324_v22 = vadd.s32 4294967288, %v3222_v12 }
 0x3cb   : > { %v2953_v0 = vmul.f32 %v2888_v32, %v5288_v16 }
 0x3cc   : > { %3016 = vst [vmem:[%s5015_s8 + $0x7a0] sm:$0xff] %v2952_v60  ;;  %v4325_v47 = vadd.s32 4294967288, %v3223_v52  ;;  %v4293_v60 = vadd.s32 4294967288, %v3111_v2  ;;  %v3286_v31 = vcvt.s32.f32 %v4324_v22 }
 0x3cd   : > { %3017 = vst [vmem:[%s5015_s8 + $0x7a8] sm:$0xff] %v2953_v0 }
 0x3ce   : > { %v3287_v28 = vcvt.s32.f32 %v4325_v47  ;;  %v3175_v17 = vcvt.s32.f32 %v4293_v60 }
 0x3cf   : > { %v2800_v55 = vpop.f32.mrf.mxu2 }
 0x3d0   : > { %v2801_v23 = vadd.f32 %v2800_v55, %v2622_v9  ;;  %v2889_v3 = vpop.f32.mrf.mxu3  ;;  %v3325_v45 = vpop.f32.mrf.mxu0  ;;  %v5671_v9 = vld [vmem:[%s4793_s6 + $0xb8] sm:$0xff] }
 0x3d1   : > { %v2890_v58 = vadd.f32 %v2889_v3, %v2711_v63  ;;  %v3414_v62 = vpop.f32.mrf.mxu1  ;;  %v4292_v63 = vadd.s32 4294967288, %v3110_v35  ;;  %v3048_v34 = vunpack.c.0.s8 %v5671_v9  ;;  %v3049_v55 = vunpack.c.1.s8 %v5671_v9 }
 0x3d2   : > { %v2954_v57 = vmul.f32 %v2801_v23, %v5296_v14  ;;  %v3309_v3 = vpack.c.bf16 %v3287_v28, %v3286_v31 }
 0x3d3   : > { %v2955_v39 = vmul.f32 %v2890_v58, %v5296_v14  ;;  %3364 = vmatmul.bf16.gmra.mxu0 %v3308_v46  ;;  %v3080_v44 = vand.u32 255, %v3048_v34 }
 0x3d4   : > { %3018 = vst [vmem:[%s5015_s8 + $0x7e0] sm:$0xff] %v2954_v57  ;;  %3453 = vmatmul.bf16.gmra.mxu1 %v3308_v46  ;;  %3542 = vmatmul.bf16.gmra.mxu2 %v3196_v1  ;;  %v3174_v46 = vcvt.s32.f32 %v4292_v63 }
 0x3d5   : > { %3019 = vst [vmem:[%s5015_s8 + $0x7e8] sm:$0xff] %v2955_v39  ;;  %3631 = vmatmul.bf16.gmra.mxu3 %v3196_v1  ;;  %v3224_v52 = vshra.s32 %v3080_v44, 4 }
 0x3d6   : > { %v3197_v57 = vpack.c.bf16 %v3175_v17, %v3174_v46  ;;  %v3051_v46 = vunpack.c.3.s8 %v5671_v9 }
 0x3d7   : > { %v3503_v41 = vpop.f32.mrf.mxu2  ;;  %v4326_v47 = vadd.s32 4294967288, %v3224_v52 }
 0x3d8   : > { %v3504_v56 = vadd.f32 %v3503_v41, %v3325_v45  ;;  %v3592_v21 = vpop.f32.mrf.mxu3  ;;  %v3327_v32 = vpop.f32.mrf.mxu0  ;;  %v3081_v45 = vand.u32 255, %v3049_v55  ;;  %v3112_v41 = vand.u32 15, %v3080_v44  ;;  %v3050_v55 = vunpack.c.2.s8 %v5671_v9 }
 0x3d9   : > { %v3593_v49 = vadd.f32 %v3592_v21, %v3414_v62  ;;  %v3416_v0 = vpop.f32.mrf.mxu1 }
 0x3da   : > { %v3672_v13 = vmul.f32 %v3504_v56, %v5004_v42  ;;  %v3225_v2 = vshra.s32 %v3081_v45, 4  ;;  %v3113_v22 = vand.u32 15, %v3081_v45  ;;  %v3082_v45 = vand.u32 255, %v3050_v55 }
 0x3db   : > { %v3673_v38 = vmul.f32 %v3593_v49, %v5004_v42  ;;  %v4294_v49 = vadd.s32 4294967288, %v3112_v41 }
 0x3dc   : > { %3736 = vst [vmem:[%s5015_s8 + $0x30] sm:$0xff] %v3672_v13  ;;  %v4327_v21 = vadd.s32 4294967288, %v3225_v2  ;;  %v3226_v52 = vshra.s32 %v3082_v45, 4  ;;  %v3114_v2 = vand.u32 15, %v3082_v45 }
 0x3dd   : > { %3737 = vst [vmem:[%s5015_s8 + $0x38] sm:$0xff] %v3673_v38  ;;  %v3288_v38 = vcvt.s32.f32 %v4326_v47  ;;  %v3176_v17 = vcvt.s32.f32 %v4294_v49 }
 0x3de   : > { %v3289_v28 = vcvt.s32.f32 %v4327_v21  ;;  %v4328_v47 = vadd.s32 4294967288, %v3226_v52  ;;  %v5694_v21 = vld [vmem:[%s4793_s6 + $0xd8] sm:$0xff] }
 0x3df   : > { %v3505_v23 = vpop.f32.mrf.mxu2  ;;  %v3053_v55 = vunpack.c.1.s8 %v5694_v21 }
 0x3e0   : > { %v3506_v1 = vadd.f32 %v3505_v23, %v3327_v32  ;;  %v3594_v58 = vpop.f32.mrf.mxu3  ;;  %v3330_v62 = vpop.f32.mrf.mxu0 }
 0x3e1   : > { %v3595_v39 = vadd.f32 %v3594_v58, %v3416_v0  ;;  %v3419_v42 = vpop.f32.mrf.mxu1  ;;  %v4295_v0 = vadd.s32 4294967288, %v3113_v22  ;;  %v3085_v45 = vand.u32 255, %v3053_v55 }
 0x3e2   : > { %v3674_v12 = vmul.f32 %v3506_v1, %v5019_v19  ;;  %v3083_v1 = vand.u32 255, %v3051_v46 }
 0x3e3   : > { %v3675_v35 = vmul.f32 %v3595_v39, %v5019_v19  ;;  %3369 = vmatmul.bf16.gmra.mxu0 %v3309_v3  ;;  %v3177_v44 = vcvt.s32.f32 %v4295_v0 }
 0x3e4   : > { %3738 = vst [vmem:[%s5015_s8 + $0x70] sm:$0xff] %v3674_v12  ;;  %3458 = vmatmul.bf16.gmra.mxu1 %v3309_v3  ;;  %3547 = vmatmul.bf16.gmra.mxu2 %v3197_v57  ;;  %v3310_v3 = vpack.c.bf16 %v3289_v28, %v3288_v38  ;;  %v3115_v41 = vand.u32 15, %v3083_v1 }
 0x3e5   : > { %3739 = vst [vmem:[%s5015_s8 + $0x78] sm:$0xff] %v3675_v35  ;;  %3636 = vmatmul.bf16.gmra.mxu3 %v3197_v57  ;;  %v3198_v39 = vpack.c.bf16 %v3177_v44, %v3176_v17  ;;  %v3227_v35 = vshra.s32 %v3083_v1, 4 }
 0x3e6   : > { %v4297_v49 = vadd.s32 4294967288, %v3115_v41 }
 0x3e7   : > { %v3508_v56 = vpop.f32.mrf.mxu2 }
 0x3e8   : > { %v3509_v32 = vadd.f32 %v3508_v56, %v3330_v62  ;;  %v3597_v63 = vpop.f32.mrf.mxu3  ;;  %v3332_v60 = vpop.f32.mrf.mxu0  ;;  %v4329_v56 = vadd.s32 4294967288, %v3227_v35  ;;  %v3179_v17 = vcvt.s32.f32 %v4297_v49  ;;  %v3117_v35 = vand.u32 15, %v3085_v45 }
 0x3e9   : > { %v3598_v19 = vadd.f32 %v3597_v63, %v3419_v42  ;;  %v3421_v13 = vpop.f32.mrf.mxu1 }
 0x3ea   : > { %v3676_v34 = vmul.f32 %v3509_v32, %v5026_v59  ;;  %v3291_v28 = vcvt.s32.f32 %v4329_v56 }
 0x3eb   : > { %v3677_v31 = vmul.f32 %v3598_v19, %v5026_v59 }
 0x3ec   : > { %3740 = vst [vmem:[%s5015_s8 + $0xb0] sm:$0xff] %v3676_v34  ;;  %v3052_v34 = vunpack.c.0.s8 %v5694_v21 }
 0x3ed   : > { %3741 = vst [vmem:[%s5015_s8 + $0xb8] sm:$0xff] %v3677_v31  ;;  %v3290_v31 = vcvt.s32.f32 %v4328_v47 }
 0x3ee   : > { %v3084_v44 = vand.u32 255, %v3052_v34  ;;  %v3054_v34 = vunpack.c.2.s8 %v5694_v21 }
 0x3ef   : > { %v3510_v23 = vpop.f32.mrf.mxu2 }
 0x3f0   : > { %v3511_v58 = vadd.f32 %v3510_v23, %v3332_v60  ;;  %v3599_v62 = vpop.f32.mrf.mxu3  ;;  %v3335_v57 = vpop.f32.mrf.mxu0  ;;  %v4296_v60 = vadd.s32 4294967288, %v3114_v2  ;;  %v3116_v52 = vand.u32 15, %v3084_v44 }
 0x3f1   : > { %v3600_v59 = vadd.f32 %v3599_v62, %v3421_v13  ;;  %v3424_v42 = vpop.f32.mrf.mxu1 }
 0x3f2   : > { %v3678_v12 = vmul.f32 %v3511_v58, %v5035_v30  ;;  %v3178_v46 = vcvt.s32.f32 %v4296_v60 }
 0x3f3   : > { %v3679_v9 = vmul.f32 %v3600_v59, %v5035_v30  ;;  %3374 = vmatmul.bf16.gmra.mxu0 %v3310_v3 }
 0x3f4   : > { %3742 = vst [vmem:[%s5015_s8 + $0xf0] sm:$0xff] %v3678_v12  ;;  %3463 = vmatmul.bf16.gmra.mxu1 %v3310_v3  ;;  %3552 = vmatmul.bf16.gmra.mxu2 %v3198_v39  ;;  %v3311_v3 = vpack.c.bf16 %v3291_v28, %v3290_v31 }
 0x3f5   : > { %3743 = vst [vmem:[%s5015_s8 + $0xf8] sm:$0xff] %v3679_v9  ;;  %3641 = vmatmul.bf16.gmra.mxu3 %v3198_v39  ;;  %v3229_v9 = vshra.s32 %v3085_v45, 4 }
 0x3f7   : > { %v3513_v22 = vpop.f32.mrf.mxu2 }
 0x3f8   : > { %v3514_v32 = vadd.f32 %v3513_v22, %v3335_v57  ;;  %v3602_v63 = vpop.f32.mrf.mxu3  ;;  %v3337_v30 = vpop.f32.mrf.mxu0  ;;  %v3199_v57 = vpack.c.bf16 %v3179_v17, %v3178_v46  ;;  %v4331_v22 = vadd.s32 4294967288, %v3229_v9  ;;  %v3086_v17 = vand.u32 255, %v3054_v34 }
 0x3f9   : > { %v3603_v0 = vadd.f32 %v3602_v63, %v3424_v42  ;;  %v3426_v19 = vpop.f32.mrf.mxu1  ;;  %v3228_v42 = vshra.s32 %v3084_v44, 4  ;;  %v4298_v63 = vadd.s32 4294967288, %v3116_v52  ;;  %v5717_v52 = vld [vmem:[%s4793_s6 + $0xf8] sm:$0xff] }
 0x3fa   : > { %v3680_v13 = vmul.f32 %v3514_v32, %v5042_v20 }
 0x3fb   : > { %v3681_v38 = vmul.f32 %v3603_v0, %v5042_v20  ;;  %v4330_v2 = vadd.s32 4294967288, %v3228_v42  ;;  %v3180_v31 = vcvt.s32.f32 %v4298_v63  ;;  %v3056_v63 = vunpack.c.0.s8 %v5717_v52 }
 0x3fc   : > { %3744 = vst [vmem:[%s5015_s8 + $0x130] sm:$0xff] %v3680_v13  ;;  %v3293_v13 = vcvt.s32.f32 %v4331_v22 }
 0x3fd   : > { %3745 = vst [vmem:[%s5015_s8 + $0x138] sm:$0xff] %v3681_v38  ;;  %v3292_v0 = vcvt.s32.f32 %v4330_v2  ;;  %v3055_v38 = vunpack.c.3.s8 %v5694_v21 }
 0x3ff   : > { %v3515_v23 = vpop.f32.mrf.mxu2  ;;  %v3312_v46 = vpack.c.bf16 %v3293_v13, %v3292_v0  ;;  %v3087_v44 = vand.u32 255, %v3055_v38  ;;  %v3088_v13 = vand.u32 255, %v3056_v63 }
 0x400   : > { %v3516_v1 = vadd.f32 %v3515_v23, %v3337_v30  ;;  %v3604_v58 = vpop.f32.mrf.mxu3  ;;  %v3340_v62 = vpop.f32.mrf.mxu0  ;;  %v4299_v30 = vadd.s32 4294967288, %v3117_v35 }
 0x401   : > { %v3605_v39 = vadd.f32 %v3604_v58, %v3426_v19  ;;  %v3429_v20 = vpop.f32.mrf.mxu1 }
 0x402   : > { %v3682_v59 = vmul.f32 %v3516_v1, %v5054_v6  ;;  %v3181_v28 = vcvt.s32.f32 %v4299_v30 }
 0x403   : > { %v3683_v12 = vmul.f32 %v3605_v39, %v5054_v6  ;;  %3379 = vmatmul.bf16.gmra.mxu0 %v3311_v3  ;;  %v3231_v39 = vshra.s32 %v3087_v44, 4 }
 0x404   : > { %3746 = vst [vmem:[%s5015_s8 + $0x170] sm:$0xff] %v3682_v59  ;;  %3468 = vmatmul.bf16.gmra.mxu1 %v3311_v3  ;;  %3557 = vmatmul.bf16.gmra.mxu2 %v3199_v57  ;;  %v3200_v1 = vpack.c.bf16 %v3181_v28, %v3180_v31  ;;  %v3119_v59 = vand.u32 15, %v3087_v44 }
 0x405   : > { %3747 = vst [vmem:[%s5015_s8 + $0x178] sm:$0xff] %v3683_v12  ;;  %3646 = vmatmul.bf16.gmra.mxu3 %v3199_v57  ;;  %v3230_v57 = vshra.s32 %v3086_v17, 4  ;;  %v4333_v9 = vadd.s32 4294967288, %v3231_v39 }
 0x406   : > { %v4301_v22 = vadd.s32 4294967288, %v3119_v59 }
 0x407   : > { %v3518_v41 = vpop.f32.mrf.mxu2  ;;  %v4332_v12 = vadd.s32 4294967288, %v3230_v57 }
 0x408   : > { %v3519_v47 = vadd.f32 %v3518_v41, %v3340_v62  ;;  %v3607_v56 = vpop.f32.mrf.mxu3  ;;  %v3342_v32 = vpop.f32.mrf.mxu0 }
 0x409   : > { %v3608_v6 = vadd.f32 %v3607_v56, %v3429_v20  ;;  %v3431_v60 = vpop.f32.mrf.mxu1  ;;  %v3118_v20 = vand.u32 15, %v3086_v17 }
 0x40a   : > { %v3684_v49 = vmul.f32 %v3519_v47, %v5061_v53 }
 0x40b   : > { %v3685_v19 = vmul.f32 %v3608_v6, %v5061_v53  ;;  %v4300_v41 = vadd.s32 4294967288, %v3118_v20  ;;  %v3294_v6 = vcvt.s32.f32 %v4332_v12 }
 0x40c   : > { %3748 = vst [vmem:[%s5015_s8 + $0x1b0] sm:$0xff] %v3684_v49  ;;  %v3057_v49 = vunpack.c.1.s8 %v5717_v52 }
 0x40d   : > { %3749 = vst [vmem:[%s5015_s8 + $0x1b8] sm:$0xff] %v3685_v19  ;;  %v3182_v0 = vcvt.s32.f32 %v4300_v41  ;;  %v3183_v19 = vcvt.s32.f32 %v4301_v22  ;;  %v3058_v22 = vunpack.c.2.s8 %v5717_v52 }
 0x40e   : > { %v3089_v31 = vand.u32 255, %v3057_v49 }
 0x40f   : > { %v3520_v55 = vpop.f32.mrf.mxu2  ;;  %v3201_v17 = vpack.c.bf16 %v3183_v19, %v3182_v0 }
 0x410   : > { %v3521_v23 = vadd.f32 %v3520_v55, %v3342_v32  ;;  %v3609_v3 = vpop.f32.mrf.mxu3  ;;  %v3345_v45 = vpop.f32.mrf.mxu0 }
 0x411   : > { %v3610_v53 = vadd.f32 %v3609_v3, %v3431_v60  ;;  %v3434_v58 = vpop.f32.mrf.mxu1  ;;  %v3295_v60 = vcvt.s32.f32 %v4333_v9  ;;  %v3232_v3 = vshra.s32 %v3088_v13, 4 }
 0x412   : > { %v3686_v62 = vmul.f32 %v3521_v23, %v5896_v33 }
 0x413   : > { %v3687_v21 = vmul.f32 %v3610_v53, %v5896_v33  ;;  %3384 = vmatmul.bf16.gmra.mxu0 %v3312_v46  ;;  %v3313_v38 = vpack.c.bf16 %v3295_v60, %v3294_v6  ;;  %v3120_v53 = vand.u32 15, %v3088_v13  ;;  %v3090_v6 = vand.u32 255, %v3058_v22 }
 0x414   : > { %3750 = vst [vmem:[%s5015_s8 + $0x1f0] sm:$0xff] %v3686_v62  ;;  %3473 = vmatmul.bf16.gmra.mxu1 %v3312_v46  ;;  %3562 = vmatmul.bf16.gmra.mxu2 %v3200_v1  ;;  %v4334_v62 = vadd.s32 4294967288, %v3232_v3 }
 0x415   : > { %3751 = vst [vmem:[%s5015_s8 + $0x1f8] sm:$0xff] %v3687_v21  ;;  %3651 = vmatmul.bf16.gmra.mxu3 %v3200_v1  ;;  %v3233_v1 = vshra.s32 %v3089_v31, 4 }
 0x417   : > { %v3523_v42 = vpop.f32.mrf.mxu2  ;;  %v4335_v57 = vadd.s32 4294967288, %v3233_v1 }
 0x418   : > { %v3524_v35 = vadd.f32 %v3523_v42, %v3345_v45  ;;  %v3612_v2 = vpop.f32.mrf.mxu3  ;;  %v3347_v33 = vpop.f32.mrf.mxu0  ;;  %v4302_v42 = vadd.s32 4294967288, %v3120_v53 }
 0x419   : > { %v3613_v47 = vadd.f32 %v3612_v2, %v3434_v58  ;;  %v3436_v56 = vpop.f32.mrf.mxu1  ;;  %v3121_v58 = vand.u32 15, %v3089_v31  ;;  %v3296_v2 = vcvt.s32.f32 %v4334_v62  ;;  %v3297_v41 = vcvt.s32.f32 %v4335_v57 }
 0x41a   : > { %v3688_v32 = vmul.f32 %v3524_v35, %v5897_v5  ;;  %v3234_v31 = vshra.s32 %v3090_v6, 4 }
 0x41b   : > { %v3689_v30 = vmul.f32 %v3613_v47, %v5897_v5  ;;  %v4303_v12 = vadd.s32 4294967288, %v3121_v58  ;;  %v3059_v47 = vunpack.c.3.s8 %v5717_v52 }
 0x41c   : > { %3752 = vst [vmem:[%s5015_s8 + $0x230] sm:$0xff] %v3688_v32 }
 0x41d   : > { %3753 = vst [vmem:[%s5015_s8 + $0x238] sm:$0xff] %v3689_v30  ;;  %v3185_v32 = vcvt.s32.f32 %v4303_v12  ;;  %v3314_v30 = vpack.c.bf16 %v3297_v41, %v3296_v2  ;;  %v3091_v60 = vand.u32 255, %v3059_v47 }
 0x41f   : > { %v3525_v34 = vpop.f32.mrf.mxu2 }
 0x420   : > { %v3526_v28 = vadd.f32 %v3525_v34, %v3347_v33  ;;  %v3614_v55 = vpop.f32.mrf.mxu3  ;;  %v3350_v46 = vpop.f32.mrf.mxu0 }
 0x421   : > { %v3615_v44 = vadd.f32 %v3614_v55, %v3436_v56  ;;  %v3439_v5 = vpop.f32.mrf.mxu1  ;;  %v3184_v56 = vcvt.s32.f32 %v4302_v42  ;;  %v3122_v55 = vand.u32 15, %v3090_v6 }
 0x422   : > { %v3690_v23 = vmul.f32 %v3526_v28, %v5898_v29  ;;  %v3235_v28 = vshra.s32 %v3091_v60, 4 }
 0x423   : > { %v3691_v45 = vmul.f32 %v3615_v44, %v5898_v29  ;;  %3389 = vmatmul.bf16.gmra.mxu0 %v3313_v38  ;;  %v3202_v13 = vpack.c.bf16 %v3185_v32, %v3184_v56  ;;  %v4336_v44 = vadd.s32 4294967288, %v3234_v31  ;;  %v4304_v1 = vadd.s32 4294967288, %v3122_v55 }
 0x424   : > { %3754 = vst [vmem:[%s5015_s8 + $0x270] sm:$0xff] %v3690_v23  ;;  %3478 = vmatmul.bf16.gmra.mxu1 %v3313_v38  ;;  %3567 = vmatmul.bf16.gmra.mxu2 %v3201_v17 }
 0x425   : > { %3755 = vst [vmem:[%s5015_s8 + $0x278] sm:$0xff] %v3691_v45  ;;  %3656 = vmatmul.bf16.gmra.mxu3 %v3201_v17  ;;  %v3298_v57 = vcvt.s32.f32 %v4336_v44 }
 0x427   : > { %v3528_v21 = vpop.f32.mrf.mxu2 }
 0x428   : > { %v3529_v39 = vadd.f32 %v3528_v21, %v3350_v46  ;;  %v3617_v20 = vpop.f32.mrf.mxu3  ;;  %v3352_v59 = vpop.f32.mrf.mxu0  ;;  %v3123_v46 = vand.u32 15, %v3091_v60 }
 0x429   : > { %v3618_v29 = vadd.f32 %v3617_v20, %v3439_v5  ;;  %v3441_v9 = vpop.f32.mrf.mxu1  ;;  %v4337_v5 = vadd.s32 4294967288, %v3235_v28  ;;  %v3186_v20 = vcvt.s32.f32 %v4304_v1 }
 0x42a   : > { %v3692_v35 = vmul.f32 %v3529_v39, %v5899_v7 }
 0x42b   : > { %v3693_v33 = vmul.f32 %v3618_v29, %v5899_v7  ;;  %v3299_v39 = vcvt.s32.f32 %v4337_v5 }
 0x42c   : > { %3756 = vst [vmem:[%s5015_s8 + $0x2b0] sm:$0xff] %v3692_v35 }
 0x42d   : > { %3757 = vst [vmem:[%s5015_s8 + $0x2b8] sm:$0xff] %v3693_v33  ;;  %v3315_v12 = vpack.c.bf16 %v3299_v39, %v3298_v57 }
 0x42f   : > { %v3530_v63 = vpop.f32.mrf.mxu2 }
 0x430   : > { %v3531_v49 = vadd.f32 %v3530_v63, %v3352_v59  ;;  %v3619_v0 = vpop.f32.mrf.mxu3  ;;  %v3355_v19 = vpop.f32.mrf.mxu0 }
 0x431   : > { %v3620_v7 = vadd.f32 %v3619_v0, %v3441_v9  ;;  %v3444_v34 = vpop.f32.mrf.mxu1 }
 0x432   : > { %v3694_v38 = vmul.f32 %v3531_v49, %v5900_v24 }
 0x433   : > { %v3695_v52 = vmul.f32 %v3620_v7, %v5900_v24  ;;  %3394 = vmatmul.bf16.gmra.mxu0 %v3314_v30  ;;  %v4305_v24 = vadd.s32 4294967288, %v3123_v46 }
 0x434   : > { %3758 = vst [vmem:[%s5015_s8 + $0x2f0] sm:$0xff] %v3694_v38  ;;  %3483 = vmatmul.bf16.gmra.mxu1 %v3314_v30  ;;  %3572 = vmatmul.bf16.gmra.mxu2 %v3202_v13 }
 0x435   : > { %3759 = vst [vmem:[%s5015_s8 + $0x2f8] sm:$0xff] %v3695_v52  ;;  %3661 = vmatmul.bf16.gmra.mxu3 %v3202_v13  ;;  %v3187_v59 = vcvt.s32.f32 %v4305_v24 }
 0x437   : > { %v3533_v17 = vpop.f32.mrf.mxu2  ;;  %v3203_v2 = vpack.c.bf16 %v3187_v59, %v3186_v20 }
 0x438   : > { %v3534_v23 = vadd.f32 %v3533_v17, %v3355_v19  ;;  %v3622_v3 = vpop.f32.mrf.mxu3  ;;  %v3357_v45 = vpop.f32.mrf.mxu0 }
 0x439   : > { %v3623_v53 = vadd.f32 %v3622_v3, %v3444_v34  ;;  %v3446_v58 = vpop.f32.mrf.mxu1 }
 0x43a   : > { %v3696_v62 = vmul.f32 %v3534_v23, %v5901_v40 }
 0x43b   : > { %v3697_v21 = vmul.f32 %v3623_v53, %v5901_v40 }
 0x43c   : > { %3760 = vst [vmem:[%s5015_s8 + $0x330] sm:$0xff] %v3696_v62 }
 0x43d   : > { %3761 = vst [vmem:[%s5015_s8 + $0x338] sm:$0xff] %v3697_v21 }
 0x43f   : > { %v3535_v42 = vpop.f32.mrf.mxu2 }
 0x440   : > { %v3536_v29 = vadd.f32 %v3535_v42, %v3357_v45  ;;  %v3624_v9 = vpop.f32.mrf.mxu3  ;;  %v3360_v35 = vpop.f32.mrf.mxu0 }
 0x441   : > { %v3625_v33 = vadd.f32 %v3624_v9, %v3446_v58  ;;  %v3449_v41 = vpop.f32.mrf.mxu1 }
 0x442   : > { %v3698_v22 = vmul.f32 %v3536_v29, %v5124_v51 }
 0x443   : > { %v3699_v40 = vmul.f32 %v3625_v33, %v5124_v51  ;;  %3399 = vmatmul.bf16.gmra.mxu0 %v3315_v12 }
 0x444   : > { %3762 = vst [vmem:[%s5015_s8 + $0x370] sm:$0xff] %v3698_v22  ;;  %3488 = vmatmul.bf16.gmra.mxu1 %v3315_v12  ;;  %3577 = vmatmul.bf16.gmra.mxu2 %v3203_v2 }
 0x445   : > { %3763 = vst [vmem:[%s5015_s8 + $0x378] sm:$0xff] %v3699_v40  ;;  %3666 = vmatmul.bf16.gmra.mxu3 %v3203_v2 }
 0x447   : > { %v3538_v47 = vpop.f32.mrf.mxu2 }
 0x448   : > { %v3539_v56 = vadd.f32 %v3538_v47, %v3360_v35  ;;  %v3627_v32 = vpop.f32.mrf.mxu3  ;;  %v3362_v63 = vpop.f32.mrf.mxu0 }
 0x449   : > { %v3628_v30 = vadd.f32 %v3627_v32, %v3449_v41  ;;  %v3451_v6 = vpop.f32.mrf.mxu1 }
 0x44a   : > { %v3700_v60 = vmul.f32 %v3539_v56, %v5902_v27 }
 0x44b   : > { %v3701_v49 = vmul.f32 %v3628_v30, %v5902_v27 }
 0x44c   : > { %3764 = vst [vmem:[%s5015_s8 + $0x3b0] sm:$0xff] %v3700_v60 }
 0x44d   : > { %3765 = vst [vmem:[%s5015_s8 + $0x3b8] sm:$0xff] %v3701_v49 }
 0x44f   : > { %v3540_v51 = vpop.f32.mrf.mxu2 }
 0x450   : > { %v3541_v0 = vadd.f32 %v3540_v51, %v3362_v63  ;;  %v3629_v19 = vpop.f32.mrf.mxu3  ;;  %v3365_v13 = vpop.f32.mrf.mxu0 }
 0x451   : > { %v3630_v7 = vadd.f32 %v3629_v19, %v3451_v6  ;;  %v3454_v34 = vpop.f32.mrf.mxu1 }
 0x452   : > { %v3702_v38 = vmul.f32 %v3541_v0, %v5140_v36 }
 0x453   : > { %v3703_v52 = vmul.f32 %v3630_v7, %v5140_v36 }
 0x454   : > { %3766 = vst [vmem:[%s5015_s8 + $0x3f0] sm:$0xff] %v3702_v38 }
 0x455   : > { %3767 = vst [vmem:[%s5015_s8 + $0x3f8] sm:$0xff] %v3703_v52 }
 0x457   : > { %v3543_v31 = vpop.f32.mrf.mxu2 }
 0x458   : > { %v3544_v28 = vadd.f32 %v3543_v31, %v3365_v13  ;;  %v3632_v55 = vpop.f32.mrf.mxu3  ;;  %v3367_v27 = vpop.f32.mrf.mxu0 }
 0x459   : > { %v3633_v46 = vadd.f32 %v3632_v55, %v3454_v34  ;;  %v3456_v17 = vpop.f32.mrf.mxu1 }
 0x45a   : > { %v3704_v44 = vmul.f32 %v3544_v28, %v5149_v54 }
 0x45b   : > { %v3705_v5 = vmul.f32 %v3633_v46, %v5149_v54 }
 0x45c   : > { %3768 = vst [vmem:[%s5015_s8 + $0x430] sm:$0xff] %v3704_v44 }
 0x45d   : > { %3769 = vst [vmem:[%s5015_s8 + $0x438] sm:$0xff] %v3705_v5 }
 0x45f   : > { %v3545_v23 = vpop.f32.mrf.mxu2 }
 0x460   : > { %v3546_v3 = vadd.f32 %v3545_v23, %v3367_v27  ;;  %v3634_v45 = vpop.f32.mrf.mxu3  ;;  %v3370_v36 = vpop.f32.mrf.mxu0 }
 0x461   : > { %v3635_v1 = vadd.f32 %v3634_v45, %v3456_v17  ;;  %v3459_v24 = vpop.f32.mrf.mxu1 }
 0x462   : > { %v3706_v53 = vmul.f32 %v3546_v3, %v5168_v25 }
 0x463   : > { %v3707_v58 = vmul.f32 %v3635_v1, %v5168_v25 }
 0x464   : > { %3770 = vst [vmem:[%s5015_s8 + $0x470] sm:$0xff] %v3706_v53 }
 0x465   : > { %3771 = vst [vmem:[%s5015_s8 + $0x478] sm:$0xff] %v3707_v58 }
 0x467   : > { %v3548_v62 = vpop.f32.mrf.mxu2 }
 0x468   : > { %v3549_v21 = vadd.f32 %v3548_v62, %v3370_v36  ;;  %v3637_v57 = vpop.f32.mrf.mxu3  ;;  %v3372_v54 = vpop.f32.mrf.mxu0 }
 0x469   : > { %v3638_v39 = vadd.f32 %v3637_v57, %v3459_v24  ;;  %v3461_v20 = vpop.f32.mrf.mxu1 }
 0x46a   : > { %v3708_v59 = vmul.f32 %v3549_v21, %v5182_v50 }
 0x46b   : > { %v3709_v42 = vmul.f32 %v3638_v39, %v5182_v50 }
 0x46c   : > { %3772 = vst [vmem:[%s5015_s8 + $0x4b0] sm:$0xff] %v3708_v59 }
 0x46d   : > { %3773 = vst [vmem:[%s5015_s8 + $0x4b8] sm:$0xff] %v3709_v42 }
 0x46f   : > { %v3550_v12 = vpop.f32.mrf.mxu2 }
 0x470   : > { %v3551_v29 = vadd.f32 %v3550_v12, %v3372_v54  ;;  %v3639_v9 = vpop.f32.mrf.mxu3  ;;  %v3375_v25 = vpop.f32.mrf.mxu0 }
 0x471   : > { %v3640_v35 = vadd.f32 %v3639_v9, %v3461_v20  ;;  %v3464_v2 = vpop.f32.mrf.mxu1 }
 0x472   : > { %v3710_v33 = vmul.f32 %v3551_v29, %v5198_v11 }
 0x473   : > { %v3711_v41 = vmul.f32 %v3640_v35, %v5198_v11 }
 0x474   : > { %3774 = vst [vmem:[%s5015_s8 + $0x4f0] sm:$0xff] %v3710_v33 }
 0x475   : > { %3775 = vst [vmem:[%s5015_s8 + $0x4f8] sm:$0xff] %v3711_v41 }
 0x477   : > { %v3553_v22 = vpop.f32.mrf.mxu2 }
 0x478   : > { %v3554_v40 = vadd.f32 %v3553_v22, %v3375_v25  ;;  %v3642_v47 = vpop.f32.mrf.mxu3  ;;  %v3377_v50 = vpop.f32.mrf.mxu0 }
 0x479   : > { %v3643_v56 = vadd.f32 %v3642_v47, %v3464_v2  ;;  %v3466_v32 = vpop.f32.mrf.mxu1 }
 0x47a   : > { %v3712_v63 = vmul.f32 %v3554_v40, %v5209_v48 }
 0x47b   : > { %v3713_v30 = vmul.f32 %v3643_v56, %v5209_v48 }
 0x47c   : > { %3776 = vst [vmem:[%s5015_s8 + $0x530] sm:$0xff] %v3712_v63 }
 0x47d   : > { %3777 = vst [vmem:[%s5015_s8 + $0x538] sm:$0xff] %v3713_v30 }
 0x47f   : > { %v3555_v6 = vpop.f32.mrf.mxu2 }
 0x480   : > { %v3556_v60 = vadd.f32 %v3555_v6, %v3377_v50  ;;  %v3644_v49 = vpop.f32.mrf.mxu3  ;;  %v3380_v11 = vpop.f32.mrf.mxu0 }
 0x481   : > { %v3645_v51 = vadd.f32 %v3644_v49, %v3466_v32  ;;  %v3469_v0 = vpop.f32.mrf.mxu1 }
 0x482   : > { %v3714_v19 = vmul.f32 %v3556_v60, %v5220_v26 }
 0x483   : > { %v3715_v13 = vmul.f32 %v3645_v51, %v5220_v26 }
 0x484   : > { %3778 = vst [vmem:[%s5015_s8 + $0x570] sm:$0xff] %v3714_v19 }
 0x485   : > { %3779 = vst [vmem:[%s5015_s8 + $0x578] sm:$0xff] %v3715_v13 }
 0x487   : > { %v3558_v7 = vpop.f32.mrf.mxu2 }
 0x488   : > { %v3559_v34 = vadd.f32 %v3558_v7, %v3380_v11  ;;  %v3647_v38 = vpop.f32.mrf.mxu3  ;;  %v3382_v48 = vpop.f32.mrf.mxu0 }
 0x489   : > { %v3648_v52 = vadd.f32 %v3647_v38, %v3469_v0  ;;  %v3471_v31 = vpop.f32.mrf.mxu1 }
 0x48a   : > { %v3716_v28 = vmul.f32 %v3559_v34, %v5226_v10 }
 0x48b   : > { %v3717_v55 = vmul.f32 %v3648_v52, %v5226_v10 }
 0x48c   : > { %3780 = vst [vmem:[%s5015_s8 + $0x5b0] sm:$0xff] %v3716_v28 }
 0x48d   : > { %3781 = vst [vmem:[%s5015_s8 + $0x5b8] sm:$0xff] %v3717_v55 }
 0x48f   : > { %v3560_v27 = vpop.f32.mrf.mxu2 }
 0x490   : > { %v3561_v46 = vadd.f32 %v3560_v27, %v3382_v48  ;;  %v3649_v17 = vpop.f32.mrf.mxu3  ;;  %v3385_v26 = vpop.f32.mrf.mxu0 }
 0x491   : > { %v3650_v44 = vadd.f32 %v3649_v17, %v3471_v31  ;;  %v3474_v5 = vpop.f32.mrf.mxu1 }
 0x492   : > { %v3718_v23 = vmul.f32 %v3561_v46, %v5234_v61 }
 0x493   : > { %v3719_v3 = vmul.f32 %v3650_v44, %v5234_v61 }
 0x494   : > { %3782 = vst [vmem:[%s5015_s8 + $0x5f0] sm:$0xff] %v3718_v23 }
 0x495   : > { %3783 = vst [vmem:[%s5015_s8 + $0x5f8] sm:$0xff] %v3719_v3 }
 0x497   : > { %v3563_v45 = vpop.f32.mrf.mxu2 }
 0x498   : > { %v3564_v36 = vadd.f32 %v3563_v45, %v3385_v26  ;;  %v3652_v1 = vpop.f32.mrf.mxu3  ;;  %v3387_v10 = vpop.f32.mrf.mxu0 }
 0x499   : > { %v3653_v24 = vadd.f32 %v3652_v1, %v3474_v5  ;;  %v3476_v53 = vpop.f32.mrf.mxu1 }
 0x49a   : > { %v3720_v58 = vmul.f32 %v3564_v36, %v5240_v43 }
 0x49b   : > { %v3721_v62 = vmul.f32 %v3653_v24, %v5240_v43 }
 0x49c   : > { %3784 = vst [vmem:[%s5015_s8 + $0x630] sm:$0xff] %v3720_v58 }
 0x49d   : > { %3785 = vst [vmem:[%s5015_s8 + $0x638] sm:$0xff] %v3721_v62 }
 0x49f   : > { %v3565_v21 = vpop.f32.mrf.mxu2 }
 0x4a0   : > { %v3566_v57 = vadd.f32 %v3565_v21, %v3387_v10  ;;  %v3654_v54 = vpop.f32.mrf.mxu3  ;;  %v3390_v61 = vpop.f32.mrf.mxu0 }
 0x4a1   : > { %v3655_v39 = vadd.f32 %v3654_v54, %v3476_v53  ;;  %v3479_v20 = vpop.f32.mrf.mxu1 }
 0x4a2   : > { %v3722_v59 = vmul.f32 %v3566_v57, %v5251_v37 }
 0x4a3   : > { %v3723_v42 = vmul.f32 %v3655_v39, %v5251_v37 }
 0x4a4   : > { %3786 = vst [vmem:[%s5015_s8 + $0x670] sm:$0xff] %v3722_v59 }
 0x4a5   : > { %3787 = vst [vmem:[%s5015_s8 + $0x678] sm:$0xff] %v3723_v42 }
 0x4a7   : > { %v3568_v12 = vpop.f32.mrf.mxu2 }
 0x4a8   : > { %v3569_v29 = vadd.f32 %v3568_v12, %v3390_v61  ;;  %v3657_v9 = vpop.f32.mrf.mxu3  ;;  %v3392_v43 = vpop.f32.mrf.mxu0 }
 0x4a9   : > { %v3658_v25 = vadd.f32 %v3657_v9, %v3479_v20  ;;  %v3481_v35 = vpop.f32.mrf.mxu1 }
 0x4aa   : > { %v3724_v2 = vmul.f32 %v3569_v29, %v5257_v4 }
 0x4ab   : > { %v3725_v33 = vmul.f32 %v3658_v25, %v5257_v4 }
 0x4ac   : > { %3788 = vst [vmem:[%s5015_s8 + $0x6b0] sm:$0xff] %v3724_v2 }
 0x4ad   : > { %3789 = vst [vmem:[%s5015_s8 + $0x6b8] sm:$0xff] %v3725_v33 }
 0x4af   : > { %v3570_v41 = vpop.f32.mrf.mxu2 }
 0x4b0   : > { %v3571_v22 = vadd.f32 %v3570_v41, %v3392_v43  ;;  %v3659_v37 = vpop.f32.mrf.mxu3  ;;  %v3395_v47 = vpop.f32.mrf.mxu0 }
 0x4b1   : > { %v3660_v40 = vadd.f32 %v3659_v37, %v3481_v35  ;;  %v3484_v56 = vpop.f32.mrf.mxu1 }
 0x4b2   : > { %v3726_v50 = vmul.f32 %v3571_v22, %v5265_v18 }
 0x4b3   : > { %v3727_v32 = vmul.f32 %v3660_v40, %v5265_v18 }
 0x4b4   : > { %3790 = vst [vmem:[%s5015_s8 + $0x6f0] sm:$0xff] %v3726_v50 }
 0x4b5   : > { %3791 = vst [vmem:[%s5015_s8 + $0x6f8] sm:$0xff] %v3727_v32 }
 0x4b7   : > { %v3573_v63 = vpop.f32.mrf.mxu2 }
 0x4b8   : > { %v3574_v30 = vadd.f32 %v3573_v63, %v3395_v47  ;;  %v3662_v4 = vpop.f32.mrf.mxu3  ;;  %v3397_v11 = vpop.f32.mrf.mxu0 }
 0x4b9   : > { %v3663_v6 = vadd.f32 %v3662_v4, %v3484_v56  ;;  %v3486_v51 = vpop.f32.mrf.mxu1 }
 0x4ba   : > { %v3728_v60 = vmul.f32 %v3574_v30, %v5271_v15 }
 0x4bb   : > { %v3729_v49 = vmul.f32 %v3663_v6, %v5271_v15 }
 0x4bc   : > { %3792 = vst [vmem:[%s5015_s8 + $0x730] sm:$0xff] %v3728_v60 }
 0x4bd   : > { %3793 = vst [vmem:[%s5015_s8 + $0x738] sm:$0xff] %v3729_v49 }
 0x4bf   : > { %v3575_v0 = vpop.f32.mrf.mxu2 }
 0x4c0   : > { %v3576_v19 = vadd.f32 %v3575_v0, %v3397_v11  ;;  %v3664_v18 = vpop.f32.mrf.mxu3  ;;  %v3400_v38 = vpop.f32.mrf.mxu0 }
 0x4c1   : > { %v3665_v13 = vadd.f32 %v3664_v18, %v3486_v51  ;;  %v3489_v15 = vpop.f32.mrf.mxu1 }
 0x4c2   : > { %v3730_v7 = vmul.f32 %v3576_v19, %v5282_v8 }
 0x4c3   : > { %v3731_v34 = vmul.f32 %v3665_v13, %v5282_v8 }
 0x4c4   : > { %3794 = vst [vmem:[%s5015_s8 + $0x770] sm:$0xff] %v3730_v7 }
 0x4c5   : > { %3795 = vst [vmem:[%s5015_s8 + $0x778] sm:$0xff] %v3731_v34 }
 0x4c7   : > { %v3578_v48 = vpop.f32.mrf.mxu2 }
 0x4c8   : > { %v3579_v52 = vadd.f32 %v3578_v48, %v3400_v38  ;;  %v3667_v31 = vpop.f32.mrf.mxu3  ;;  %v3402_v8 = vpop.f32.mrf.mxu0 }
 0x4c9   : > { %v3668_v28 = vadd.f32 %v3667_v31, %v3489_v15  ;;  %v3491_v17 = vpop.f32.mrf.mxu1 }
 0x4ca   : > { %v3732_v55 = vmul.f32 %v3579_v52, %v5288_v16 }
 0x4cb   : > { %v3733_v27 = vmul.f32 %v3668_v28, %v5288_v16 }
 0x4cc   : > { %3796 = vst [vmem:[%s5015_s8 + $0x7b0] sm:$0xff] %v3732_v55 }
 0x4cd   : > { %3797 = vst [vmem:[%s5015_s8 + $0x7b8] sm:$0xff] %v3733_v27 }
 0x4cf   : > { %v3580_v46 = vpop.f32.mrf.mxu2 }
 0x4d0   : > { %v3581_v26 = vadd.f32 %v3580_v46, %v3402_v8  ;;  %v3669_v44 = vpop.f32.mrf.mxu3 }
 0x4d1   : > { %v3670_v5 = vadd.f32 %v3669_v44, %v3491_v17 }
 0x4d2   : > { %v3734_v16 = vmul.f32 %v3581_v26, %v5296_v14 }
 0x4d3   : > { %v3735_v23 = vmul.f32 %v3670_v5, %v5296_v14 }
 0x4d4   : > { %3798 = vst [vmem:[%s5015_s8 + $0x7f0] sm:$0xff] %v3734_v16 }
 0x4d5   : > { %3799 = vst [vmem:[%s5015_s8 + $0x7f8] sm:$0xff] %v3735_v23 }
 0x4d6   : > { %4590 = shalt.err (!%p4587_p3)
}
 0x4d7   : > { %s4658_s21 = smov 1024   ;;  %s4659_s30 = smov 64  }
 0x4d8   : > { %4390 = dma.vmem_to_hbm [thread:$0]  (%p4768_p7), %s3817_s13, 32768, %s3819_s24, %s3801_s18, %s4658_s21, %s4658_s21, %s4659_s30  }
 0x4d9 PF: > { %s3833_s22 = sand.u32 1, %s4629_s15   ;;  %p4404_p5 = pnand %p3942_p11, %p4734_p6 }
 0x4da   : > { %s3834_s29 = scalar_lea.sflag [#allocation4], %s3833_s22 }
 0x4db   : > { %p4405_p9 = pneg %p4404_p5 }
 0x4dd   : > { %4624 = dma.done.wait (%p4405_p9), %s3834_s29, 32768  }
 0x4de   : > { %4626 = vsyncadd (%p4405_p9), %s3834_s29, 4294934528  ;;  %s21_s20 = sadd.s32 1, %s4649_s20   ;;  %s5903_s15 = smov %s4633_s16 }
 0x4df   : > { %p18_p2 = scmp.ge.s32.totalorder %s21_s20, 4   ;;  %s5904_s16 = smov %s4637_s17 }
 0x4e0   : > { %s5905_s17 = smov %s4777_s7  ;;  %s5906_s18 = smov %s4645_s19 }
 0x4e1   : > { %s5907_s19 = smov %s5909_s14  ;;  %20 = sbr.rel (!%p18_p2) target bundleno = 10 (0xa), region = 92 }
 0x4e6   :  { %3840 = vsyncpa [#allocation3], 1 }
 0x4e7   :  { %3842 = vsyncpa [#allocation3 + $0x1], 1 }
 0x4e8   :  { %3843 = vsyncpa [#allocation6], 1 }
 0x4e9   :  { %3844 = vsyncpa [#allocation4], 1 }
 0x4ea   :  { %3846 = vsyncpa [#allocation4 + $0x1], 1 }

</bundles_post_ra>
